<compile_context>
chip_gen: v6e
topology: v6e:2x2x1
jax: 0.10.0
libtpu: 0.0.40
codegen_flags: <defaults>
</compile_context>

<pallas_src>
import functools

import jax
import jax.numpy as jnp
import numpy as np
from jax.experimental import pallas as pl
from jax.experimental.pallas import tpu as pltpu

EPS = 1e-5
_VMEM_LIMIT = 48 * 1024 * 1024


def _round_up(n, m):
    return ((n + m - 1) // m) * m


# ---------------------------------------------------------------------------
# In-kernel block: fused (Linear || Linear-skip) + LayerNorm + SiLU + add
# ---------------------------------------------------------------------------
def _block_compute(x, w_ref, b_ref, aff_ref, dout, dp):
    """silu(LN(x @ Wm + bm)) + (x @ Ws + bs) with (Wm || Ws) fused in w_ref.

    x: (tm, Din_pad) in the MXU compute dtype; columns >= true Din are zero.
    Returns f32 (tm, dp); columns >= dout are exactly zero (padded gamma/beta,
    padded weights and biases are zero), so the result can feed the next block
    directly.
    """
    # Single wide MXU matmul covering both the MLP and the skip projection.
    y = jnp.dot(x, w_ref[...], preferred_element_type=jnp.float32) + b_ref[...]
    h = y[:, :dp]       # MLP path
    skip = y[:, dp:]    # skip path

    # Custom LayerNorm: (h - mean) / (std + eps) * gamma + beta, unbiased=False.
    # Padded columns contribute 0 to the sums, so divide by the true dout.
    inv_d = 1.0 / dout
    s1 = jnp.sum(h, axis=-1, keepdims=True)
    s2 = jnp.sum(h * h, axis=-1, keepdims=True)
    mean = s1 * inv_d
    var = jnp.maximum(s2 * inv_d - mean * mean, 0.0)
    rinv = pl.reciprocal(jnp.sqrt(var) + EPS, approx=True)      # EUP slot
    gamma = aff_ref[0:1, :]
    beta = aff_ref[1:2, :]
    ln = (h - mean) * rinv * gamma + beta

    # SiLU (Dropout = identity in eval) + skip add.
    return ln * jax.nn.sigmoid(ln) + skip


def _head_kernel(x_ref, *refs, douts, dps, compute_dtype):
    """Whole LargeFormer MLP head for one row tile (all weights VMEM-resident)."""
    n_blocks = len(douts)
    block_refs = refs[: 3 * n_blocks]
    wo_ref, bo_ref, o_ref = refs[3 * n_blocks:]

    x = x_ref[...]                              # (tm, Din0_pad) compute_dtype
    for k in range(n_blocks):
        w_ref, b_ref, aff_ref = block_refs[3 * k: 3 * k + 3]
        y = _block_compute(x, w_ref, b_ref, aff_ref, douts[k], dps[k])   # f32
        # Cast back to the MXU dtype only when feeding the next matmul.
        x = y.astype(compute_dtype) if k + 1 < n_blocks else y

    # Final head: Linear(K -> 1) + Sigmoid (reduce instead of a 1-wide matmul).
    # TODO(synk): num_classes > 1 would use a (K, C) MXU matmul here instead.
    logit = jnp.sum(x * wo_ref[...], axis=-1, keepdims=True) + bo_ref[...]
    o_ref[...] = jax.nn.sigmoid(logit).astype(o_ref.dtype)


# ---------------------------------------------------------------------------
# Host-side wrapper
# ---------------------------------------------------------------------------
def _prep_block(params, din_pad, compute_dtype):
    """Fuse + lane-pad one MLPwithSkipConnection's parameters."""
    w_mlp, b_mlp, gamma, beta, w_skip, b_skip = params
    din, dout = w_mlp.shape
    dp = _round_up(dout, 128)

    def pad_mat(a):          # (din, dout) -> (din_pad, dp), zero-padded
        return jnp.pad(a, ((0, din_pad - din), (0, dp - dout)))

    def pad_vec(v):          # (dout,) -> (1, dp), zero-padded
        return jnp.pad(v.reshape(1, dout), ((0, 0), (0, dp - dout)))

    w_cat = jnp.concatenate([pad_mat(w_mlp), pad_mat(w_skip)],
                            axis=1).astype(compute_dtype)             # (din_pad, 2*dp)
    b_cat = jnp.concatenate([pad_vec(b_mlp), pad_vec(b_skip)],
                            axis=1).astype(jnp.float32)               # (1, 2*dp)
    aff = jnp.concatenate([pad_vec(gamma), pad_vec(beta)],
                          axis=0).astype(jnp.float32)                 # (2, dp)
    return w_cat, b_cat, aff, dout, dp


@functools.partial(jax.jit, static_argnames=("tm", "compute_dtype"))
def largeformer_head(feats, blocks, w_out, b_out, *, tm=256,
                     compute_dtype=jnp.bfloat16):
    """LargeFormer.mlp + sigmoid applied to ViT backbone features, one kernel."""
    m, din0 = feats.shape
    din0_pad = _round_up(din0, 128)

    # Pack / pad all block parameters; chain the padded widths between blocks.
    prepped, douts, dps = [], [], []
    din_pad = din0_pad
    for params in blocks:
        w_cat, b_cat, aff, dout, dp = _prep_block(params, din_pad, compute_dtype)
        prepped += [w_cat, b_cat, aff]
        douts.append(dout)
        dps.append(dp)
        din_pad = dp

    k_fin = w_out.shape[0]
    w_row = jnp.pad(w_out.reshape(1, k_fin),
                    ((0, 0), (0, dps[-1] - k_fin))).astype(jnp.float32)   # (1, dp_last)
    b_fin = b_out.reshape(1, 1).astype(jnp.float32)                        # (1, 1)

    # Row tiling: large tiles, ragged M handled by zero-padded rows (dropped below).
    tm_eff = min(tm, _round_up(m, 8))
    m_pad = _round_up(m, tm_eff)
    xc = feats.astype(compute_dtype)
    if (m_pad != m) or (din0_pad != din0):
        xc = jnp.pad(xc, ((0, m_pad - m), (0, din0_pad - din0)))

    in_specs = [pl.BlockSpec((tm_eff, din0_pad), lambda i: (i, 0))]   # x row tile
    for arr in prepped:                                               # weights/biases/affine
        in_specs.append(pl.BlockSpec(arr.shape, lambda i: (0, 0)))
    in_specs += [pl.BlockSpec(w_row.shape, lambda i: (0, 0)),
                 pl.BlockSpec(b_fin.shape, lambda i: (0, 0))]

    out = pl.pallas_call(
        functools.partial(_head_kernel, douts=tuple(douts), dps=tuple(dps),
                          compute_dtype=compute_dtype),
        out_shape=jax.ShapeDtypeStruct((m_pad, 1), feats.dtype),
        grid_spec=pltpu.PrefetchScalarGridSpec(
            num_scalar_prefetch=0,
            grid=(m_pad // tm_eff,),
            in_specs=in_specs,
            out_specs=pl.BlockSpec((tm_eff, 1), lambda i: (i, 0)),
        ),
        compiler_params=pltpu.CompilerParams(
            dimension_semantics=("parallel",),
            vmem_limit_bytes=_VMEM_LIMIT,
        ),
    )(xc, *prepped, w_row, b_fin)

    return out[:m] if m_pad != m else out


# ---------------------------------------------------------------------------
# Pure-JAX references (mirror the bf16 matmul quantization of the kernel).
# ---------------------------------------------------------------------------
def _mlp_block_ref(x, w_mlp, b_mlp, gamma, beta, w_skip, b_skip,
                   compute_dtype=jnp.bfloat16):
    xc = x.astype(compute_dtype)
    h = jnp.dot(xc, w_mlp.astype(compute_dtype),
                preferred_element_type=jnp.float32) + b_mlp
    mean = jnp.mean(h, axis=-1, keepdims=True)
    std = jnp.sqrt(jnp.mean((h - mean) ** 2, axis=-1, keepdims=True))
    ln = (h - mean) / (std + EPS) * gamma + beta
    act = ln * jax.nn.sigmoid(ln)
    skip = jnp.dot(xc, w_skip.astype(compute_dtype),
                   preferred_element_type=jnp.float32) + b_skip
    return act + skip


def _head_ref(feats, blocks, w_out, b_out):
    x = feats
    for params in blocks:
        x = _mlp_block_ref(x, *params)
    return jax.nn.sigmoid(x @ w_out + b_out)


if __name__ == "__main__":
    key = jax.random.PRNGKey(0)
    n, vit_dim = 20, 768                          # batch of ViT-B/16 features
    dims = [(768, 512), (512, 84), (84, 16)]      # LargeFormer MLP head widths

    key, kx = jax.random.split(key)
    feats = jax.random.normal(kx, (n, vit_dim), dtype=jnp.float32)

    blocks = []
    for din, dout in dims:
        key, k1, k2, k3, k4, k5, k6 = jax.random.split(key, 7)
        blocks.append((
            jax.random.normal(k1, (din, dout), jnp.float32) / np.sqrt(din),   # W_mlp
            jax.random.normal(k2, (dout,), jnp.float32) * 0.01,               # b_mlp
            1.0 + 0.1 * jax.random.normal(k3, (dout,), jnp.float32),          # gamma
            0.05 * jax.random.normal(k4, (dout,), jnp.float32),               # beta
            jax.random.normal(k5, (din, dout), jnp.float32) / np.sqrt(din),   # W_skip
            jax.random.normal(k6, (dout,), jnp.float32) * 0.01,               # b_skip
        ))
    key, k7, k8 = jax.random.split(key, 3)
    w_out = jax.random.normal(k7, (16, 1), jnp.float32) / np.sqrt(16.0)
    b_out = jax.random.normal(k8, (1,), jnp.float32) * 0.01

    # Full MLP head + sigmoid through the single fused Pallas kernel.
    out = jax.block_until_ready(largeformer_head(feats, blocks, w_out, b_out))
    ref = _head_ref(feats, blocks, w_out, b_out)
    np.testing.assert_allclose(np.asarray(out), np.asarray(ref), rtol=3e-2, atol=3e-2)

    # Extra check: multi-tile grid + ragged-row padding path (tm=256 -> grid=2).
    key, kb = jax.random.split(key)
    featsb = jax.random.normal(kb, (272, vit_dim), dtype=jnp.float32)
    outb = jax.block_until_ready(largeformer_head(featsb, blocks, w_out, b_out))
    refb = _head_ref(featsb, blocks, w_out, b_out)
    np.testing.assert_allclose(np.asarray(outb), np.asarray(refb), rtol=3e-2, atol=3e-2)

    print("KERNEL_OK")
</pallas_src>

<mosaic_0001>
module attributes {stable_mosaic.version = 11 : i64} {
  func.func @_head_kernel(%arg0: i32, %arg1: memref<24x768xbf16, #tpu.memory_space<vmem>>, %arg2: memref<768x1024xbf16, #tpu.memory_space<vmem>>, %arg3: memref<1x1024xf32, #tpu.memory_space<vmem>>, %arg4: memref<2x512xf32, #tpu.memory_space<vmem>>, %arg5: memref<512x256xbf16, #tpu.memory_space<vmem>>, %arg6: memref<1x256xf32, #tpu.memory_space<vmem>>, %arg7: memref<2x128xf32, #tpu.memory_space<vmem>>, %arg8: memref<128x256xbf16, #tpu.memory_space<vmem>>, %arg9: memref<1x256xf32, #tpu.memory_space<vmem>>, %arg10: memref<2x128xf32, #tpu.memory_space<vmem>>, %arg11: memref<1x128xf32, #tpu.memory_space<vmem>>, %arg12: memref<1x1xf32, #tpu.memory_space<vmem>>, %arg13: memref<24x1xf32, #tpu.memory_space<vmem>>) attributes {dimension_semantics = [#tpu.dimension_semantics<parallel>], iteration_bounds = array<i64: 1>, scalar_prefetch = 0 : i64, scratch_operands = 0 : i64, tpu.core_type = #tpu.core_type<tc>, window_params = [{transform_indices = @transform_0, window_bounds = array<i64: 24, 768>}, {pipeline_mode = #tpu.pipeline_mode<synchronous>, transform_indices = @transform_1, window_bounds = array<i64: 768, 1024>}, {pipeline_mode = #tpu.pipeline_mode<synchronous>, transform_indices = @transform_2, window_bounds = array<i64: 1, 1024>}, {pipeline_mode = #tpu.pipeline_mode<synchronous>, transform_indices = @transform_3, window_bounds = array<i64: 2, 512>}, {pipeline_mode = #tpu.pipeline_mode<synchronous>, transform_indices = @transform_4, window_bounds = array<i64: 512, 256>}, {pipeline_mode = #tpu.pipeline_mode<synchronous>, transform_indices = @transform_5, window_bounds = array<i64: 1, 256>}, {pipeline_mode = #tpu.pipeline_mode<synchronous>, transform_indices = @transform_6, window_bounds = array<i64: 2, 128>}, {pipeline_mode = #tpu.pipeline_mode<synchronous>, transform_indices = @transform_7, window_bounds = array<i64: 128, 256>}, {pipeline_mode = #tpu.pipeline_mode<synchronous>, transform_indices = @transform_8, window_bounds = array<i64: 1, 256>}, {pipeline_mode = #tpu.pipeline_mode<synchronous>, transform_indices = @transform_9, window_bounds = array<i64: 2, 128>}, {pipeline_mode = #tpu.pipeline_mode<synchronous>, transform_indices = @transform_10, window_bounds = array<i64: 1, 128>}, {pipeline_mode = #tpu.pipeline_mode<synchronous>, transform_indices = @transform_11, window_bounds = array<i64: 1, 1>}, {transform_indices = @transform_12, window_bounds = array<i64: 24, 1>}]} {
    %c0 = arith.constant 0 : index
    %c0_0 = arith.constant 0 : index
    %0 = vector.load %arg1[%c0, %c0_0] : memref<24x768xbf16, #tpu.memory_space<vmem>>, vector<24x768xbf16>
    %c0_1 = arith.constant 0 : index
    %c0_2 = arith.constant 0 : index
    %1 = vector.load %arg2[%c0_1, %c0_2] : memref<768x1024xbf16, #tpu.memory_space<vmem>>, vector<768x1024xbf16>
    %cst = arith.constant dense<0.000000e+00> : vector<24x1024xf32>
    %2 = tpu.matmul %0, %1, %cst {dimension_numbers = #tpu.dot_dimension_numbers<[1], [0], [0], [1], [0, 0, 1, 1], [], []>} : vector<24x768xbf16>, vector<768x1024xbf16>, vector<24x1024xf32> -> vector<24x1024xf32>
    %c0_3 = arith.constant 0 : index
    %c0_4 = arith.constant 0 : index
    %3 = vector.load %arg3[%c0_3, %c0_4] : memref<1x1024xf32, #tpu.memory_space<vmem>>, vector<1x1024xf32>
    %4 = vector.broadcast %3 : vector<1x1024xf32> to vector<24x1024xf32>
    %5 = arith.addf %2, %4 : vector<24x1024xf32>
    %6 = vector.extract_strided_slice %5 {offsets = [0, 0], sizes = [24, 512], strides = [1, 1]} : vector<24x1024xf32> to vector<24x512xf32>
    %7 = vector.extract_strided_slice %5 {offsets = [0, 512], sizes = [24, 512], strides = [1, 1]} : vector<24x1024xf32> to vector<24x512xf32>
    %cst_5 = arith.constant dense<0.000000e+00> : vector<24xf32>
    %8 = vector.multi_reduction <add>, %6, %cst_5 [1] : vector<24x512xf32> to vector<24xf32>
    %9 = vector.shape_cast %8 : vector<24xf32> to vector<24x1xf32>
    %10 = arith.mulf %6, %6 : vector<24x512xf32>
    %cst_6 = arith.constant dense<0.000000e+00> : vector<24xf32>
    %11 = vector.multi_reduction <add>, %10, %cst_6 [1] : vector<24x512xf32> to vector<24xf32>
    %12 = vector.shape_cast %11 : vector<24xf32> to vector<24x1xf32>
    %cst_7 = arith.constant 0.001953125 : f32
    %13 = vector.broadcast %cst_7 : f32 to vector<24x1xf32>
    %14 = arith.mulf %9, %13 : vector<24x1xf32>
    %cst_8 = arith.constant 0.001953125 : f32
    %15 = vector.broadcast %cst_8 : f32 to vector<24x1xf32>
    %16 = arith.mulf %12, %15 : vector<24x1xf32>
    %17 = arith.mulf %14, %14 : vector<24x1xf32>
    %18 = arith.subf %16, %17 : vector<24x1xf32>
    %cst_9 = arith.constant 0.000000e+00 : f32
    %19 = vector.broadcast %cst_9 : f32 to vector<24x1xf32>
    %20 = arith.maximumf %18, %19 : vector<24x1xf32>
    %21 = math.sqrt %20 : vector<24x1xf32>
    %cst_10 = arith.constant 9.99999974E-6 : f32
    %22 = vector.broadcast %cst_10 : f32 to vector<24x1xf32>
    %23 = arith.addf %21, %22 : vector<24x1xf32>
    %24 = tpu.reciprocal %23 {approx = true} : vector<24x1xf32> -> vector<24x1xf32>
    %c0_11 = arith.constant 0 : index
    %c0_12 = arith.constant 0 : index
    %25 = vector.load %arg4[%c0_11, %c0_12] : memref<2x512xf32, #tpu.memory_space<vmem>>, vector<1x512xf32>
    %c1 = arith.constant 1 : index
    %c0_13 = arith.constant 0 : index
    %26 = vector.load %arg4[%c1, %c0_13] : memref<2x512xf32, #tpu.memory_space<vmem>>, vector<1x512xf32>
    %27 = vector.broadcast %14 : vector<24x1xf32> to vector<24x512xf32>
    %28 = arith.subf %6, %27 : vector<24x512xf32>
    %29 = vector.broadcast %24 : vector<24x1xf32> to vector<24x512xf32>
    %30 = arith.mulf %28, %29 : vector<24x512xf32>
    %31 = vector.broadcast %25 : vector<1x512xf32> to vector<24x512xf32>
    %32 = arith.mulf %30, %31 : vector<24x512xf32>
    %33 = vector.broadcast %26 : vector<1x512xf32> to vector<24x512xf32>
    %34 = arith.addf %32, %33 : vector<24x512xf32>
    %35 = arith.negf %34 : vector<24x512xf32>
    %36 = math.exp %35 : vector<24x512xf32>
    %cst_14 = arith.constant 1.000000e+00 : f32
    %37 = vector.broadcast %cst_14 : f32 to vector<24x512xf32>
    %38 = arith.addf %37, %36 : vector<24x512xf32>
    %39 = arith.divf %37, %38 : vector<24x512xf32>
    %40 = arith.mulf %34, %39 : vector<24x512xf32>
    %41 = arith.addf %40, %7 : vector<24x512xf32>
    %42 = arith.truncf %41 : vector<24x512xf32> to vector<24x512xbf16>
    %c0_15 = arith.constant 0 : index
    %c0_16 = arith.constant 0 : index
    %43 = vector.load %arg5[%c0_15, %c0_16] : memref<512x256xbf16, #tpu.memory_space<vmem>>, vector<512x256xbf16>
    %cst_17 = arith.constant dense<0.000000e+00> : vector<24x256xf32>
    %44 = tpu.matmul %42, %43, %cst_17 {dimension_numbers = #tpu.dot_dimension_numbers<[1], [0], [0], [1], [0, 0, 1, 1], [], []>} : vector<24x512xbf16>, vector<512x256xbf16>, vector<24x256xf32> -> vector<24x256xf32>
    %c0_18 = arith.constant 0 : index
    %c0_19 = arith.constant 0 : index
    %45 = vector.load %arg6[%c0_18, %c0_19] : memref<1x256xf32, #tpu.memory_space<vmem>>, vector<1x256xf32>
    %46 = vector.broadcast %45 : vector<1x256xf32> to vector<24x256xf32>
    %47 = arith.addf %44, %46 : vector<24x256xf32>
    %48 = vector.extract_strided_slice %47 {offsets = [0, 0], sizes = [24, 128], strides = [1, 1]} : vector<24x256xf32> to vector<24x128xf32>
    %49 = vector.extract_strided_slice %47 {offsets = [0, 128], sizes = [24, 128], strides = [1, 1]} : vector<24x256xf32> to vector<24x128xf32>
    %cst_20 = arith.constant dense<0.000000e+00> : vector<24xf32>
    %50 = vector.multi_reduction <add>, %48, %cst_20 [1] : vector<24x128xf32> to vector<24xf32>
    %51 = vector.shape_cast %50 : vector<24xf32> to vector<24x1xf32>
    %52 = arith.mulf %48, %48 : vector<24x128xf32>
    %cst_21 = arith.constant dense<0.000000e+00> : vector<24xf32>
    %53 = vector.multi_reduction <add>, %52, %cst_21 [1] : vector<24x128xf32> to vector<24xf32>
    %54 = vector.shape_cast %53 : vector<24xf32> to vector<24x1xf32>
    %cst_22 = arith.constant 0.0119047621 : f32
    %55 = vector.broadcast %cst_22 : f32 to vector<24x1xf32>
    %56 = arith.mulf %51, %55 : vector<24x1xf32>
    %cst_23 = arith.constant 0.0119047621 : f32
    %57 = vector.broadcast %cst_23 : f32 to vector<24x1xf32>
    %58 = arith.mulf %54, %57 : vector<24x1xf32>
    %59 = arith.mulf %56, %56 : vector<24x1xf32>
    %60 = arith.subf %58, %59 : vector<24x1xf32>
    %cst_24 = arith.constant 0.000000e+00 : f32
    %61 = vector.broadcast %cst_24 : f32 to vector<24x1xf32>
    %62 = arith.maximumf %60, %61 : vector<24x1xf32>
    %63 = math.sqrt %62 : vector<24x1xf32>
    %cst_25 = arith.constant 9.99999974E-6 : f32
    %64 = vector.broadcast %cst_25 : f32 to vector<24x1xf32>
    %65 = arith.addf %63, %64 : vector<24x1xf32>
    %66 = tpu.reciprocal %65 {approx = true} : vector<24x1xf32> -> vector<24x1xf32>
    %c0_26 = arith.constant 0 : index
    %c0_27 = arith.constant 0 : index
    %67 = vector.load %arg7[%c0_26, %c0_27] : memref<2x128xf32, #tpu.memory_space<vmem>>, vector<1x128xf32>
    %c1_28 = arith.constant 1 : index
    %c0_29 = arith.constant 0 : index
    %68 = vector.load %arg7[%c1_28, %c0_29] : memref<2x128xf32, #tpu.memory_space<vmem>>, vector<1x128xf32>
    %69 = vector.broadcast %56 : vector<24x1xf32> to vector<24x128xf32>
    %70 = arith.subf %48, %69 : vector<24x128xf32>
    %71 = vector.broadcast %66 : vector<24x1xf32> to vector<24x128xf32>
    %72 = arith.mulf %70, %71 : vector<24x128xf32>
    %73 = vector.broadcast %67 : vector<1x128xf32> to vector<24x128xf32>
    %74 = arith.mulf %72, %73 : vector<24x128xf32>
    %75 = vector.broadcast %68 : vector<1x128xf32> to vector<24x128xf32>
    %76 = arith.addf %74, %75 : vector<24x128xf32>
    %77 = arith.negf %76 : vector<24x128xf32>
    %78 = math.exp %77 : vector<24x128xf32>
    %cst_30 = arith.constant 1.000000e+00 : f32
    %79 = vector.broadcast %cst_30 : f32 to vector<24x128xf32>
    %80 = arith.addf %79, %78 : vector<24x128xf32>
    %81 = arith.divf %79, %80 : vector<24x128xf32>
    %82 = arith.mulf %76, %81 : vector<24x128xf32>
    %83 = arith.addf %82, %49 : vector<24x128xf32>
    %84 = arith.truncf %83 : vector<24x128xf32> to vector<24x128xbf16>
    %c0_31 = arith.constant 0 : index
    %c0_32 = arith.constant 0 : index
    %85 = vector.load %arg8[%c0_31, %c0_32] : memref<128x256xbf16, #tpu.memory_space<vmem>>, vector<128x256xbf16>
    %cst_33 = arith.constant dense<0.000000e+00> : vector<24x256xf32>
    %86 = tpu.matmul %84, %85, %cst_33 {dimension_numbers = #tpu.dot_dimension_numbers<[1], [0], [0], [1], [0, 0, 1, 1], [], []>} : vector<24x128xbf16>, vector<128x256xbf16>, vector<24x256xf32> -> vector<24x256xf32>
    %c0_34 = arith.constant 0 : index
    %c0_35 = arith.constant 0 : index
    %87 = vector.load %arg9[%c0_34, %c0_35] : memref<1x256xf32, #tpu.memory_space<vmem>>, vector<1x256xf32>
    %88 = vector.broadcast %87 : vector<1x256xf32> to vector<24x256xf32>
    %89 = arith.addf %86, %88 : vector<24x256xf32>
    %90 = vector.extract_strided_slice %89 {offsets = [0, 0], sizes = [24, 128], strides = [1, 1]} : vector<24x256xf32> to vector<24x128xf32>
    %91 = vector.extract_strided_slice %89 {offsets = [0, 128], sizes = [24, 128], strides = [1, 1]} : vector<24x256xf32> to vector<24x128xf32>
    %cst_36 = arith.constant dense<0.000000e+00> : vector<24xf32>
    %92 = vector.multi_reduction <add>, %90, %cst_36 [1] : vector<24x128xf32> to vector<24xf32>
    %93 = vector.shape_cast %92 : vector<24xf32> to vector<24x1xf32>
    %94 = arith.mulf %90, %90 : vector<24x128xf32>
    %cst_37 = arith.constant dense<0.000000e+00> : vector<24xf32>
    %95 = vector.multi_reduction <add>, %94, %cst_37 [1] : vector<24x128xf32> to vector<24xf32>
    %96 = vector.shape_cast %95 : vector<24xf32> to vector<24x1xf32>
    %cst_38 = arith.constant 6.250000e-02 : f32
    %97 = vector.broadcast %cst_38 : f32 to vector<24x1xf32>
    %98 = arith.mulf %93, %97 : vector<24x1xf32>
    %cst_39 = arith.constant 6.250000e-02 : f32
    %99 = vector.broadcast %cst_39 : f32 to vector<24x1xf32>
    %100 = arith.mulf %96, %99 : vector<24x1xf32>
    %101 = arith.mulf %98, %98 : vector<24x1xf32>
    %102 = arith.subf %100, %101 : vector<24x1xf32>
    %cst_40 = arith.constant 0.000000e+00 : f32
    %103 = vector.broadcast %cst_40 : f32 to vector<24x1xf32>
    %104 = arith.maximumf %102, %103 : vector<24x1xf32>
    %105 = math.sqrt %104 : vector<24x1xf32>
    %cst_41 = arith.constant 9.99999974E-6 : f32
    %106 = vector.broadcast %cst_41 : f32 to vector<24x1xf32>
    %107 = arith.addf %105, %106 : vector<24x1xf32>
    %108 = tpu.reciprocal %107 {approx = true} : vector<24x1xf32> -> vector<24x1xf32>
    %c0_42 = arith.constant 0 : index
    %c0_43 = arith.constant 0 : index
    %109 = vector.load %arg10[%c0_42, %c0_43] : memref<2x128xf32, #tpu.memory_space<vmem>>, vector<1x128xf32>
    %c1_44 = arith.constant 1 : index
    %c0_45 = arith.constant 0 : index
    %110 = vector.load %arg10[%c1_44, %c0_45] : memref<2x128xf32, #tpu.memory_space<vmem>>, vector<1x128xf32>
    %111 = vector.broadcast %98 : vector<24x1xf32> to vector<24x128xf32>
    %112 = arith.subf %90, %111 : vector<24x128xf32>
    %113 = vector.broadcast %108 : vector<24x1xf32> to vector<24x128xf32>
    %114 = arith.mulf %112, %113 : vector<24x128xf32>
    %115 = vector.broadcast %109 : vector<1x128xf32> to vector<24x128xf32>
    %116 = arith.mulf %114, %115 : vector<24x128xf32>
    %117 = vector.broadcast %110 : vector<1x128xf32> to vector<24x128xf32>
    %118 = arith.addf %116, %117 : vector<24x128xf32>
    %119 = arith.negf %118 : vector<24x128xf32>
    %120 = math.exp %119 : vector<24x128xf32>
    %cst_46 = arith.constant 1.000000e+00 : f32
    %121 = vector.broadcast %cst_46 : f32 to vector<24x128xf32>
    %122 = arith.addf %121, %120 : vector<24x128xf32>
    %123 = arith.divf %121, %122 : vector<24x128xf32>
    %124 = arith.mulf %118, %123 : vector<24x128xf32>
    %125 = arith.addf %124, %91 : vector<24x128xf32>
    %c0_47 = arith.constant 0 : index
    %c0_48 = arith.constant 0 : index
    %126 = vector.load %arg11[%c0_47, %c0_48] : memref<1x128xf32, #tpu.memory_space<vmem>>, vector<1x128xf32>
    %127 = vector.broadcast %126 : vector<1x128xf32> to vector<24x128xf32>
    %128 = arith.mulf %125, %127 : vector<24x128xf32>
    %cst_49 = arith.constant dense<0.000000e+00> : vector<24xf32>
    %129 = vector.multi_reduction <add>, %128, %cst_49 [1] : vector<24x128xf32> to vector<24xf32>
    %130 = vector.shape_cast %129 : vector<24xf32> to vector<24x1xf32>
    %c0_50 = arith.constant 0 : index
    %c0_51 = arith.constant 0 : index
    %131 = vector.load %arg12[%c0_50, %c0_51] : memref<1x1xf32, #tpu.memory_space<vmem>>, vector<1x1xf32>
    %132 = vector.broadcast %131 : vector<1x1xf32> to vector<24x1xf32>
    %133 = arith.addf %130, %132 : vector<24x1xf32>
    %134 = arith.negf %133 : vector<24x1xf32>
    %135 = math.exp %134 : vector<24x1xf32>
    %cst_52 = arith.constant 1.000000e+00 : f32
    %136 = vector.broadcast %cst_52 : f32 to vector<24x1xf32>
    %137 = arith.addf %136, %135 : vector<24x1xf32>
    %138 = arith.divf %136, %137 : vector<24x1xf32>
    %c0_53 = arith.constant 0 : index
    %c0_54 = arith.constant 0 : index
    %139 = vector.load %arg13[%c0_53, %c0_54] : memref<24x1xf32, #tpu.memory_space<vmem>>, vector<24x1xf32>
    tpu.vector_store %arg13[%c0_53, %c0_54], %138 {strides = array<i32>} : memref<24x1xf32, #tpu.memory_space<vmem>>, vector<24x1xf32>,
    return
  }
  func.func @transform_0(%arg0: i32) -> (i32, i32) {
    %c0_i32 = arith.constant 0 : i32
    %c0_i32_0 = arith.constant 0 : i32
    return %arg0, %c0_i32 : i32, i32
  }
  func.func @transform_1(%arg0: i32) -> (i32, i32) {
    %c0_i32 = arith.constant 0 : i32
    %c0_i32_0 = arith.constant 0 : i32
    %c0_i32_1 = arith.constant 0 : i32
    return %c0_i32, %c0_i32_0 : i32, i32
  }
  func.func @transform_2(%arg0: i32) -> (i32, i32) {
    %c0_i32 = arith.constant 0 : i32
    %c0_i32_0 = arith.constant 0 : i32
    %c0_i32_1 = arith.constant 0 : i32
    return %c0_i32, %c0_i32_0 : i32, i32
  }
  func.func @transform_3(%arg0: i32) -> (i32, i32) {
    %c0_i32 = arith.constant 0 : i32
    %c0_i32_0 = arith.constant 0 : i32
    %c0_i32_1 = arith.constant 0 : i32
    return %c0_i32, %c0_i32_0 : i32, i32
  }
  func.func @transform_4(%arg0: i32) -> (i32, i32) {
    %c0_i32 = arith.constant 0 : i32
    %c0_i32_0 = arith.constant 0 : i32
    %c0_i32_1 = arith.constant 0 : i32
    return %c0_i32, %c0_i32_0 : i32, i32
  }
  func.func @transform_5(%arg0: i32) -> (i32, i32) {
    %c0_i32 = arith.constant 0 : i32
    %c0_i32_0 = arith.constant 0 : i32
    %c0_i32_1 = arith.constant 0 : i32
    return %c0_i32, %c0_i32_0 : i32, i32
  }
  func.func @transform_6(%arg0: i32) -> (i32, i32) {
    %c0_i32 = arith.constant 0 : i32
    %c0_i32_0 = arith.constant 0 : i32
    %c0_i32_1 = arith.constant 0 : i32
    return %c0_i32, %c0_i32_0 : i32, i32
  }
  func.func @transform_7(%arg0: i32) -> (i32, i32) {
    %c0_i32 = arith.constant 0 : i32
    %c0_i32_0 = arith.constant 0 : i32
    %c0_i32_1 = arith.constant 0 : i32
    return %c0_i32, %c0_i32_0 : i32, i32
  }
  func.func @transform_8(%arg0: i32) -> (i32, i32) {
    %c0_i32 = arith.constant 0 : i32
    %c0_i32_0 = arith.constant 0 : i32
    %c0_i32_1 = arith.constant 0 : i32
    return %c0_i32, %c0_i32_0 : i32, i32
  }
  func.func @transform_9(%arg0: i32) -> (i32, i32) {
    %c0_i32 = arith.constant 0 : i32
    %c0_i32_0 = arith.constant 0 : i32
    %c0_i32_1 = arith.constant 0 : i32
    return %c0_i32, %c0_i32_0 : i32, i32
  }
  func.func @transform_10(%arg0: i32) -> (i32, i32) {
    %c0_i32 = arith.constant 0 : i32
    %c0_i32_0 = arith.constant 0 : i32
    %c0_i32_1 = arith.constant 0 : i32
    return %c0_i32, %c0_i32_0 : i32, i32
  }
  func.func @transform_11(%arg0: i32) -> (i32, i32) {
    %c0_i32 = arith.constant 0 : i32
    %c0_i32_0 = arith.constant 0 : i32
    %c0_i32_1 = arith.constant 0 : i32
    return %c0_i32, %c0_i32_0 : i32, i32
  }
  func.func @transform_12(%arg0: i32) -> (i32, i32) {
    %c0_i32 = arith.constant 0 : i32
    %c0_i32_0 = arith.constant 0 : i32
    return %arg0, %c0_i32 : i32, i32
  }
}

</mosaic_0001>

<bundles_post_ra>
// kernel: largeformer_head.1
= control target key start
LH: loop header
LB: loop body
LE: loop exit
PB: predicated region body
PF: predicated region fallthrough
CT: control target
= control target key end

     0   :  { %s7075_s1 = inlined_call_operand.vmem [shape: bf16[768,1024], index: 1, kind: input, shape index: {}]   ;;  %s7076_s0 = inlined_call_operand.vmem [shape: bf16[24,768], index: 0, kind: input, shape index: {}]   ;;  %s7077_s2 = inlined_call_operand.vmem [shape: f32[1,1024], index: 2, kind: input, shape index: {}]   ;;  %s7078_s4 = inlined_call_operand.vmem [shape: bf16[512,256], index: 4, kind: input, shape index: {}]   ;;  %s7079_s3 = inlined_call_operand.vmem [shape: f32[2,512], index: 3, kind: input, shape index: {}]   ;;  %s7080_s5 = inlined_call_operand.vmem [shape: f32[1,256], index: 5, kind: input, shape index: {}]   ;;  %s7081_s7 = inlined_call_operand.vmem [shape: bf16[128,256], index: 7, kind: input, shape index: {}]   ;;  %s7082_s6 = inlined_call_operand.vmem [shape: f32[2,128], index: 6, kind: input, shape index: {}]   ;;  %s7083_s8 = inlined_call_operand.vmem [shape: f32[1,256], index: 8, kind: input, shape index: {}]   ;;  %s7084_s11 = inlined_call_operand.<no memory space> [shape: f32[1,1], index: 11, kind: input, shape index: {}]   ;;  %s7085_s9 = inlined_call_operand.vmem [shape: f32[2,128], index: 9, kind: input, shape index: {}]   ;;  %s7086_s10 = inlined_call_operand.vmem [shape: f32[1,128], index: 10, kind: input, shape index: {}]   ;;  %s7087_s12 = inlined_call_operand.vmem [shape: f32[24,1], index: 12, kind: output, shape index: {}]  }
   0x1   :  { %v109_v0 = vld [vmem:[%s7075_s1 + $0x1c0] sm:$0xff] }
   0x2   :  { %v113_v1 = vld [vmem:[%s7075_s1 + $0x1e0] sm:$0xff] }
   0x3   :  { %v237_v2 = vld [vmem:[%s7075_s1 + $0x5c0] sm:$0xff]  ;;  %v4329_v3 = vcombine.high %v109_v0, %v113_v1  ;;  %v4328_v5 = vcombine.low %v109_v0, %v113_v1 }
   0x4   :  { %v241_v4 = vld [vmem:[%s7075_s1 + $0x5e0] sm:$0xff] }
   0x5   :  { %v101_v6 = vld [vmem:[%s7075_s1 + $0x180] sm:$0xff]  ;;  %v4457_v8 = vcombine.high %v237_v2, %v241_v4  ;;  %v4456_v9 = vcombine.low %v237_v2, %v241_v4  ;;  %2450 = vmatprep.subr.bf16.mxu0 %v4329_v3 }
   0x6   :  { %v105_v7 = vld [vmem:[%s7075_s1 + $0x1a0] sm:$0xff]  ;;  %2451 = vmatpush1.bf16.msra.mxu0 %v4328_v5 }
   0x7   :  { %v4321_v10 = vcombine.high %v101_v6, %v105_v7  ;;  %v229_v11 = vld [vmem:[%s7075_s1 + $0x580] sm:$0xff]  ;;  %2501 = vmatprep.subr.bf16.mxu1 %v4457_v8  ;;  %v4320_v18 = vcombine.low %v101_v6, %v105_v7 }
   0x8   :  { %v233_v12 = vld [vmem:[%s7075_s1 + $0x5a0] sm:$0xff]  ;;  %2502 = vmatpush1.bf16.msra.mxu1 %v4456_v9 }
   0x9   :  { %v93_v13 = vld [vmem:[%s7075_s1 + $0x140] sm:$0xff]  ;;  %v4449_v14 = vcombine.high %v229_v11, %v233_v12  ;;  %2452 = vmatprep.subr.bf16.mxu0 %v4321_v10  ;;  %v4448_v19 = vcombine.low %v229_v11, %v233_v12 }
   0xa   :  { %v97_v15 = vld [vmem:[%s7075_s1 + $0x160] sm:$0xff]  ;;  %2453 = vmatpush1.bf16.msra.mxu0 %v4320_v18 }
   0xb   :  { %v221_v16 = vld [vmem:[%s7075_s1 + $0x540] sm:$0xff]  ;;  %v4313_v20 = vcombine.high %v93_v13, %v97_v15  ;;  %2503 = vmatprep.subr.bf16.mxu1 %v4449_v14  ;;  %v4312_v26 = vcombine.low %v93_v13, %v97_v15 }
   0xc   :  { %v225_v17 = vld [vmem:[%s7075_s1 + $0x560] sm:$0xff]  ;;  %2504 = vmatpush1.bf16.msra.mxu1 %v4448_v19 }
   0xd   :  { %v4441_v21 = vcombine.high %v221_v16, %v225_v17  ;;  %v85_v22 = vld [vmem:[%s7075_s1 + $0x100] sm:$0xff]  ;;  %2454 = vmatprep.subr.bf16.mxu0 %v4313_v20  ;;  %v4440_v27 = vcombine.low %v221_v16, %v225_v17 }
   0xe   :  { %v89_v23 = vld [vmem:[%s7075_s1 + $0x120] sm:$0xff]  ;;  %2455 = vmatpush1.bf16.msra.mxu0 %v4312_v26 }
   0xf   :  { %v213_v24 = vld [vmem:[%s7075_s1 + $0x500] sm:$0xff]  ;;  %v4305_v28 = vcombine.high %v85_v22, %v89_v23  ;;  %2505 = vmatprep.subr.bf16.mxu1 %v4441_v21  ;;  %v4304_v34 = vcombine.low %v85_v22, %v89_v23 }
  0x10   :  { %v217_v25 = vld [vmem:[%s7075_s1 + $0x520] sm:$0xff]  ;;  %2506 = vmatpush1.bf16.msra.mxu1 %v4440_v27 }
  0x11   :  { %v4433_v29 = vcombine.high %v213_v24, %v217_v25  ;;  %v77_v30 = vld [vmem:[%s7075_s1 + $0xc0] sm:$0xff]  ;;  %2456 = vmatprep.subr.bf16.mxu0 %v4305_v28  ;;  %v4432_v35 = vcombine.low %v213_v24, %v217_v25 }
  0x12   :  { %v81_v31 = vld [vmem:[%s7075_s1 + $0xe0] sm:$0xff]  ;;  %2457 = vmatpush1.bf16.msra.mxu0 %v4304_v34 }
  0x13   :  { %v205_v32 = vld [vmem:[%s7075_s1 + $0x4c0] sm:$0xff]  ;;  %v4297_v36 = vcombine.high %v77_v30, %v81_v31  ;;  %2507 = vmatprep.subr.bf16.mxu1 %v4433_v29  ;;  %v4296_v42 = vcombine.low %v77_v30, %v81_v31 }
  0x14   :  { %v209_v33 = vld [vmem:[%s7075_s1 + $0x4e0] sm:$0xff]  ;;  %2508 = vmatpush1.bf16.msra.mxu1 %v4432_v35 }
  0x15   :  { %v4425_v37 = vcombine.high %v205_v32, %v209_v33  ;;  %v69_v38 = vld [vmem:[%s7075_s1 + $0x80] sm:$0xff]  ;;  %2458 = vmatprep.subr.bf16.mxu0 %v4297_v36  ;;  %v4424_v43 = vcombine.low %v205_v32, %v209_v33 }
  0x16   :  { %v73_v39 = vld [vmem:[%s7075_s1 + $0xa0] sm:$0xff]  ;;  %2459 = vmatpush1.bf16.msra.mxu0 %v4296_v42 }
  0x17   :  { %v197_v40 = vld [vmem:[%s7075_s1 + $0x480] sm:$0xff]  ;;  %v4289_v44 = vcombine.high %v69_v38, %v73_v39  ;;  %2509 = vmatprep.subr.bf16.mxu1 %v4425_v37  ;;  %v4288_v50 = vcombine.low %v69_v38, %v73_v39 }
  0x18   :  { %v201_v41 = vld [vmem:[%s7075_s1 + $0x4a0] sm:$0xff]  ;;  %2510 = vmatpush1.bf16.msra.mxu1 %v4424_v43 }
  0x19   :  { %v4417_v45 = vcombine.high %v197_v40, %v201_v41  ;;  %v61_v46 = vld [vmem:[%s7075_s1 + $0x40] sm:$0xff]  ;;  %2460 = vmatprep.subr.bf16.mxu0 %v4289_v44  ;;  %v4416_v52 = vcombine.low %v197_v40, %v201_v41 }
  0x1a   :  { %v65_v47 = vld [vmem:[%s7075_s1 + $0x60] sm:$0xff]  ;;  %2461 = vmatpush1.bf16.msra.mxu0 %v4288_v50 }
  0x1b   :  { %v189_v48 = vld [vmem:[%s7075_s1 + $0x440] sm:$0xff]  ;;  %v4281_v53 = vcombine.high %v61_v46, %v65_v47  ;;  %2511 = vmatprep.subr.bf16.mxu1 %v4417_v45  ;;  %v4280_v60 = vcombine.low %v61_v46, %v65_v47 }
  0x1c   :  { %v193_v49 = vld [vmem:[%s7075_s1 + $0x460] sm:$0xff]  ;;  %2512 = vmatpush1.bf16.msra.mxu1 %v4416_v52 }
  0x1d   :  { %v53_v51 = vld [vmem:[%s7075_s1] sm:$0xff]  ;;  %v4409_v55 = vcombine.high %v189_v48, %v193_v49  ;;  %2462 = vmatprep.subr.bf16.mxu0 %v4281_v53  ;;  %v4408_v61 = vcombine.low %v189_v48, %v193_v49 }
  0x1e   :  { %v57_v54 = vld [vmem:[%s7075_s1 + $0x20] sm:$0xff]  ;;  %2463 = vmatpush1.bf16.msra.mxu0 %v4280_v60 }
  0x1f   :  { %v5202_v56 = vld [vmem:[%s7076_s0 + $0x4] ss:$24 sps:$4 sm:$0xff]   ;;  %v4273_v62 = vcombine.high %v53_v51, %v57_v54  ;;  %2513 = vmatprep.subr.bf16.mxu1 %v4409_v55  ;;  %v4272_v4 = vcombine.low %v53_v51, %v57_v54 }
  0x20   :  { %v181_v57 = vld [vmem:[%s7075_s1 + $0x400] sm:$0xff]  ;;  %2482 = vmatprep.mubr.bf16.mxu0 %v5202_v56  ;;  %2514 = vmatpush1.bf16.msra.mxu1 %v4408_v61 }
  0x21   :  { %v185_v58 = vld [vmem:[%s7075_s1 + $0x420] sm:$0xff]  ;;  %2464 = vmatprep.subr.bf16.mxu0 %v4273_v62 }
  0x22   :  { %v5213_v59 = vld [vmem:[%s7076_s0 + $0xc] ss:$24 sps:$4 sm:$0xff]   ;;  %v4401_v63 = vcombine.high %v181_v57, %v185_v58  ;;  %v4400_v5 = vcombine.low %v181_v57, %v185_v58  ;;  %2465 = vmatpush1.bf16.msra.mxu0 %v4272_v4 }
  0x23   :  { %v173_v0 = vld [vmem:[%s7075_s1 + $0x3c0] sm:$0xff]  ;;  %2533 = vmatprep.mubr.bf16.mxu1 %v5213_v59  ;;  %v110_v4 = vld [vmem:[%s7075_s1 + $0x1c8] sm:$0xff] }
  0x24   :  { %v177_v1 = vld [vmem:[%s7075_s1 + $0x3e0] sm:$0xff]  ;;  %2515 = vmatprep.subr.bf16.mxu1 %v4401_v63 }
  0x25   :  { %v301_v2 = vld [vmem:[%s7075_s1 + $0x7c0] sm:$0xff]  ;;  %v4393_v6 = vcombine.high %v173_v0, %v177_v1  ;;  %v4392_v12 = vcombine.low %v173_v0, %v177_v1  ;;  %2516 = vmatpush1.bf16.msra.mxu1 %v4400_v5  ;;  %v114_v5 = vld [vmem:[%s7075_s1 + $0x1e8] sm:$0xff] }
  0x26   :  { %v305_v3 = vld [vmem:[%s7075_s1 + $0x7e0] sm:$0xff] }
  0x27   :  { %v4521_v7 = vcombine.high %v301_v2, %v305_v3  ;;  %v165_v8 = vld [vmem:[%s7075_s1 + $0x380] sm:$0xff]  ;;  %2466 = vmatprep.subr.bf16.mxu0 %v4393_v6  ;;  %v4520_v13 = vcombine.low %v301_v2, %v305_v3 }
  0x28   :  { %v169_v9 = vld [vmem:[%s7075_s1 + $0x3a0] sm:$0xff]  ;;  %2467 = vmatpush2.bf16.msra.mxu0 %v4392_v12 }
  0x29   :  { %v293_v10 = vld [vmem:[%s7075_s1 + $0x780] sm:$0xff]  ;;  %v4385_v14 = vcombine.high %v165_v8, %v169_v9  ;;  %2517 = vmatprep.subr.bf16.mxu1 %v4521_v7  ;;  %v4384_v20 = vcombine.low %v165_v8, %v169_v9 }
  0x2a   :  { %v297_v11 = vld [vmem:[%s7075_s1 + $0x7a0] sm:$0xff]  ;;  %2518 = vmatpush2.bf16.msra.mxu1 %v4520_v13  ;;  %v102_v13 = vld [vmem:[%s7075_s1 + $0x188] sm:$0xff] }
  0x2b   :  { %v4513_v15 = vcombine.high %v293_v10, %v297_v11  ;;  %v157_v16 = vld [vmem:[%s7075_s1 + $0x340] sm:$0xff]  ;;  %2468 = vmatprep.subr.bf16.mxu0 %v4385_v14  ;;  %v4512_v21 = vcombine.low %v293_v10, %v297_v11  ;;  %v4331_v10 = vcombine.high %v110_v4, %v114_v5  ;;  %v106_v14 = vld [vmem:[%s7075_s1 + $0x1a8] sm:$0xff] }
  0x2c   :  { %v161_v17 = vld [vmem:[%s7075_s1 + $0x360] sm:$0xff]  ;;  %2469 = vmatpush2.bf16.msra.mxu0 %v4384_v20 }
  0x2d   :  { %v285_v18 = vld [vmem:[%s7075_s1 + $0x740] sm:$0xff]  ;;  %v4377_v22 = vcombine.high %v157_v16, %v161_v17  ;;  %2519 = vmatprep.subr.bf16.mxu1 %v4513_v15  ;;  %v4376_v28 = vcombine.low %v157_v16, %v161_v17  ;;  %v50_v15 = vld [vmem:[%s7076_s0 + $0x30] sm:$0xff] }
  0x2e   :  { %v289_v19 = vld [vmem:[%s7075_s1 + $0x760] sm:$0xff]  ;;  %2520 = vmatpush2.bf16.msra.mxu1 %v4512_v21  ;;  %v4323_v21 = vcombine.high %v102_v13, %v106_v14 }
  0x2f   :  { %v4505_v23 = vcombine.high %v285_v18, %v289_v19  ;;  %v149_v24 = vld [vmem:[%s7075_s1 + $0x300] sm:$0xff]  ;;  %2470 = vmatprep.subr.bf16.mxu0 %v4377_v22  ;;  %v4504_v29 = vcombine.low %v285_v18, %v289_v19  ;;  %v51_v18 = vld [vmem:[%s7076_s0 + $0x38] sm:$0xff]  ;;  %v4330_v19 = vcombine.low %v110_v4, %v114_v5 }
  0x30   :  { %v153_v25 = vld [vmem:[%s7075_s1 + $0x320] sm:$0xff]  ;;  %2471 = vmatpush2.bf16.msra.mxu0 %v4376_v28 }
  0x31   :  { %v277_v26 = vld [vmem:[%s7075_s1 + $0x700] sm:$0xff]  ;;  %v4369_v30 = vcombine.high %v149_v24, %v153_v25  ;;  %2521 = vmatprep.subr.bf16.mxu1 %v4505_v23  ;;  %v4368_v36 = vcombine.low %v149_v24, %v153_v25  ;;  %v5359_v24 = vcombine.high %v50_v15, %v50_v15  ;;  %v94_v25 = vld [vmem:[%s7075_s1 + $0x148] sm:$0xff] }
  0x32   :  { %v281_v27 = vld [vmem:[%s7075_s1 + $0x720] sm:$0xff]  ;;  %2522 = vmatpush2.bf16.msra.mxu1 %v4504_v29  ;;  %v4322_v29 = vcombine.low %v102_v13, %v106_v14 }
  0x33   :  { %v4497_v31 = vcombine.high %v277_v26, %v281_v27  ;;  %v141_v32 = vld [vmem:[%s7075_s1 + $0x2c0] sm:$0xff]  ;;  %2472 = vmatprep.subr.bf16.mxu0 %v4369_v30  ;;  %v4496_v37 = vcombine.low %v277_v26, %v281_v27  ;;  %v98_v26 = vld [vmem:[%s7075_s1 + $0x168] sm:$0xff]  ;;  %v5368_v27 = vcombine.high %v51_v18, %v51_v18 }
  0x34   :  { %v145_v33 = vld [vmem:[%s7075_s1 + $0x2e0] sm:$0xff]  ;;  %2473 = vmatpush2.bf16.msra.mxu0 %v4368_v36  ;;  %v5384_v36 = vcombine.low %v50_v15, %v50_v15  ;;  %v174_v15 = vld [vmem:[%s7075_s1 + $0x3c8] sm:$0xff] }
  0x35   :  { %v269_v34 = vld [vmem:[%s7075_s1 + $0x6c0] sm:$0xff]  ;;  %v4361_v38 = vcombine.high %v141_v32, %v145_v33  ;;  %2523 = vmatprep.subr.bf16.mxu1 %v4497_v31  ;;  %v4360_v44 = vcombine.low %v141_v32, %v145_v33  ;;  %v4315_v31 = vcombine.high %v94_v25, %v98_v26 }
  0x36   :  { %v273_v35 = vld [vmem:[%s7075_s1 + $0x6e0] sm:$0xff]  ;;  %2524 = vmatpush2.bf16.msra.mxu1 %v4496_v37 }
  0x37   :  { %v133_v39 = vld [vmem:[%s7075_s1 + $0x280] sm:$0xff]  ;;  %v4489_v40 = vcombine.high %v269_v34, %v273_v35  ;;  %2474 = vmatprep.subr.bf16.mxu0 %v4361_v38  ;;  %v4488_v45 = vcombine.low %v269_v34, %v273_v35  ;;  %v86_v34 = vld [vmem:[%s7075_s1 + $0x108] sm:$0xff]  ;;  %v5387_v38 = vcombine.low %v51_v18, %v51_v18 }
  0x38   :  { %v137_v41 = vld [vmem:[%s7075_s1 + $0x2a0] sm:$0xff]  ;;  %2475 = vmatpush2.bf16.msra.mxu0 %v4360_v44  ;;  %v90_v35 = vld [vmem:[%s7075_s1 + $0x128] sm:$0xff] }
  0x39   :  { %v261_v42 = vld [vmem:[%s7075_s1 + $0x680] sm:$0xff]  ;;  %v4353_v46 = vcombine.high %v133_v39, %v137_v41  ;;  %2525 = vmatprep.subr.bf16.mxu1 %v4489_v40  ;;  %v4352_v52 = vcombine.low %v133_v39, %v137_v41  ;;  %v4314_v39 = vcombine.low %v94_v25, %v98_v26  ;;  %v4307_v41 = vcombine.high %v86_v34, %v90_v35  ;;  %v5398_v44 = vld [vmem:[%s7076_s0 + $0x14] ss:$24 sps:$4 sm:$0xff]  }
  0x3a   :  { %v265_v43 = vld [vmem:[%s7075_s1 + $0x6a0] sm:$0xff]  ;;  %2526 = vmatpush2.bf16.msra.mxu1 %v4488_v45  ;;  %v78_v45 = vld [vmem:[%s7075_s1 + $0xc8] sm:$0xff] }
  0x3b   :  { %v4481_v47 = vcombine.high %v261_v42, %v265_v43  ;;  %v125_v48 = vld [vmem:[%s7075_s1 + $0x240] sm:$0xff]  ;;  %2476 = vmatprep.subr.bf16.mxu0 %v4353_v46  ;;  %v4480_v53 = vcombine.low %v261_v42, %v265_v43  ;;  %v82_v46 = vld [vmem:[%s7075_s1 + $0xe8] sm:$0xff] }
  0x3c   :  { %v129_v49 = vld [vmem:[%s7075_s1 + $0x260] sm:$0xff]  ;;  %2477 = vmatpush2.bf16.msra.mxu0 %v4352_v52  ;;  %v166_v25 = vld [vmem:[%s7075_s1 + $0x388] sm:$0xff] }
  0x3d   :  { %v253_v50 = vld [vmem:[%s7075_s1 + $0x640] sm:$0xff]  ;;  %v4345_v54 = vcombine.high %v125_v48, %v129_v49  ;;  %2527 = vmatprep.subr.bf16.mxu1 %v4481_v47  ;;  %v4344_v62 = vcombine.low %v125_v48, %v129_v49  ;;  %v4306_v48 = vcombine.low %v86_v34, %v90_v35  ;;  %v170_v26 = vld [vmem:[%s7075_s1 + $0x3a8] sm:$0xff] }
  0x3e   :  { %v257_v51 = vld [vmem:[%s7075_s1 + $0x660] sm:$0xff]  ;;  %2528 = vmatpush2.bf16.msra.mxu1 %v4480_v53  ;;  %v70_v53 = vld [vmem:[%s7075_s1 + $0x88] sm:$0xff] }
  0x3f   :  { %v4473_v55 = vcombine.high %v253_v50, %v257_v51  ;;  %v117_v57 = vld [vmem:[%s7075_s1 + $0x200] sm:$0xff]  ;;  %2478 = vmatprep.subr.bf16.mxu0 %v4345_v54  ;;  %v4472_v63 = vcombine.low %v253_v50, %v257_v51  ;;  %v4299_v50 = vcombine.high %v78_v45, %v82_v46  ;;  %v74_v54 = vld [vmem:[%s7075_s1 + $0xa8] sm:$0xff] }
  0x40   :  { %v121_v58 = vld [vmem:[%s7075_s1 + $0x220] sm:$0xff]  ;;  %2479 = vmatpush2.bf16.msra.mxu0 %v4344_v62  ;;  %v158_v34 = vld [vmem:[%s7075_s1 + $0x348] sm:$0xff] }
  0x41   :  { %v245_v60 = vld [vmem:[%s7075_s1 + $0x600] sm:$0xff]  ;;  %v4337_v0 = vcombine.high %v117_v57, %v121_v58  ;;  %2529 = vmatprep.subr.bf16.mxu1 %v4473_v55  ;;  %v4336_v6 = vcombine.low %v117_v57, %v121_v58  ;;  %v4298_v57 = vcombine.low %v78_v45, %v82_v46  ;;  %v162_v35 = vld [vmem:[%s7075_s1 + $0x368] sm:$0xff] }
  0x42   :  { %v249_v61 = vld [vmem:[%s7075_s1 + $0x620] sm:$0xff]  ;;  %2530 = vmatpush2.bf16.msra.mxu1 %v4472_v63  ;;  %v66_v63 = vld [vmem:[%s7075_s1 + $0x68] sm:$0xff] }
  0x43   :  { %v4465_v1 = vcombine.high %v245_v60, %v249_v61  ;;  %v365_v2 = vld [vmem:[%s7075_s1 + $0x9c0] sm:$0xff]  ;;  %2480 = vmatprep.subr.bf16.mxu0 %v4337_v0  ;;  %v4464_v7 = vcombine.low %v245_v60, %v249_v61  ;;  %v4291_v60 = vcombine.high %v70_v53, %v74_v54  ;;  %v150_v45 = vld [vmem:[%s7075_s1 + $0x308] sm:$0xff] }
  0x44   :  { %v369_v3 = vld [vmem:[%s7075_s1 + $0x9e0] sm:$0xff]  ;;  %2481 = vmatpush2.bf16.msra.mxu0 %v4336_v6  ;;  %v54_v6 = vld [vmem:[%s7075_s1 + $0x8] sm:$0xff] }
  0x45   :  { %v4585_v8 = vcombine.high %v365_v2, %v369_v3  ;;  %2531 = vmatprep.subr.bf16.mxu1 %v4465_v1  ;;  %v5328_v9 = vld [vmem:[%s7076_s0] ss:$24 sps:$4 sm:$0xff]   ;;  %v4584_v17 = vcombine.low %v365_v2, %v369_v3  ;;  %v4290_v1 = vcombine.low %v70_v53, %v74_v54  ;;  %v154_v46 = vld [vmem:[%s7075_s1 + $0x328] sm:$0xff] }
  0x46   :  { %v357_v11 = vld [vmem:[%s7075_s1 + $0x980] sm:$0xff]  ;;  %2532 = vmatpush2.bf16.msra.mxu1 %v4464_v7  ;;  %v58_v7 = vld [vmem:[%s7075_s1 + $0x28] sm:$0xff] }
  0x47   :  { %v361_v12 = vld [vmem:[%s7075_s1 + $0x9a0] sm:$0xff]  ;;  %2552 = vmatprep.subr.bf16.mxu0 %v4585_v8  ;;  %2603 = vmatprep.subr.bf16.mxu1 %v4331_v10  ;;  %v142_v53 = vld [vmem:[%s7075_s1 + $0x2c8] sm:$0xff] }
  0x48   :  { %v5348_v16 = vld [vmem:[%s7076_s0 + $0x8] ss:$24 sps:$4 sm:$0xff]   ;;  %v4577_v20 = vcombine.high %v357_v11, %v361_v12  ;;  %2483 = vmatmul.mubr.bf16.vlgmr.msra.gmra.mxu0 %v5328_v9  ;;  %v4576_v28 = vcombine.low %v357_v11, %v361_v12  ;;  %v4275_v12 = vcombine.high %v54_v6, %v58_v7 }
  0x49   :  { %v349_v22 = vld [vmem:[%s7075_s1 + $0x940] sm:$0xff]  ;;  %2534 = vmatmul.mubr.bf16.vlgmr.msra.gmra.mxu1 %v5348_v16  ;;  %2553 = vmatpush1.bf16.msra.mxu0 %v4584_v17  ;;  %v178_v17 = vld [vmem:[%s7075_s1 + $0x3e8] sm:$0xff] }
  0x4a   :  { %v353_v23 = vld [vmem:[%s7075_s1 + $0x960] sm:$0xff]  ;;  %2604 = vmatpush1.bf16.msra.mxu1 %v4330_v19  ;;  %2554 = vmatprep.subr.bf16.mxu0 %v4577_v20  ;;  %v4274_v19 = vcombine.low %v54_v6, %v58_v7  ;;  %v146_v54 = vld [vmem:[%s7075_s1 + $0x2e8] sm:$0xff] }
  0x4b   :  { %v4569_v30 = vcombine.high %v349_v22, %v353_v23  ;;  %2605 = vmatprep.subr.bf16.mxu1 %v4323_v21  ;;  %v341_v32 = vld [vmem:[%s7075_s1 + $0x900] sm:$0xff]  ;;  %2492 = vmatprep.mubr.bf16.mxu0 %v5359_v24  ;;  %v4568_v37 = vcombine.low %v349_v22, %v353_v23  ;;  %v4395_v21 = vcombine.high %v174_v15, %v178_v17  ;;  %v126_v6 = vld [vmem:[%s7075_s1 + $0x248] sm:$0xff] }
  0x4c   :  { %v345_v33 = vld [vmem:[%s7075_s1 + $0x920] sm:$0xff]  ;;  %2543 = vmatprep.mubr.bf16.mxu1 %v5368_v27  ;;  %v130_v7 = vld [vmem:[%s7075_s1 + $0x268] sm:$0xff] }
  0x4d   :  { %2555 = vmatpush1.bf16.msra.mxu0 %v4576_v28  ;;  %v4561_v40 = vcombine.high %v341_v32, %v345_v33  ;;  %v333_v42 = vld [vmem:[%s7075_s1 + $0x8c0] sm:$0xff]  ;;  %v4560_v47 = vcombine.low %v341_v32, %v345_v33 }
  0x4e   :  { %2606 = vmatpush1.bf16.msra.mxu1 %v4322_v29  ;;  %2556 = vmatprep.subr.bf16.mxu0 %v4569_v30  ;;  %v337_v43 = vld [vmem:[%s7075_s1 + $0x8e0] sm:$0xff]  ;;  %v4394_v29 = vcombine.low %v174_v15, %v178_v17  ;;  %v118_v15 = vld [vmem:[%s7075_s1 + $0x208] sm:$0xff] }
  0x4f   :  { %2607 = vmatprep.subr.bf16.mxu1 %v4315_v31  ;;  %v4553_v49 = vcombine.high %v333_v42, %v337_v43  ;;  %v325_v51 = vld [vmem:[%s7075_s1 + $0x880] sm:$0xff]  ;;  %v4552_v55 = vcombine.low %v333_v42, %v337_v43  ;;  %v4387_v31 = vcombine.high %v166_v25, %v170_v26  ;;  %v122_v17 = vld [vmem:[%s7075_s1 + $0x228] sm:$0xff] }
  0x50   :  { %2493 = vmatmul.mubr.bf16.gmra.mxu0 %v5384_v36  ;;  %v329_v52 = vld [vmem:[%s7075_s1 + $0x8a0] sm:$0xff] }
  0x51   :  { %2557 = vmatpush1.bf16.msra.mxu0 %v4568_v37  ;;  %2544 = vmatmul.mubr.bf16.gmra.mxu1 %v5387_v38  ;;  %v4545_v58 = vcombine.high %v325_v51, %v329_v52  ;;  %v317_v61 = vld [vmem:[%s7075_s1 + $0x840] sm:$0xff]  ;;  %v4544_v0 = vcombine.low %v325_v51, %v329_v52 }
  0x52   :  { %2608 = vmatpush1.bf16.msra.mxu1 %v4314_v39  ;;  %2558 = vmatprep.subr.bf16.mxu0 %v4561_v40  ;;  %v321_v62 = vld [vmem:[%s7075_s1 + $0x860] sm:$0xff]  ;;  %v4386_v39 = vcombine.low %v166_v25, %v170_v26  ;;  %v366_v25 = vld [vmem:[%s7075_s1 + $0x9c8] sm:$0xff] }
  0x53   :  { %2609 = vmatprep.subr.bf16.mxu1 %v4307_v41  ;;  %2584 = vmatprep.mubr.bf16.mxu0 %v5398_v44  ;;  %v4537_v2 = vcombine.high %v317_v61, %v321_v62  ;;  %v309_v4 = vld [vmem:[%s7075_s1 + $0x800] sm:$0xff]  ;;  %v4536_v8 = vcombine.low %v317_v61, %v321_v62  ;;  %v4379_v41 = vcombine.high %v158_v34, %v162_v35  ;;  %v370_v26 = vld [vmem:[%s7075_s1 + $0x9e8] sm:$0xff] }
  0x54   :  { %2635 = vmatprep.mubr.bf16.mxu1 %v5202_v56  ;;  %v62_v56 = vld [vmem:[%s7075_s1 + $0x48] sm:$0xff]  ;;  %v313_v5 = vld [vmem:[%s7075_s1 + $0x820] sm:$0xff] }
  0x55   :  { %2559 = vmatpush1.bf16.msra.mxu0 %v4560_v47  ;;  %v4283_v3 = vcombine.high %v62_v56, %v66_v63  ;;  %v4282_v10 = vcombine.low %v62_v56, %v66_v63  ;;  %v4529_v11 = vcombine.high %v309_v4, %v313_v5  ;;  %v429_v13 = vld [vmem:[%s7075_s1 + $0xbc0] sm:$0xff]  ;;  %v4528_v18 = vcombine.low %v309_v4, %v313_v5  ;;  %v134_v56 = vld [vmem:[%s7075_s1 + $0x288] sm:$0xff] }
  0x56   :  { %2610 = vmatpush1.bf16.msra.mxu1 %v4306_v48  ;;  %2560 = vmatprep.subr.bf16.mxu0 %v4553_v49  ;;  %v433_v14 = vld [vmem:[%s7075_s1 + $0xbe0] sm:$0xff]  ;;  %v4378_v48 = vcombine.low %v158_v34, %v162_v35  ;;  %v138_v63 = vld [vmem:[%s7075_s1 + $0x2a8] sm:$0xff] }
  0x57   :  { %2611 = vmatprep.subr.bf16.mxu1 %v4299_v50  ;;  %v4649_v20 = vcombine.high %v429_v13, %v433_v14  ;;  %v421_v22 = vld [vmem:[%s7075_s1 + $0xb80] sm:$0xff]  ;;  %v4648_v28 = vcombine.low %v429_v13, %v433_v14  ;;  %v4371_v50 = vcombine.high %v150_v45, %v154_v46  ;;  %v234_v34 = vld [vmem:[%s7075_s1 + $0x5a8] sm:$0xff] }
  0x58   :  { %v425_v23 = vld [vmem:[%s7075_s1 + $0xba0] sm:$0xff]  ;;  %v358_v35 = vld [vmem:[%s7075_s1 + $0x988] sm:$0xff] }
  0x59   :  { %2561 = vmatpush1.bf16.msra.mxu0 %v4552_v55  ;;  %v4641_v30 = vcombine.high %v421_v22, %v425_v23  ;;  %v413_v32 = vld [vmem:[%s7075_s1 + $0xb40] sm:$0xff]  ;;  %v4640_v37 = vcombine.low %v421_v22, %v425_v23  ;;  %v238_v22 = vld [vmem:[%s7075_s1 + $0x5c8] sm:$0xff] }
  0x5a   :  { %2612 = vmatpush1.bf16.msra.mxu1 %v4298_v57  ;;  %2562 = vmatprep.subr.bf16.mxu0 %v4545_v58  ;;  %v417_v33 = vld [vmem:[%s7075_s1 + $0xb60] sm:$0xff]  ;;  %v4370_v57 = vcombine.low %v150_v45, %v154_v46  ;;  %v242_v23 = vld [vmem:[%s7075_s1 + $0x5e8] sm:$0xff] }
  0x5b   :  { %2613 = vmatprep.subr.bf16.mxu1 %v4291_v60  ;;  %v4633_v40 = vcombine.high %v413_v32, %v417_v33  ;;  %v405_v42 = vld [vmem:[%s7075_s1 + $0xb00] sm:$0xff]  ;;  %v4632_v47 = vcombine.low %v413_v32, %v417_v33  ;;  %v4363_v60 = vcombine.high %v142_v53, %v146_v54  ;;  %v4587_v32 = vcombine.high %v366_v25, %v370_v26  ;;  %v230_v33 = vld [vmem:[%s7075_s1 + $0x588] sm:$0xff] }
  0x5c   :  { %v409_v43 = vld [vmem:[%s7075_s1 + $0xb20] sm:$0xff]  ;;  %v222_v46 = vld [vmem:[%s7075_s1 + $0x548] sm:$0xff] }
  0x5d   :  { %2563 = vmatpush1.bf16.msra.mxu0 %v4544_v0  ;;  %v4625_v49 = vcombine.high %v405_v42, %v409_v43  ;;  %v397_v51 = vld [vmem:[%s7075_s1 + $0xac0] sm:$0xff]  ;;  %v4624_v55 = vcombine.low %v405_v42, %v409_v43  ;;  %v4451_v42 = vcombine.high %v230_v33, %v234_v34 }
  0x5e   :  { %2614 = vmatpush1.bf16.msra.mxu1 %v4290_v1  ;;  %2564 = vmatprep.subr.bf16.mxu0 %v4537_v2  ;;  %v401_v52 = vld [vmem:[%s7075_s1 + $0xae0] sm:$0xff]  ;;  %v4362_v1 = vcombine.low %v142_v53, %v146_v54  ;;  %v214_v54 = vld [vmem:[%s7075_s1 + $0x508] sm:$0xff] }
  0x5f   :  { %2615 = vmatprep.subr.bf16.mxu1 %v4283_v3  ;;  %v4617_v58 = vcombine.high %v397_v51, %v401_v52  ;;  %v389_v61 = vld [vmem:[%s7075_s1 + $0xa80] sm:$0xff]  ;;  %v4616_v0 = vcombine.low %v397_v51, %v401_v52  ;;  %v4355_v3 = vcombine.high %v134_v56, %v138_v63 }
  0x60   :  { %v393_v62 = vld [vmem:[%s7075_s1 + $0xaa0] sm:$0xff] }
  0x61   :  { %2565 = vmatpush1.bf16.msra.mxu0 %v4536_v8  ;;  %v4609_v2 = vcombine.high %v389_v61, %v393_v62  ;;  %v381_v4 = vld [vmem:[%s7075_s1 + $0xa40] sm:$0xff]  ;;  %v4608_v8 = vcombine.low %v389_v61, %v393_v62 }
  0x62   :  { %2616 = vmatpush1.bf16.msra.mxu1 %v4282_v10  ;;  %2566 = vmatprep.subr.bf16.mxu0 %v4529_v11  ;;  %v385_v5 = vld [vmem:[%s7075_s1 + $0xa60] sm:$0xff]  ;;  %v4354_v10 = vcombine.low %v134_v56, %v138_v63  ;;  %v206_v63 = vld [vmem:[%s7075_s1 + $0x4c8] sm:$0xff] }
  0x63   :  { %2617 = vmatprep.subr.bf16.mxu1 %v4275_v12  ;;  %v4601_v11 = vcombine.high %v381_v4, %v385_v5  ;;  %v4347_v12 = vcombine.high %v126_v6, %v130_v7  ;;  %v373_v13 = vld [vmem:[%s7075_s1 + $0xa00] sm:$0xff] }
  0x64   :  { %v377_v14 = vld [vmem:[%s7075_s1 + $0xa20] sm:$0xff] }
  0x65   :  { %2567 = vmatpush1.bf16.msra.mxu0 %v4528_v18  ;;  %v4600_v18 = vcombine.low %v381_v4, %v385_v5 }
  0x66   :  { %2618 = vmatpush1.bf16.msra.mxu1 %v4274_v19  ;;  %2568 = vmatprep.subr.bf16.mxu0 %v4649_v20  ;;  %v4346_v19 = vcombine.low %v126_v6, %v130_v7  ;;  %v4593_v20 = vcombine.high %v373_v13, %v377_v14  ;;  %v198_v7 = vld [vmem:[%s7075_s1 + $0x488] sm:$0xff] }
  0x67   :  { %2619 = vmatprep.subr.bf16.mxu1 %v4395_v21  ;;  %v4339_v21 = vcombine.high %v118_v15, %v122_v17 }
  0x69   :  { %2569 = vmatpush2.bf16.msra.mxu0 %v4648_v28  ;;  %v4592_v28 = vcombine.low %v373_v13, %v377_v14 }
  0x6a   :  { %2620 = vmatpush2.bf16.msra.mxu1 %v4394_v29  ;;  %2570 = vmatprep.subr.bf16.mxu0 %v4641_v30  ;;  %v4338_v29 = vcombine.low %v118_v15, %v122_v17  ;;  %v4459_v30 = vcombine.high %v238_v22, %v242_v23  ;;  %v194_v17 = vld [vmem:[%s7075_s1 + $0x468] sm:$0xff] }
  0x6b   :  { %2621 = vmatprep.subr.bf16.mxu1 %v4387_v31  ;;  %v5557_v31 = vld [vmem:[%s7076_s0 + $0x10] ss:$24 sps:$4 sm:$0xff]  }
  0x6d   :  { %2571 = vmatpush2.bf16.msra.mxu0 %v4640_v37  ;;  %v362_v37 = vld [vmem:[%s7075_s1 + $0x9a8] sm:$0xff] }
  0x6e   :  { %2622 = vmatpush2.bf16.msra.mxu1 %v4386_v39  ;;  %2572 = vmatprep.subr.bf16.mxu0 %v4633_v40  ;;  %v52_v39 = vld [vmem:[%s7076_s0 + $0x40] sm:$0xff]  ;;  %v4458_v40 = vcombine.low %v238_v22, %v242_v23  ;;  %v4579_v43 = vcombine.high %v358_v35, %v362_v37  ;;  %v4578_v51 = vcombine.low %v358_v35, %v362_v37  ;;  %v182_v23 = vld [vmem:[%s7075_s1 + $0x408] sm:$0xff] }
  0x6f   :  { %2623 = vmatprep.subr.bf16.mxu1 %v4379_v41  ;;  %v4586_v41 = vcombine.low %v366_v25, %v370_v26  ;;  %v5574_v45 = vcombine.high %v52_v39, %v52_v39  ;;  %v186_v25 = vld [vmem:[%s7075_s1 + $0x428] sm:$0xff] }
  0x70   :  { %v310_v26 = vld [vmem:[%s7075_s1 + $0x808] sm:$0xff] }
  0x71   :  { %2573 = vmatpush2.bf16.msra.mxu0 %v4632_v47  ;;  %v226_v47 = vld [vmem:[%s7075_s1 + $0x568] sm:$0xff] }
  0x72   :  { %2624 = vmatpush2.bf16.msra.mxu1 %v4378_v48  ;;  %2574 = vmatprep.subr.bf16.mxu0 %v4625_v49  ;;  %v350_v48 = vld [vmem:[%s7075_s1 + $0x948] sm:$0xff]  ;;  %v4443_v52 = vcombine.high %v222_v46, %v226_v47 }
  0x73   :  { %2625 = vmatprep.subr.bf16.mxu1 %v4371_v50  ;;  %v354_v49 = vld [vmem:[%s7075_s1 + $0x968] sm:$0xff]  ;;  %v4450_v50 = vcombine.low %v230_v33, %v234_v34 }
  0x74   :  { %v4571_v53 = vcombine.high %v350_v48, %v354_v49  ;;  %v4570_v61 = vcombine.low %v350_v48, %v354_v49  ;;  %v302_v34 = vld [vmem:[%s7075_s1 + $0x7c8] sm:$0xff] }
  0x75   :  { %2575 = vmatpush2.bf16.msra.mxu0 %v4624_v55  ;;  %v218_v55 = vld [vmem:[%s7075_s1 + $0x528] sm:$0xff] }
  0x76   :  { %2626 = vmatpush2.bf16.msra.mxu1 %v4370_v57  ;;  %2576 = vmatprep.subr.bf16.mxu0 %v4617_v58  ;;  %v5597_v57 = vcombine.low %v52_v39, %v52_v39  ;;  %v346_v58 = vld [vmem:[%s7075_s1 + $0x928] sm:$0xff]  ;;  %v4435_v62 = vcombine.high %v214_v54, %v218_v55 }
  0x77   :  { %2627 = vmatprep.subr.bf16.mxu1 %v4363_v60  ;;  %v4442_v60 = vcombine.low %v222_v46, %v226_v47  ;;  %v306_v35 = vld [vmem:[%s7075_s1 + $0x7e8] sm:$0xff] }
  0x78   :  { %v430_v37 = vld [vmem:[%s7075_s1 + $0xbc8] sm:$0xff] }
  0x79   :  { %2577 = vmatpush2.bf16.msra.mxu0 %v4616_v0  ;;  %v210_v0 = vld [vmem:[%s7075_s1 + $0x4e8] sm:$0xff] }
  0x7a   :  { %2628 = vmatpush2.bf16.msra.mxu1 %v4362_v1  ;;  %2578 = vmatprep.subr.bf16.mxu0 %v4609_v2  ;;  %v334_v1 = vld [vmem:[%s7075_s1 + $0x8c8] sm:$0xff]  ;;  %v4427_v5 = vcombine.high %v206_v63, %v210_v0 }
  0x7b   :  { %2629 = vmatprep.subr.bf16.mxu1 %v4355_v3  ;;  %v338_v2 = vld [vmem:[%s7075_s1 + $0x8e8] sm:$0xff]  ;;  %v4434_v3 = vcombine.low %v214_v54, %v218_v55 }
  0x7c   :  { %v4555_v6 = vcombine.high %v334_v1, %v338_v2  ;;  %v4554_v13 = vcombine.low %v334_v1, %v338_v2  ;;  %v434_v39 = vld [vmem:[%s7075_s1 + $0xbe8] sm:$0xff] }
  0x7d   :  { %2579 = vmatpush2.bf16.msra.mxu0 %v4608_v8  ;;  %v202_v8 = vld [vmem:[%s7075_s1 + $0x4a8] sm:$0xff] }
  0x7e   :  { %2630 = vmatpush2.bf16.msra.mxu1 %v4354_v10  ;;  %2580 = vmatprep.subr.bf16.mxu0 %v4601_v11  ;;  %v326_v10 = vld [vmem:[%s7075_s1 + $0x888] sm:$0xff]  ;;  %v4419_v14 = vcombine.high %v198_v7, %v202_v8 }
  0x7f   :  { %2631 = vmatprep.subr.bf16.mxu1 %v4347_v12  ;;  %v330_v11 = vld [vmem:[%s7075_s1 + $0x8a8] sm:$0xff]  ;;  %v4426_v12 = vcombine.low %v206_v63, %v210_v0 }
  0x80   :  { %v4547_v15 = vcombine.high %v326_v10, %v330_v11  ;;  %v294_v46 = vld [vmem:[%s7075_s1 + $0x788] sm:$0xff] }
  0x81   :  { %2581 = vmatpush2.bf16.msra.mxu0 %v4600_v18  ;;  %v322_v18 = vld [vmem:[%s7075_s1 + $0x868] sm:$0xff] }
  0x82   :  { %2632 = vmatpush2.bf16.msra.mxu1 %v4346_v19  ;;  %2582 = vmatprep.subr.bf16.mxu0 %v4593_v20  ;;  %v4418_v19 = vcombine.low %v198_v7, %v202_v8  ;;  %v4546_v20 = vcombine.low %v326_v10, %v330_v11  ;;  %v298_v47 = vld [vmem:[%s7075_s1 + $0x7a8] sm:$0xff] }
  0x83   :  { %2633 = vmatprep.subr.bf16.mxu1 %v4339_v21  ;;  %v422_v48 = vld [vmem:[%s7075_s1 + $0xb88] sm:$0xff] }
  0x84   :  { %v426_v49 = vld [vmem:[%s7075_s1 + $0xba8] sm:$0xff] }
  0x85   :  { %2583 = vmatpush2.bf16.msra.mxu0 %v4592_v28  ;;  %v314_v28 = vld [vmem:[%s7075_s1 + $0x828] sm:$0xff] }
  0x86   :  { %2634 = vmatpush2.bf16.msra.mxu1 %v4338_v29  ;;  %2654 = vmatprep.subr.bf16.mxu0 %v4459_v30  ;;  %v4531_v33 = vcombine.high %v310_v26, %v314_v28  ;;  %v286_v54 = vld [vmem:[%s7075_s1 + $0x748] sm:$0xff] }
  0x87   :  { %2705 = vmatprep.subr.bf16.mxu1 %v4587_v32  ;;  %v4403_v32 = vcombine.high %v182_v23, %v186_v25  ;;  %v290_v55 = vld [vmem:[%s7075_s1 + $0x768] sm:$0xff] }
  0x88   :  { %2585 = vmatmul.mubr.bf16.vlgmr.msra.gmra.mxu0 %v5557_v31  ;;  %v278_v63 = vld [vmem:[%s7075_s1 + $0x708] sm:$0xff] }
  0x89   :  { %2636 = vmatmul.mubr.bf16.vlgmr.msra.gmra.mxu1 %v5328_v9  ;;  %2655 = vmatpush1.bf16.msra.mxu0 %v4458_v40  ;;  %v342_v9 = vld [vmem:[%s7075_s1 + $0x908] sm:$0xff]  ;;  %v4402_v40 = vcombine.low %v182_v23, %v186_v25 }
  0x8a   :  { %2706 = vmatpush1.bf16.msra.mxu1 %v4586_v41  ;;  %2656 = vmatprep.subr.bf16.mxu0 %v4451_v42  ;;  %v4563_v56 = vcombine.high %v342_v9, %v346_v58  ;;  %v4562_v4 = vcombine.low %v342_v9, %v346_v58  ;;  %v4530_v41 = vcombine.low %v310_v26, %v314_v28  ;;  %v414_v9 = vld [vmem:[%s7075_s1 + $0xb48] sm:$0xff] }
  0x8b   :  { %2707 = vmatprep.subr.bf16.mxu1 %v4579_v43  ;;  %2594 = vmatprep.mubr.bf16.mxu0 %v5574_v45  ;;  %v4523_v42 = vcombine.high %v302_v34, %v306_v35  ;;  %v4651_v43 = vcombine.high %v430_v37, %v434_v39  ;;  %v418_v58 = vld [vmem:[%s7075_s1 + $0xb68] sm:$0xff] }
  0x8c   :  { %2645 = vmatprep.mubr.bf16.mxu1 %v5359_v24  ;;  %v282_v0 = vld [vmem:[%s7075_s1 + $0x728] sm:$0xff] }
  0x8d   :  { %2657 = vmatpush1.bf16.msra.mxu0 %v4450_v50  ;;  %v4522_v50 = vcombine.low %v302_v34, %v306_v35  ;;  %v406_v1 = vld [vmem:[%s7075_s1 + $0xb08] sm:$0xff] }
  0x8e   :  { %2708 = vmatpush1.bf16.msra.mxu1 %v4578_v51  ;;  %2658 = vmatprep.subr.bf16.mxu0 %v4443_v52  ;;  %v4650_v51 = vcombine.low %v430_v37, %v434_v39  ;;  %v4515_v52 = vcombine.high %v294_v46, %v298_v47  ;;  %v410_v2 = vld [vmem:[%s7075_s1 + $0xb28] sm:$0xff] }
  0x8f   :  { %2709 = vmatprep.subr.bf16.mxu1 %v4571_v53  ;;  %v4643_v53 = vcombine.high %v422_v48, %v426_v49  ;;  %v270_v7 = vld [vmem:[%s7075_s1 + $0x6c8] sm:$0xff] }
  0x90   :  { %2595 = vmatmul.mubr.bf16.gmra.mxu0 %v5597_v57  ;;  %v274_v8 = vld [vmem:[%s7075_s1 + $0x6e8] sm:$0xff] }
  0x91   :  { %2659 = vmatpush1.bf16.msra.mxu0 %v4442_v60  ;;  %2646 = vmatmul.mubr.bf16.gmra.mxu1 %v5384_v36  ;;  %v4514_v60 = vcombine.low %v294_v46, %v298_v47  ;;  %v398_v10 = vld [vmem:[%s7075_s1 + $0xac8] sm:$0xff]  ;;  %v111_v46 = vld [vmem:[%s7075_s1 + $0x1d0] sm:$0xff] }
  0x92   :  { %2710 = vmatpush1.bf16.msra.mxu1 %v4570_v61  ;;  %2660 = vmatprep.subr.bf16.mxu0 %v4435_v62  ;;  %v4642_v61 = vcombine.low %v422_v48, %v426_v49  ;;  %v4507_v62 = vcombine.high %v286_v54, %v290_v55  ;;  %v402_v11 = vld [vmem:[%s7075_s1 + $0xae8] sm:$0xff]  ;;  %v115_v47 = vld [vmem:[%s7075_s1 + $0x1f0] sm:$0xff] }
  0x93   :  { %2711 = vmatprep.subr.bf16.mxu1 %v4563_v56  ;;  %2686 = vmatprep.mubr.bf16.mxu0 %v5213_v59  ;;  %v190_v59 = vld [vmem:[%s7075_s1 + $0x448] sm:$0xff]  ;;  %v4635_v56 = vcombine.high %v414_v9, %v418_v58  ;;  %v239_v48 = vld [vmem:[%s7075_s1 + $0x5d0] sm:$0xff] }
  0x94   :  { %2737 = vmatprep.mubr.bf16.mxu1 %v5398_v44  ;;  %v318_v44 = vld [vmem:[%s7075_s1 + $0x848] sm:$0xff]  ;;  %v4411_v21 = vcombine.high %v190_v59, %v194_v17  ;;  %v4410_v29 = vcombine.low %v190_v59, %v194_v17  ;;  %v243_v49 = vld [vmem:[%s7075_s1 + $0x5f0] sm:$0xff] }
  0x95   :  { %2661 = vmatpush1.bf16.msra.mxu0 %v4434_v3  ;;  %v4539_v22 = vcombine.high %v318_v44, %v322_v18  ;;  %v4538_v30 = vcombine.low %v318_v44, %v322_v18  ;;  %v4506_v3 = vcombine.low %v286_v54, %v290_v55  ;;  %v262_v59 = vld [vmem:[%s7075_s1 + $0x688] sm:$0xff]  ;;  %v103_v54 = vld [vmem:[%s7075_s1 + $0x190] sm:$0xff] }
  0x96   :  { %2712 = vmatpush1.bf16.msra.mxu1 %v4562_v4  ;;  %2662 = vmatprep.subr.bf16.mxu0 %v4427_v5  ;;  %v4634_v4 = vcombine.low %v414_v9, %v418_v58  ;;  %v4499_v5 = vcombine.high %v278_v63, %v282_v0  ;;  %v266_v17 = vld [vmem:[%s7075_s1 + $0x6a8] sm:$0xff]  ;;  %v107_v55 = vld [vmem:[%s7075_s1 + $0x1b0] sm:$0xff] }
  0x97   :  { %2713 = vmatprep.subr.bf16.mxu1 %v4555_v6  ;;  %v4627_v6 = vcombine.high %v406_v1, %v410_v2  ;;  %v390_v44 = vld [vmem:[%s7075_s1 + $0xa88] sm:$0xff]  ;;  %v231_v9 = vld [vmem:[%s7075_s1 + $0x590] sm:$0xff] }
  0x98   :  { %v394_v18 = vld [vmem:[%s7075_s1 + $0xaa8] sm:$0xff]  ;;  %v235_v58 = vld [vmem:[%s7075_s1 + $0x5b0] sm:$0xff] }
  0x99   :  { %2663 = vmatpush1.bf16.msra.mxu0 %v4426_v12  ;;  %v4498_v12 = vcombine.low %v278_v63, %v282_v0  ;;  %v254_v23 = vld [vmem:[%s7075_s1 + $0x648] sm:$0xff]  ;;  %v95_v63 = vld [vmem:[%s7075_s1 + $0x150] sm:$0xff] }
  0x9a   :  { %2714 = vmatpush1.bf16.msra.mxu1 %v4554_v13  ;;  %2664 = vmatprep.subr.bf16.mxu0 %v4419_v14  ;;  %v4626_v13 = vcombine.low %v406_v1, %v410_v2  ;;  %v4491_v14 = vcombine.high %v270_v7, %v274_v8  ;;  %v258_v25 = vld [vmem:[%s7075_s1 + $0x668] sm:$0xff]  ;;  %v99_v0 = vld [vmem:[%s7075_s1 + $0x170] sm:$0xff] }
  0x9b   :  { %2715 = vmatprep.subr.bf16.mxu1 %v4547_v15  ;;  %v4619_v15 = vcombine.high %v398_v10, %v402_v11  ;;  %v382_v26 = vld [vmem:[%s7075_s1 + $0xa48] sm:$0xff]  ;;  %v223_v1 = vld [vmem:[%s7075_s1 + $0x550] sm:$0xff] }
  0x9c   :  { %v386_v28 = vld [vmem:[%s7075_s1 + $0xa68] sm:$0xff]  ;;  %v227_v2 = vld [vmem:[%s7075_s1 + $0x570] sm:$0xff] }
  0x9d   :  { %2665 = vmatpush1.bf16.msra.mxu0 %v4418_v19  ;;  %v4490_v19 = vcombine.low %v270_v7, %v274_v8  ;;  %v246_v34 = vld [vmem:[%s7075_s1 + $0x608] sm:$0xff]  ;;  %v91_v7 = vld [vmem:[%s7075_s1 + $0x130] sm:$0xff] }
  0x9e   :  { %2716 = vmatpush1.bf16.msra.mxu1 %v4546_v20  ;;  %2666 = vmatprep.subr.bf16.mxu0 %v4411_v21  ;;  %v4618_v20 = vcombine.low %v398_v10, %v402_v11  ;;  %v4483_v21 = vcombine.high %v262_v59, %v266_v17  ;;  %v250_v35 = vld [vmem:[%s7075_s1 + $0x628] sm:$0xff]  ;;  %v219_v8 = vld [vmem:[%s7075_s1 + $0x530] sm:$0xff]  ;;  %v4316_v10 = vcombine.low %v95_v63, %v99_v0 }
  0x9f   :  { %2717 = vmatprep.subr.bf16.mxu1 %v4539_v22  ;;  %v4611_v22 = vcombine.high %v390_v44, %v394_v18  ;;  %v374_v37 = vld [vmem:[%s7075_s1 + $0xa08] sm:$0xff]  ;;  %v4444_v11 = vcombine.low %v223_v1, %v227_v2 }
  0xa0   :  { %v378_v39 = vld [vmem:[%s7075_s1 + $0xa28] sm:$0xff] }
  0xa1   :  { %2667 = vmatpush1.bf16.msra.mxu0 %v4410_v29  ;;  %v4482_v29 = vcombine.low %v262_v59, %v266_v17  ;;  %v207_v59 = vld [vmem:[%s7075_s1 + $0x4d0] sm:$0xff] }
  0xa2   :  { %2718 = vmatpush1.bf16.msra.mxu1 %v4538_v30  ;;  %2668 = vmatprep.subr.bf16.mxu0 %v4403_v32  ;;  %v4610_v30 = vcombine.low %v390_v44, %v394_v18  ;;  %v4475_v32 = vcombine.high %v254_v23, %v258_v25  ;;  %v211_v17 = vld [vmem:[%s7075_s1 + $0x4f0] sm:$0xff] }
  0xa3   :  { %2719 = vmatprep.subr.bf16.mxu1 %v4531_v33  ;;  %v4603_v33 = vcombine.high %v382_v26, %v386_v28 }
  0xa5   :  { %2669 = vmatpush1.bf16.msra.mxu0 %v4402_v40  ;;  %v4474_v40 = vcombine.low %v254_v23, %v258_v25  ;;  %v5829_v23 = vld [vmem:[%s7076_s0 + $0x4] ss:$24 sps:$4 sm:$0xff]   ;;  %v199_v25 = vld [vmem:[%s7075_s1 + $0x490] sm:$0xff] }
  0xa6   :  { %2720 = vmatpush1.bf16.msra.mxu1 %v4530_v41  ;;  %2670 = vmatprep.subr.bf16.mxu0 %v4523_v42  ;;  %v4602_v41 = vcombine.low %v382_v26, %v386_v28  ;;  %v4467_v42 = vcombine.high %v246_v34, %v250_v35  ;;  %v203_v26 = vld [vmem:[%s7075_s1 + $0x4b0] sm:$0xff]  ;;  %v5841_v28 = vld [vmem:[%s7076_s0 + $0xc] ss:$24 sps:$4 sm:$0xff]  }
  0xa7   :  { %2721 = vmatprep.subr.bf16.mxu1 %v4651_v43  ;;  %v4595_v43 = vcombine.high %v374_v37, %v378_v39 }
  0xa9   :  { %2671 = vmatpush2.bf16.msra.mxu0 %v4522_v50  ;;  %v4466_v50 = vcombine.low %v246_v34, %v250_v35  ;;  %v63_v34 = vld [vmem:[%s7075_s1 + $0x50] sm:$0xff] }
  0xaa   :  { %2722 = vmatpush2.bf16.msra.mxu1 %v4650_v51  ;;  %2672 = vmatprep.subr.bf16.mxu0 %v4515_v52  ;;  %v4594_v51 = vcombine.low %v374_v37, %v378_v39  ;;  %v4333_v52 = vcombine.high %v111_v46, %v115_v47  ;;  %v67_v35 = vld [vmem:[%s7075_s1 + $0x70] sm:$0xff] }
  0xab   :  { %2723 = vmatprep.subr.bf16.mxu1 %v4643_v53  ;;  %v4461_v53 = vcombine.high %v239_v48, %v243_v49  ;;  %v191_v37 = vld [vmem:[%s7075_s1 + $0x450] sm:$0xff] }
  0xac   :  { %v195_v39 = vld [vmem:[%s7075_s1 + $0x470] sm:$0xff] }
  0xad   :  { %2673 = vmatpush2.bf16.msra.mxu0 %v4514_v60  ;;  %v4332_v60 = vcombine.low %v111_v46, %v115_v47  ;;  %v55_v46 = vld [vmem:[%s7075_s1 + $0x10] sm:$0xff] }
  0xae   :  { %2724 = vmatpush2.bf16.msra.mxu1 %v4642_v61  ;;  %2674 = vmatprep.subr.bf16.mxu0 %v4507_v62  ;;  %v4460_v61 = vcombine.low %v239_v48, %v243_v49  ;;  %v4325_v62 = vcombine.high %v103_v54, %v107_v55  ;;  %v59_v47 = vld [vmem:[%s7075_s1 + $0x30] sm:$0xff] }
  0xaf   :  { %2725 = vmatprep.subr.bf16.mxu1 %v4635_v56  ;;  %v4453_v56 = vcombine.high %v231_v9, %v235_v58  ;;  %v183_v48 = vld [vmem:[%s7075_s1 + $0x410] sm:$0xff] }
  0xb0   :  { %v187_v49 = vld [vmem:[%s7075_s1 + $0x430] sm:$0xff] }
  0xb1   :  { %2675 = vmatpush2.bf16.msra.mxu0 %v4506_v3  ;;  %v4324_v3 = vcombine.low %v103_v54, %v107_v55  ;;  %v175_v54 = vld [vmem:[%s7075_s1 + $0x3d0] sm:$0xff] }
  0xb2   :  { %2726 = vmatpush2.bf16.msra.mxu1 %v4634_v4  ;;  %2676 = vmatprep.subr.bf16.mxu0 %v4499_v5  ;;  %v4452_v4 = vcombine.low %v231_v9, %v235_v58  ;;  %v4317_v5 = vcombine.high %v95_v63, %v99_v0  ;;  %v179_v55 = vld [vmem:[%s7075_s1 + $0x3f0] sm:$0xff] }
  0xb3   :  { %2727 = vmatprep.subr.bf16.mxu1 %v4627_v6  ;;  %v87_v6 = vld [vmem:[%s7075_s1 + $0x110] sm:$0xff] }
  0xb4   :  { %v4308_v44 = vcombine.low %v87_v6, %v91_v7  ;;  %v303_v9 = vld [vmem:[%s7075_s1 + $0x7d0] sm:$0xff] }
  0xb5   :  { %2677 = vmatpush2.bf16.msra.mxu0 %v4498_v12  ;;  %v4309_v12 = vcombine.high %v87_v6, %v91_v7  ;;  %v307_v58 = vld [vmem:[%s7075_s1 + $0x7f0] sm:$0xff] }
  0xb6   :  { %2728 = vmatpush2.bf16.msra.mxu1 %v4626_v13  ;;  %2678 = vmatprep.subr.bf16.mxu0 %v4491_v14  ;;  %v79_v14 = vld [vmem:[%s7075_s1 + $0xd0] sm:$0xff] }
  0xb7   :  { %2729 = vmatprep.subr.bf16.mxu1 %v4619_v15  ;;  %v83_v15 = vld [vmem:[%s7075_s1 + $0xf0] sm:$0xff] }
  0xb8   :  { %v167_v63 = vld [vmem:[%s7075_s1 + $0x390] sm:$0xff] }
  0xb9   :  { %2679 = vmatpush2.bf16.msra.mxu0 %v4490_v19  ;;  %v4301_v19 = vcombine.high %v79_v14, %v83_v15  ;;  %v171_v0 = vld [vmem:[%s7075_s1 + $0x3b0] sm:$0xff] }
  0xba   :  { %2730 = vmatpush2.bf16.msra.mxu1 %v4618_v20  ;;  %2680 = vmatprep.subr.bf16.mxu0 %v4483_v21  ;;  %v4429_v20 = vcombine.high %v207_v59, %v211_v17  ;;  %v71_v21 = vld [vmem:[%s7075_s1 + $0x90] sm:$0xff] }
  0xbb   :  { %2731 = vmatprep.subr.bf16.mxu1 %v4611_v22  ;;  %v75_v22 = vld [vmem:[%s7075_s1 + $0xb0] sm:$0xff] }
  0xbc   :  { %v159_v6 = vld [vmem:[%s7075_s1 + $0x350] sm:$0xff] }
  0xbd   :  { %2681 = vmatpush2.bf16.msra.mxu0 %v4482_v29  ;;  %v4300_v29 = vcombine.low %v79_v14, %v83_v15  ;;  %v163_v7 = vld [vmem:[%s7075_s1 + $0x370] sm:$0xff] }
  0xbe   :  { %2732 = vmatpush2.bf16.msra.mxu1 %v4610_v30  ;;  %2682 = vmatprep.subr.bf16.mxu0 %v4475_v32  ;;  %v4428_v30 = vcombine.low %v207_v59, %v211_v17  ;;  %v4293_v32 = vcombine.high %v71_v21, %v75_v22  ;;  %v151_v14 = vld [vmem:[%s7075_s1 + $0x310] sm:$0xff] }
  0xbf   :  { %2733 = vmatprep.subr.bf16.mxu1 %v4603_v33  ;;  %v4421_v33 = vcombine.high %v199_v25, %v203_v26  ;;  %v155_v15 = vld [vmem:[%s7075_s1 + $0x330] sm:$0xff] }
  0xc0   :  { %v279_v59 = vld [vmem:[%s7075_s1 + $0x710] sm:$0xff] }
  0xc1   :  { %2683 = vmatpush2.bf16.msra.mxu0 %v4474_v40  ;;  %v4292_v40 = vcombine.low %v71_v21, %v75_v22  ;;  %v283_v17 = vld [vmem:[%s7075_s1 + $0x730] sm:$0xff] }
  0xc2   :  { %2734 = vmatpush2.bf16.msra.mxu1 %v4602_v41  ;;  %2684 = vmatprep.subr.bf16.mxu0 %v4467_v42  ;;  %v4420_v41 = vcombine.low %v199_v25, %v203_v26  ;;  %v4285_v42 = vcombine.high %v63_v34, %v67_v35  ;;  %v143_v21 = vld [vmem:[%s7075_s1 + $0x2d0] sm:$0xff] }
  0xc3   :  { %2735 = vmatprep.subr.bf16.mxu1 %v4595_v43  ;;  %v4413_v43 = vcombine.high %v191_v37, %v195_v39  ;;  %v147_v22 = vld [vmem:[%s7075_s1 + $0x2f0] sm:$0xff] }
  0xc4   :  { %v271_v25 = vld [vmem:[%s7075_s1 + $0x6d0] sm:$0xff] }
  0xc5   :  { %2685 = vmatpush2.bf16.msra.mxu0 %v4466_v50  ;;  %v4284_v50 = vcombine.low %v63_v34, %v67_v35  ;;  %v275_v26 = vld [vmem:[%s7075_s1 + $0x6f0] sm:$0xff] }
  0xc6   :  { %2736 = vmatpush2.bf16.msra.mxu1 %v4594_v51  ;;  %2756 = vmatprep.subr.bf16.mxu0 %v4333_v52  ;;  %v4412_v51 = vcombine.low %v191_v37, %v195_v39  ;;  %v4277_v52 = vcombine.high %v55_v46, %v59_v47  ;;  %v135_v34 = vld [vmem:[%s7075_s1 + $0x290] sm:$0xff] }
  0xc7   :  { %2807 = vmatprep.subr.bf16.mxu1 %v4461_v53  ;;  %v4405_v53 = vcombine.high %v183_v48, %v187_v49  ;;  %v139_v35 = vld [vmem:[%s7075_s1 + $0x2b0] sm:$0xff] }
  0xc8   :  { %2687 = vmatmul.mubr.bf16.vlgmr.msra.gmra.mxu0 %v5348_v16  ;;  %v4445_v16 = vcombine.high %v223_v1, %v227_v2  ;;  %v295_v1 = vld [vmem:[%s7075_s1 + $0x790] sm:$0xff] }
  0xc9   :  { %2738 = vmatmul.mubr.bf16.vlgmr.msra.gmra.mxu1 %v5557_v31  ;;  %2757 = vmatpush1.bf16.msra.mxu0 %v4332_v60  ;;  %v215_v31 = vld [vmem:[%s7075_s1 + $0x510] sm:$0xff]  ;;  %v4276_v60 = vcombine.low %v55_v46, %v59_v47 }
  0xca   :  { %2808 = vmatpush1.bf16.msra.mxu1 %v4460_v61  ;;  %2758 = vmatprep.subr.bf16.mxu0 %v4325_v62  ;;  %v4437_v13 = vcombine.high %v215_v31, %v219_v8  ;;  %v4436_v18 = vcombine.low %v215_v31, %v219_v8  ;;  %v4404_v61 = vcombine.low %v183_v48, %v187_v49  ;;  %v299_v2 = vld [vmem:[%s7075_s1 + $0x7b0] sm:$0xff] }
  0xcb   :  { %2809 = vmatprep.subr.bf16.mxu1 %v4453_v56  ;;  %2696 = vmatprep.mubr.bf16.mxu0 %v5368_v27  ;;  %v4397_v62 = vcombine.high %v175_v54, %v179_v55  ;;  %v4525_v56 = vcombine.high %v303_v9, %v307_v58  ;;  %v287_v31 = vld [vmem:[%s7075_s1 + $0x750] sm:$0xff] }
  0xcc   :  { %2747 = vmatprep.mubr.bf16.mxu1 %v5574_v45  ;;  %v291_v8 = vld [vmem:[%s7075_s1 + $0x770] sm:$0xff] }
  0xcd   :  { %2759 = vmatpush1.bf16.msra.mxu0 %v4324_v3  ;;  %v4396_v3 = vcombine.low %v175_v54, %v179_v55  ;;  %v263_v37 = vld [vmem:[%s7075_s1 + $0x690] sm:$0xff] }
  0xce   :  { %2810 = vmatpush1.bf16.msra.mxu1 %v4452_v4  ;;  %2760 = vmatprep.subr.bf16.mxu0 %v4317_v5  ;;  %v4524_v4 = vcombine.low %v303_v9, %v307_v58  ;;  %v4389_v5 = vcombine.high %v167_v63, %v171_v0  ;;  %v267_v39 = vld [vmem:[%s7075_s1 + $0x6b0] sm:$0xff] }
  0xcf   :  { %2811 = vmatprep.subr.bf16.mxu1 %v4445_v16  ;;  %v4517_v16 = vcombine.high %v295_v1, %v299_v2  ;;  %v127_v46 = vld [vmem:[%s7075_s1 + $0x250] sm:$0xff] }
  0xd0   :  { %2697 = vmatmul.mubr.bf16.gmra.mxu0 %v5387_v38  ;;  %v131_v47 = vld [vmem:[%s7075_s1 + $0x270] sm:$0xff] }
  0xd1   :  { %2761 = vmatpush1.bf16.msra.mxu0 %v4316_v10  ;;  %2748 = vmatmul.mubr.bf16.gmra.mxu1 %v5597_v57  ;;  %v4388_v10 = vcombine.low %v167_v63, %v171_v0  ;;  %v255_v48 = vld [vmem:[%s7075_s1 + $0x650] sm:$0xff] }
  0xd2   :  { %2812 = vmatpush1.bf16.msra.mxu1 %v4444_v11  ;;  %2762 = vmatprep.subr.bf16.mxu0 %v4309_v12  ;;  %v4516_v11 = vcombine.low %v295_v1, %v299_v2  ;;  %v4381_v12 = vcombine.high %v159_v6, %v163_v7  ;;  %v259_v49 = vld [vmem:[%s7075_s1 + $0x670] sm:$0xff] }
  0xd3   :  { %2813 = vmatprep.subr.bf16.mxu1 %v4437_v13  ;;  %2788 = vmatprep.mubr.bf16.mxu0 %v5829_v23  ;;  %v4509_v13 = vcombine.high %v287_v31, %v291_v8  ;;  %v4477_v54 = vcombine.high %v255_v48, %v259_v49  ;;  %v119_v55 = vld [vmem:[%s7075_s1 + $0x210] sm:$0xff] }
  0xd4   :  { %2839 = vmatprep.mubr.bf16.mxu1 %v5841_v28  ;;  %v123_v9 = vld [vmem:[%s7075_s1 + $0x230] sm:$0xff] }
  0xd5   :  { %2763 = vmatpush1.bf16.msra.mxu0 %v4308_v44  ;;  %v4380_v44 = vcombine.low %v159_v6, %v163_v7  ;;  %v247_v58 = vld [vmem:[%s7075_s1 + $0x610] sm:$0xff]  ;;  %v4341_v63 = vcombine.high %v119_v55, %v123_v9  ;;  %v5984_v7 = vld [vmem:[%s7077_s2] sm:$0xff] }
  0xd6   :  { %2814 = vmatpush1.bf16.msra.mxu1 %v4436_v18  ;;  %2764 = vmatprep.subr.bf16.mxu0 %v4301_v19  ;;  %v4508_v18 = vcombine.low %v287_v31, %v291_v8  ;;  %v4373_v19 = vcombine.high %v151_v14, %v155_v15  ;;  %v367_v1 = vld [vmem:[%s7075_s1 + $0x9d0] sm:$0xff] }
  0xd7   :  { %2815 = vmatprep.subr.bf16.mxu1 %v4429_v20  ;;  %v4501_v20 = vcombine.high %v279_v59, %v283_v17  ;;  %v371_v2 = vld [vmem:[%s7075_s1 + $0x9f0] sm:$0xff] }
  0xd8   :  { %v4589_v31 = vcombine.high %v367_v1, %v371_v2 }
  0xd9   :  { %2765 = vmatpush1.bf16.msra.mxu0 %v4300_v29  ;;  %v4372_v29 = vcombine.low %v151_v14, %v155_v15  ;;  %v108_v14 = vld [vmem:[%s7075_s1 + $0x1b8] sm:$0xff] }
  0xda   :  { %2816 = vmatpush1.bf16.msra.mxu1 %v4428_v30  ;;  %2766 = vmatprep.subr.bf16.mxu0 %v4293_v32  ;;  %v4500_v30 = vcombine.low %v279_v59, %v283_v17  ;;  %v4365_v32 = vcombine.high %v143_v21, %v147_v22  ;;  %v4588_v59 = vcombine.low %v367_v1, %v371_v2  ;;  %v339_v1 = vld [vmem:[%s7075_s1 + $0x8f0] sm:$0xff]  ;;  %v80_v2 = vld [vmem:[%s7075_s1 + $0xd8] sm:$0xff] }
  0xdb   :  { %2817 = vmatprep.subr.bf16.mxu1 %v4421_v33  ;;  %v4493_v33 = vcombine.high %v271_v25, %v275_v26 }
  0xdd   :  { %2767 = vmatpush1.bf16.msra.mxu0 %v4292_v40  ;;  %v4364_v40 = vcombine.low %v143_v21, %v147_v22  ;;  %v355_v21 = vld [vmem:[%s7075_s1 + $0x970] sm:$0xff] }
  0xde   :  { %2818 = vmatpush1.bf16.msra.mxu1 %v4420_v41  ;;  %2768 = vmatprep.subr.bf16.mxu0 %v4285_v42  ;;  %v4492_v41 = vcombine.low %v271_v25, %v275_v26  ;;  %v4357_v42 = vcombine.high %v135_v34, %v139_v35  ;;  %v6018_v25 = vld [vmem:[%s7076_s0] ss:$24 sps:$4 sm:$0xff]  }
  0xdf   :  { %2819 = vmatprep.subr.bf16.mxu1 %v4413_v43  ;;  %v4485_v43 = vcombine.high %v263_v37, %v267_v39  ;;  %v96_v26 = vld [vmem:[%s7075_s1 + $0x158] sm:$0xff] }
  0xe1   :  { %2769 = vmatpush1.bf16.msra.mxu0 %v4284_v50  ;;  %v4356_v50 = vcombine.low %v135_v34, %v139_v35 }
  0xe2   :  { %2820 = vmatpush1.bf16.msra.mxu1 %v4412_v51  ;;  %2770 = vmatprep.subr.bf16.mxu0 %v4277_v52  ;;  %v439_v51 = vlaneseq  ;;  %v4484_v52 = vcombine.low %v263_v37, %v267_v39 }
  0xe3   :  { %2821 = vmatprep.subr.bf16.mxu1 %v4405_v53  ;;  %v4349_v53 = vcombine.high %v127_v46, %v131_v47 }
  0xe5   :  { %2771 = vmatpush1.bf16.msra.mxu0 %v4276_v60  ;;  %v251_v60 = vld [vmem:[%s7075_s1 + $0x630] sm:$0xff] }
  0xe6   :  { %2822 = vmatpush1.bf16.msra.mxu1 %v4404_v61  ;;  %2772 = vmatprep.subr.bf16.mxu0 %v4397_v62  ;;  %v4348_v61 = vcombine.low %v127_v46, %v131_v47  ;;  %v5964_v62 = vshrl.u32 %v439_v51, 7  ;;  %v4469_v0 = vcombine.high %v247_v58, %v251_v60  ;;  %v4468_v6 = vcombine.low %v247_v58, %v251_v60  ;;  %v343_v46 = vld [vmem:[%s7075_s1 + $0x910] sm:$0xff] }
  0xe7   :  { %2823 = vmatprep.subr.bf16.mxu1 %v4525_v56  ;;  %v4476_v56 = vcombine.low %v255_v48, %v259_v49  ;;  %v347_v47 = vld [vmem:[%s7075_s1 + $0x930] sm:$0xff]  ;;  %v88_v49 = vld [vmem:[%s7075_s1 + $0x118] sm:$0xff] }
  0xe8   :  { %v5987_v8 = vsub.s32 1, %v5964_v62  ;;  %v4565_v58 = vcombine.high %v343_v46, %v347_v47 }
  0xe9   :  { %2773 = vmatpush2.bf16.msra.mxu0 %v4396_v3  ;;  %v112_v3 = vld [vmem:[%s7075_s1 + $0x1d8] sm:$0xff] }
  0xea   :  { %2824 = vmatpush2.bf16.msra.mxu1 %v4524_v4  ;;  %2774 = vmatprep.subr.bf16.mxu0 %v4389_v5  ;;  %v116_v4 = vld [vmem:[%s7075_s1 + $0x1f8] sm:$0xff]  ;;  %v4340_v5 = vcombine.low %v119_v55, %v123_v9 }
  0xeb   :  { %2825 = vmatprep.subr.bf16.mxu1 %v4517_v16  ;;  %v5979_v16 = vsub.s32 0, %v5964_v62  ;;  %v4334_v17 = vcombine.low %v112_v3, %v116_v4 }
  0xed   :  { %2775 = vmatpush2.bf16.msra.mxu0 %v4388_v10  ;;  %v4335_v10 = vcombine.high %v112_v3, %v116_v4  ;;  %v6003_v15 = vrot.slane %v5984_v7, %v5979_v16  ;;  %v84_v3 = vld [vmem:[%s7075_s1 + $0xf8] sm:$0xff] }
  0xee   :  { %2826 = vmatpush2.bf16.msra.mxu1 %v4516_v11  ;;  %2776 = vmatprep.subr.bf16.mxu0 %v4381_v12  ;;  %v359_v11 = vld [vmem:[%s7075_s1 + $0x990] sm:$0xff] }
  0xef   :  { %2827 = vmatprep.subr.bf16.mxu1 %v4509_v13  ;;  %v363_v12 = vld [vmem:[%s7075_s1 + $0x9b0] sm:$0xff]  ;;  %v104_v13 = vld [vmem:[%s7075_s1 + $0x198] sm:$0xff] }
  0xf0   :  { %v4580_v34 = vcombine.low %v359_v11, %v363_v12  ;;  %v4326_v37 = vcombine.low %v104_v13, %v108_v14 }
  0xf1   :  { %2777 = vmatpush2.bf16.msra.mxu0 %v4380_v44  ;;  %v4581_v44 = vcombine.high %v359_v11, %v363_v12 }
  0xf2   :  { %2828 = vmatpush2.bf16.msra.mxu1 %v4508_v18  ;;  %2778 = vmatprep.subr.bf16.mxu0 %v4373_v19  ;;  %v6007_v18 = vrot.slane %v5984_v7, %v5987_v8  ;;  %v4327_v19 = vcombine.high %v104_v13, %v108_v14  ;;  %v4303_v14 = vcombine.high %v80_v2, %v84_v3 }
  0xf3   :  { %2829 = vmatprep.subr.bf16.mxu1 %v4501_v20  ;;  %v351_v20 = vld [vmem:[%s7075_s1 + $0x950] sm:$0xff] }
  0xf4   :  { %v4573_v39 = vcombine.high %v351_v20, %v355_v21 }
  0xf5   :  { %2779 = vmatpush2.bf16.msra.mxu0 %v4372_v29  ;;  %v100_v29 = vld [vmem:[%s7075_s1 + $0x178] sm:$0xff] }
  0xf6   :  { %2830 = vmatpush2.bf16.msra.mxu1 %v4500_v30  ;;  %2780 = vmatprep.subr.bf16.mxu0 %v4365_v32  ;;  %v4318_v9 = vcombine.low %v96_v26, %v100_v29 }
  0xf7   :  { %2831 = vmatprep.subr.bf16.mxu1 %v4493_v33  ;;  %v6031_v33 = vld [vmem:[%s7076_s0 + $0x8] ss:$24 sps:$4 sm:$0xff]  }
  0xf9   :  { %2781 = vmatpush2.bf16.msra.mxu0 %v4364_v40 }
  0xfa   :  { %2832 = vmatpush2.bf16.msra.mxu1 %v4492_v41  ;;  %2782 = vmatprep.subr.bf16.mxu0 %v4357_v42 }
  0xfb   :  { %2833 = vmatprep.subr.bf16.mxu1 %v4485_v43  ;;  %v4319_v43 = vcombine.high %v96_v26, %v100_v29 }
  0xfd   :  { %2783 = vmatpush2.bf16.msra.mxu0 %v4356_v50  ;;  %v92_v50 = vld [vmem:[%s7075_s1 + $0x138] sm:$0xff] }
  0xfe   :  { %2834 = vmatpush2.bf16.msra.mxu1 %v4484_v52  ;;  %2784 = vmatprep.subr.bf16.mxu0 %v4349_v53  ;;  %v4310_v11 = vcombine.low %v88_v49, %v92_v50 }
  0xff   :  { %2835 = vmatprep.subr.bf16.mxu1 %v4477_v54  ;;  %v4572_v54 = vcombine.low %v351_v20, %v355_v21  ;;  %v6086_v20 = vld [vmem:[%s7076_s0 + $0x14] ss:$24 sps:$4 sm:$0xff]   ;;  %v72_v21 = vld [vmem:[%s7075_s1 + $0x98] sm:$0xff] }
 0x101   :  { %2785 = vmatpush2.bf16.msra.mxu0 %v4348_v61 }
 0x102   :  { %2836 = vmatpush2.bf16.msra.mxu1 %v4476_v56  ;;  %2786 = vmatprep.subr.bf16.mxu0 %v4341_v63  ;;  %v4311_v63 = vcombine.high %v88_v49, %v92_v50  ;;  %v311_v50 = vld [vmem:[%s7075_s1 + $0x810] sm:$0xff] }
 0x103   :  { %2837 = vmatprep.subr.bf16.mxu1 %v4469_v0  ;;  %v335_v0 = vld [vmem:[%s7075_s1 + $0x8d0] sm:$0xff] }
 0x104   :  { %v4557_v12 = vcombine.high %v335_v0, %v339_v1 }
 0x105   :  { %2787 = vmatpush2.bf16.msra.mxu0 %v4340_v5 }
 0x106   :  { %2838 = vmatpush2.bf16.msra.mxu1 %v4468_v6  ;;  %2858 = vmatprep.subr.bf16.mxu0 %v4589_v31  ;;  %v4564_v6 = vcombine.low %v343_v46, %v347_v47 }
 0x107   :  { %2909 = vmatprep.subr.bf16.mxu1 %v4335_v10 }
 0x108   :  { %v2484_v22 = vpop.f32.mrf.mxu0  ;;  %2789 = vmatmul.mubr.bf16.vlgmr.msra.gmra.mxu0 %v6018_v25 }
 0x109   :  { %v2485_v30 = vadd.f32 %v2484_v22, %v6003_v15  ;;  %v2535_v32 = vpop.f32.mrf.mxu1  ;;  %2859 = vmatpush1.bf16.msra.mxu0 %v4588_v59  ;;  %2840 = vmatmul.mubr.bf16.vlgmr.msra.gmra.mxu1 %v6031_v33  ;;  %v327_v59 = vld [vmem:[%s7075_s1 + $0x890] sm:$0xff]  ;;  %v76_v22 = vld [vmem:[%s7075_s1 + $0xb8] sm:$0xff] }
 0x10a   :  { %v2486_v35 = vpop.f32.mrf.mxu0  ;;  %2910 = vmatpush1.bf16.msra.mxu1 %v4334_v17  ;;  %2860 = vmatprep.subr.bf16.mxu0 %v4581_v44  ;;  %v331_v17 = vld [vmem:[%s7075_s1 + $0x8b0] sm:$0xff]  ;;  %v4294_v47 = vcombine.low %v72_v21, %v76_v22 }
 0x10b   :  { %v6034_v40 = vadd.f32 %v2535_v32, %v2485_v30  ;;  %v2487_v41 = vadd.f32 %v2486_v35, %v6007_v18  ;;  %v2537_v42 = vpop.f32.mrf.mxu1  ;;  %2911 = vmatprep.subr.bf16.mxu1 %v4327_v19  ;;  %2798 = vmatprep.mubr.bf16.mxu0 %v5359_v24  ;;  %v4302_v32 = vcombine.low %v80_v2, %v84_v3 }
 0x10c   :  { %v2488_v48 = vpop.f32.mrf.mxu0  ;;  %2849 = vmatprep.mubr.bf16.mxu1 %v5368_v27  ;;  %v4548_v46 = vcombine.low %v327_v59, %v331_v17 }
 0x10d   :  { %v6051_v51 = vadd.f32 %v2537_v42, %v2487_v41  ;;  %v2489_v52 = vadd.f32 %v2488_v48, %v6003_v15  ;;  %v2539_v53 = vpop.f32.mrf.mxu1  ;;  %2861 = vmatpush1.bf16.msra.mxu0 %v4580_v34  ;;  %v4549_v34 = vcombine.high %v327_v59, %v331_v17  ;;  %v64_v42 = vld [vmem:[%s7075_s1 + $0x58] sm:$0xff] }
 0x10e   :  { %v2490_v55 = vpop.f32.mrf.mxu0  ;;  %2912 = vmatpush1.bf16.msra.mxu1 %v4326_v37  ;;  %2862 = vmatprep.subr.bf16.mxu0 %v4573_v39  ;;  %v4295_v37 = vcombine.high %v72_v21, %v76_v22  ;;  %v319_v39 = vld [vmem:[%s7075_s1 + $0x850] sm:$0xff]  ;;  %v160_v21 = vld [vmem:[%s7075_s1 + $0x358] sm:$0xff] }
 0x10f   :  { %v6054_v60 = vadd.f32 %v2539_v53, %v2489_v52  ;;  %v2491_v61 = vadd.f32 %v2490_v55, %v6007_v18  ;;  %v2541_v56 = vpop.f32.mrf.mxu1  ;;  %2913 = vmatprep.subr.bf16.mxu1 %v4319_v43  ;;  %v68_v43 = vld [vmem:[%s7075_s1 + $0x78] sm:$0xff]  ;;  %v315_v52 = vld [vmem:[%s7075_s1 + $0x830] sm:$0xff] }
 0x110   :  { %v2494_v4 = vpop.f32.mrf.mxu0  ;;  %2799 = vmatmul.mubr.bf16.gmra.mxu0 %v5384_v36  ;;  %v4287_v49 = vcombine.high %v64_v42, %v68_v43  ;;  %v56_v53 = vld [vmem:[%s7075_s1 + $0x18] sm:$0xff]  ;;  %v4532_v2 = vcombine.low %v311_v50, %v315_v52 }
 0x111   :  { %v6070_v5 = vadd.f32 %v2541_v56, %v2491_v61  ;;  %2863 = vmatpush1.bf16.msra.mxu0 %v4572_v54  ;;  %v2495_v31 = vadd.f32 %v2494_v4, %v6003_v15  ;;  %v2545_v10 = vpop.f32.mrf.mxu1  ;;  %2850 = vmatmul.mubr.bf16.gmra.mxu1 %v5387_v38  ;;  %v60_v54 = vld [vmem:[%s7075_s1 + $0x38] sm:$0xff]  ;;  %v431_v56 = vld [vmem:[%s7075_s1 + $0xbd0] sm:$0xff] }
 0x112   :  { %2914 = vmatpush1.bf16.msra.mxu1 %v4318_v9  ;;  %2864 = vmatprep.subr.bf16.mxu0 %v4565_v58  ;;  %v2496_v13 = vpop.f32.mrf.mxu0  ;;  %v4286_v9 = vcombine.low %v64_v42, %v68_v43  ;;  %v4533_v58 = vcombine.high %v311_v50, %v315_v52  ;;  %v4279_v61 = vcombine.high %v56_v53, %v60_v54  ;;  %v164_v22 = vld [vmem:[%s7075_s1 + $0x378] sm:$0xff] }
 0x113   :  { %2915 = vmatprep.subr.bf16.mxu1 %v4311_v63  ;;  %v2497_v15 = vadd.f32 %v2496_v13, %v6007_v18  ;;  %v6081_v44 = vadd.f32 %v2545_v10, %v2495_v31  ;;  %v2547_v19 = vpop.f32.mrf.mxu1  ;;  %2890 = vmatprep.mubr.bf16.mxu0 %v6086_v20  ;;  %v4556_v18 = vcombine.low %v335_v0, %v339_v1  ;;  %v435_v63 = vld [vmem:[%s7075_s1 + $0xbf0] sm:$0xff]  ;;  %v176_v0 = vld [vmem:[%s7075_s1 + $0x3d8] sm:$0xff] }
 0x114   :  { %v2498_v26 = vpop.f32.mrf.mxu0  ;;  %2941 = vmatprep.mubr.bf16.mxu1 %v5829_v23  ;;  %v323_v23 = vld [vmem:[%s7075_s1 + $0x870] sm:$0xff]  ;;  %v180_v1 = vld [vmem:[%s7075_s1 + $0x3f8] sm:$0xff]  ;;  %v4278_v3 = vcombine.low %v56_v53, %v60_v54  ;;  %v4653_v4 = vcombine.high %v431_v56, %v435_v63  ;;  %v4652_v13 = vcombine.low %v431_v56, %v435_v63 }
 0x115   :  { %2865 = vmatpush1.bf16.msra.mxu0 %v4564_v6  ;;  %v6096_v29 = vadd.f32 %v2547_v19, %v2497_v15  ;;  %v2549_v30 = vpop.f32.mrf.mxu1  ;;  %v4541_v48 = vcombine.high %v319_v39, %v323_v23  ;;  %v4540_v55 = vcombine.low %v319_v39, %v323_v23  ;;  %v4399_v6 = vcombine.high %v176_v0, %v180_v1  ;;  %v423_v31 = vld [vmem:[%s7075_s1 + $0xb90] sm:$0xff]  ;;  %v156_v39 = vld [vmem:[%s7075_s1 + $0x338] sm:$0xff] }
 0x116   :  { %2916 = vmatpush1.bf16.msra.mxu1 %v4310_v11  ;;  %2866 = vmatprep.subr.bf16.mxu0 %v4557_v12  ;;  %v2499_v35 = vpop.f32.mrf.mxu0  ;;  %v427_v10 = vld [vmem:[%s7075_s1 + $0xbb0] sm:$0xff]  ;;  %v168_v11 = vld [vmem:[%s7075_s1 + $0x398] sm:$0xff] }
 0x117   :  { %2917 = vmatprep.subr.bf16.mxu1 %v4303_v14  ;;  %v2550_v41 = vpop.f32.mrf.mxu1  ;;  %v172_v12 = vld [vmem:[%s7075_s1 + $0x3b8] sm:$0xff]  ;;  %v4398_v14 = vcombine.low %v176_v0, %v180_v1  ;;  %v4645_v59 = vcombine.high %v423_v31, %v427_v10  ;;  %v415_v15 = vld [vmem:[%s7075_s1 + $0xb50] sm:$0xff]  ;;  %v4644_v26 = vcombine.low %v423_v31, %v427_v10 }
 0x118   :  { %v4391_v17 = vcombine.high %v168_v11, %v172_v12  ;;  %v419_v19 = vld [vmem:[%s7075_s1 + $0xb70] sm:$0xff]  ;;  %v4382_v41 = vcombine.low %v160_v21, %v164_v22 }
 0x119   :  { %2867 = vmatpush1.bf16.msra.mxu0 %v4556_v18  ;;  %v4390_v18 = vcombine.low %v168_v11, %v172_v12  ;;  %v4637_v30 = vcombine.high %v415_v15, %v419_v19  ;;  %v411_v35 = vld [vmem:[%s7075_s1 + $0xb30] sm:$0xff]  ;;  %v4636_v23 = vcombine.low %v415_v15, %v419_v19 }
 0x11a   :  { %2918 = vmatpush1.bf16.msra.mxu1 %v4302_v32  ;;  %2868 = vmatprep.subr.bf16.mxu0 %v4549_v34  ;;  %v4383_v32 = vcombine.high %v160_v21, %v164_v22  ;;  %v407_v34 = vld [vmem:[%s7075_s1 + $0xb10] sm:$0xff] }
 0x11b   :  { %2919 = vmatprep.subr.bf16.mxu1 %v4295_v37  ;;  %v152_v37 = vld [vmem:[%s7075_s1 + $0x318] sm:$0xff]  ;;  %v4629_v42 = vcombine.high %v407_v34, %v411_v35  ;;  %v4628_v50 = vcombine.low %v407_v34, %v411_v35 }
 0x11c   :  { %v4375_v43 = vcombine.high %v152_v37, %v156_v39  ;;  %v4374_v52 = vcombine.low %v152_v37, %v156_v39 }
 0x11d   :  { %2869 = vmatpush1.bf16.msra.mxu0 %v4548_v46  ;;  %v399_v46 = vld [vmem:[%s7075_s1 + $0xad0] sm:$0xff] }
 0x11e   :  { %2920 = vmatpush1.bf16.msra.mxu1 %v4294_v47  ;;  %2870 = vmatprep.subr.bf16.mxu0 %v4541_v48  ;;  %v403_v47 = vld [vmem:[%s7075_s1 + $0xaf0] sm:$0xff]  ;;  %v144_v48 = vld [vmem:[%s7075_s1 + $0x2d8] sm:$0xff] }
 0x11f   :  { %2921 = vmatprep.subr.bf16.mxu1 %v4287_v49  ;;  %v148_v49 = vld [vmem:[%s7075_s1 + $0x2f8] sm:$0xff]  ;;  %v4621_v53 = vcombine.high %v399_v46, %v403_v47  ;;  %v4620_v56 = vcombine.low %v399_v46, %v403_v47 }
 0x120   :  { %v4367_v54 = vcombine.high %v144_v48, %v148_v49  ;;  %v4366_v63 = vcombine.low %v144_v48, %v148_v49 }
 0x121   :  { %2871 = vmatpush1.bf16.msra.mxu0 %v4540_v55  ;;  %v391_v55 = vld [vmem:[%s7075_s1 + $0xa90] sm:$0xff] }
 0x122   :  { %2922 = vmatpush1.bf16.msra.mxu1 %v4286_v9  ;;  %2872 = vmatprep.subr.bf16.mxu0 %v4533_v58  ;;  %v395_v9 = vld [vmem:[%s7075_s1 + $0xab0] sm:$0xff]  ;;  %v136_v58 = vld [vmem:[%s7075_s1 + $0x298] sm:$0xff] }
 0x123   :  { %2923 = vmatprep.subr.bf16.mxu1 %v4279_v61  ;;  %v140_v61 = vld [vmem:[%s7075_s1 + $0x2b8] sm:$0xff]  ;;  %v4613_v0 = vcombine.high %v391_v55, %v395_v9  ;;  %v4612_v31 = vcombine.low %v391_v55, %v395_v9 }
 0x124   :  { %v4359_v1 = vcombine.high %v136_v58, %v140_v61  ;;  %v4358_v10 = vcombine.low %v136_v58, %v140_v61  ;;  %v352_v55 = vld [vmem:[%s7075_s1 + $0x958] sm:$0xff] }
 0x125   :  { %2873 = vmatpush1.bf16.msra.mxu0 %v4532_v2  ;;  %v383_v2 = vld [vmem:[%s7075_s1 + $0xa50] sm:$0xff]  ;;  %v356_v9 = vld [vmem:[%s7075_s1 + $0x978] sm:$0xff] }
 0x126   :  { %2924 = vmatpush1.bf16.msra.mxu1 %v4278_v3  ;;  %2874 = vmatprep.subr.bf16.mxu0 %v4653_v4  ;;  %v387_v3 = vld [vmem:[%s7075_s1 + $0xa70] sm:$0xff]  ;;  %v128_v4 = vld [vmem:[%s7075_s1 + $0x258] sm:$0xff] }
 0x127   :  { %2925 = vmatprep.subr.bf16.mxu1 %v4399_v6  ;;  %v132_v6 = vld [vmem:[%s7075_s1 + $0x278] sm:$0xff]  ;;  %v4605_v11 = vcombine.high %v383_v2, %v387_v3  ;;  %v4604_v15 = vcombine.low %v383_v2, %v387_v3  ;;  %v4575_v3 = vcombine.high %v352_v55, %v356_v9 }
 0x128   :  { %v4351_v12 = vcombine.high %v128_v4, %v132_v6  ;;  %v4350_v19 = vcombine.low %v128_v4, %v132_v6  ;;  %v220_v4 = vld [vmem:[%s7075_s1 + $0x538] sm:$0xff] }
 0x129   :  { %2875 = vmatpush2.bf16.msra.mxu0 %v4652_v13  ;;  %v375_v13 = vld [vmem:[%s7075_s1 + $0xa10] sm:$0xff]  ;;  %v344_v6 = vld [vmem:[%s7075_s1 + $0x918] sm:$0xff] }
 0x12a   :  { %2926 = vmatpush2.bf16.msra.mxu1 %v4398_v14  ;;  %2876 = vmatprep.subr.bf16.mxu0 %v4645_v59  ;;  %v379_v14 = vld [vmem:[%s7075_s1 + $0xa30] sm:$0xff]  ;;  %v120_v59 = vld [vmem:[%s7075_s1 + $0x218] sm:$0xff] }
 0x12b   :  { %2927 = vmatprep.subr.bf16.mxu1 %v4391_v17  ;;  %v124_v17 = vld [vmem:[%s7075_s1 + $0x238] sm:$0xff]  ;;  %v4597_v21 = vcombine.high %v375_v13, %v379_v14  ;;  %v4596_v34 = vcombine.low %v375_v13, %v379_v14  ;;  %v4574_v14 = vcombine.low %v352_v55, %v356_v9 }
 0x12c   :  { %v4343_v22 = vcombine.high %v120_v59, %v124_v17  ;;  %v4342_v35 = vcombine.low %v120_v59, %v124_v17  ;;  %v324_v55 = vld [vmem:[%s7075_s1 + $0x878] sm:$0xff] }
 0x12d   :  { %2877 = vmatpush2.bf16.msra.mxu0 %v4644_v26  ;;  %v240_v26 = vld [vmem:[%s7075_s1 + $0x5d8] sm:$0xff] }
 0x12e   :  { %2928 = vmatpush2.bf16.msra.mxu1 %v4390_v18  ;;  %2878 = vmatprep.subr.bf16.mxu0 %v4637_v30  ;;  %v244_v18 = vld [vmem:[%s7075_s1 + $0x5f8] sm:$0xff] }
 0x12f   :  { %2929 = vmatprep.subr.bf16.mxu1 %v4383_v32  ;;  %v368_v30 = vld [vmem:[%s7075_s1 + $0x9d8] sm:$0xff]  ;;  %v4463_v37 = vcombine.high %v240_v26, %v244_v18  ;;  %v4462_v46 = vcombine.low %v240_v26, %v244_v18 }
 0x130   :  { %v372_v32 = vld [vmem:[%s7075_s1 + $0x9f8] sm:$0xff] }
 0x131   :  { %2879 = vmatpush2.bf16.msra.mxu0 %v4636_v23  ;;  %v4591_v39 = vcombine.high %v368_v30, %v372_v32  ;;  %v232_v23 = vld [vmem:[%s7075_s1 + $0x598] sm:$0xff]  ;;  %v4590_v47 = vcombine.low %v368_v30, %v372_v32 }
 0x132   :  { %2930 = vmatpush2.bf16.msra.mxu1 %v4382_v41  ;;  %2880 = vmatprep.subr.bf16.mxu0 %v4629_v42  ;;  %v236_v41 = vld [vmem:[%s7075_s1 + $0x5b8] sm:$0xff] }
 0x133   :  { %2931 = vmatprep.subr.bf16.mxu1 %v4375_v43  ;;  %v360_v42 = vld [vmem:[%s7075_s1 + $0x998] sm:$0xff]  ;;  %v4455_v48 = vcombine.high %v232_v23, %v236_v41 }
 0x134   :  { %v364_v43 = vld [vmem:[%s7075_s1 + $0x9b8] sm:$0xff] }
 0x135   :  { %2881 = vmatpush2.bf16.msra.mxu0 %v4628_v50  ;;  %v4583_v49 = vcombine.high %v360_v42, %v364_v43  ;;  %v224_v50 = vld [vmem:[%s7075_s1 + $0x558] sm:$0xff] }
 0x136   :  { %2932 = vmatpush2.bf16.msra.mxu1 %v4374_v52  ;;  %2882 = vmatprep.subr.bf16.mxu0 %v4621_v53  ;;  %v228_v52 = vld [vmem:[%s7075_s1 + $0x578] sm:$0xff] }
 0x137   :  { %2933 = vmatprep.subr.bf16.mxu1 %v4367_v54  ;;  %v6251_v54 = vld [vmem:[%s7076_s0 + $0x10] ss:$24 sps:$4 sm:$0xff]  }
 0x139   :  { %2883 = vmatpush2.bf16.msra.mxu0 %v4620_v56  ;;  %v4454_v56 = vcombine.low %v232_v23, %v236_v41  ;;  %v332_v41 = vld [vmem:[%s7075_s1 + $0x8b8] sm:$0xff] }
 0x13a   :  { %2934 = vmatpush2.bf16.msra.mxu1 %v4366_v63  ;;  %2884 = vmatprep.subr.bf16.mxu0 %v4613_v0  ;;  %v4582_v0 = vcombine.low %v360_v42, %v364_v43 }
 0x13b   :  { %2935 = vmatprep.subr.bf16.mxu1 %v4359_v1  ;;  %v4447_v1 = vcombine.high %v224_v50, %v228_v52 }
 0x13d   :  { %2885 = vmatpush2.bf16.msra.mxu0 %v4612_v31  ;;  %v348_v31 = vld [vmem:[%s7075_s1 + $0x938] sm:$0xff] }
 0x13e   :  { %2936 = vmatpush2.bf16.msra.mxu1 %v4358_v10  ;;  %2886 = vmatprep.subr.bf16.mxu0 %v4605_v11 }
 0x13f   :  { %2937 = vmatprep.subr.bf16.mxu1 %v4351_v12  ;;  %v4446_v12 = vcombine.low %v224_v50, %v228_v52  ;;  %v192_v50 = vld [vmem:[%s7075_s1 + $0x458] sm:$0xff] }
 0x140   :  { %v196_v52 = vld [vmem:[%s7075_s1 + $0x478] sm:$0xff] }
 0x141   :  { %2887 = vmatpush2.bf16.msra.mxu0 %v4604_v15  ;;  %v4567_v15 = vcombine.high %v344_v6, %v348_v31 }
 0x142   :  { %2938 = vmatpush2.bf16.msra.mxu1 %v4350_v19  ;;  %2888 = vmatprep.subr.bf16.mxu0 %v4597_v21  ;;  %v336_v21 = vld [vmem:[%s7075_s1 + $0x8d8] sm:$0xff] }
 0x143   :  { %2939 = vmatprep.subr.bf16.mxu1 %v4343_v22  ;;  %v340_v22 = vld [vmem:[%s7075_s1 + $0x8f8] sm:$0xff] }
 0x145   :  { %2889 = vmatpush2.bf16.msra.mxu0 %v4596_v34  ;;  %v4566_v34 = vcombine.low %v344_v6, %v348_v31  ;;  %v4414_v6 = vcombine.low %v192_v50, %v196_v52 }
 0x146   :  { %2940 = vmatpush2.bf16.msra.mxu1 %v4342_v35  ;;  %2960 = vmatprep.subr.bf16.mxu0 %v4463_v37  ;;  %v4559_v37 = vcombine.high %v336_v21, %v340_v22 }
 0x147   :  { %3011 = vmatprep.subr.bf16.mxu1 %v4591_v39  ;;  %v200_v39 = vld [vmem:[%s7075_s1 + $0x498] sm:$0xff] }
 0x148   :  { %v2586_v53 = vpop.f32.mrf.mxu0  ;;  %2891 = vmatmul.mubr.bf16.vlgmr.msra.gmra.mxu0 %v6251_v54 }
 0x149   :  { %v6261_v58 = vadd.f32 %v2586_v53, %v6034_v40  ;;  %v6263_v61 = vpop.f32.mrf.mxu1  ;;  %2961 = vmatpush1.bf16.msra.mxu0 %v4462_v46  ;;  %2942 = vmatmul.mubr.bf16.vlgmr.msra.gmra.mxu1 %v6018_v25  ;;  %v216_v40 = vld [vmem:[%s7075_s1 + $0x518] sm:$0xff] }
 0x14a   :  { %v6266_v63 = vpop.f32.mrf.mxu0  ;;  %3012 = vmatpush1.bf16.msra.mxu1 %v4590_v47  ;;  %2962 = vmatprep.subr.bf16.mxu0 %v4455_v48  ;;  %v4439_v59 = vcombine.high %v216_v40, %v220_v4  ;;  %v4438_v18 = vcombine.low %v216_v40, %v220_v4  ;;  %v4558_v47 = vcombine.low %v336_v21, %v340_v22  ;;  %v188_v40 = vld [vmem:[%s7075_s1 + $0x438] sm:$0xff] }
 0x14b   :  { %v6268_v2 = vpop.f32.mrf.mxu1  ;;  %3013 = vmatprep.subr.bf16.mxu1 %v4583_v49  ;;  %2900 = vmatprep.mubr.bf16.mxu0 %v5574_v45  ;;  %v312_v4 = vld [vmem:[%s7075_s1 + $0x818] sm:$0xff] }
 0x14c   :  { %v2590_v25 = vpop.f32.mrf.mxu0  ;;  %2951 = vmatprep.mubr.bf16.mxu1 %v5359_v24  ;;  %v208_v24 = vld [vmem:[%s7075_s1 + $0x4d8] sm:$0xff] }
 0x14d   :  { %v6285_v10 = vadd.f32 %v2590_v25, %v6054_v60  ;;  %v6287_v11 = vpop.f32.mrf.mxu1  ;;  %2963 = vmatpush1.bf16.msra.mxu0 %v4454_v56  ;;  %v212_v60 = vld [vmem:[%s7075_s1 + $0x4f8] sm:$0xff] }
 0x14e   :  { %v6289_v13 = vpop.f32.mrf.mxu0  ;;  %3014 = vmatpush1.bf16.msra.mxu1 %v4582_v0  ;;  %2964 = vmatprep.subr.bf16.mxu0 %v4447_v1  ;;  %v4431_v35 = vcombine.high %v208_v24, %v212_v60  ;;  %v4430_v43 = vcombine.low %v208_v24, %v212_v60  ;;  %v4415_v0 = vcombine.high %v192_v50, %v196_v52  ;;  %v316_v25 = vld [vmem:[%s7075_s1 + $0x838] sm:$0xff] }
 0x14f   :  { %v6291_v17 = vpop.f32.mrf.mxu1  ;;  %3015 = vmatprep.subr.bf16.mxu1 %v4575_v3  ;;  %v184_v3 = vld [vmem:[%s7075_s1 + $0x418] sm:$0xff]  ;;  %v4534_v21 = vcombine.low %v312_v4, %v316_v25 }
 0x150   :  { %v2596_v19 = vpop.f32.mrf.mxu0  ;;  %2901 = vmatmul.mubr.bf16.gmra.mxu0 %v5597_v57  ;;  %v432_v24 = vld [vmem:[%s7075_s1 + $0xbd8] sm:$0xff] }
 0x151   :  { %v6307_v26 = vadd.f32 %v2596_v19, %v6081_v44  ;;  %2965 = vmatpush1.bf16.msra.mxu0 %v4446_v12  ;;  %v6309_v30 = vpop.f32.mrf.mxu1  ;;  %2952 = vmatmul.mubr.bf16.gmra.mxu1 %v5384_v36  ;;  %v204_v44 = vld [vmem:[%s7075_s1 + $0x4b8] sm:$0xff]  ;;  %v4407_v12 = vcombine.high %v184_v3, %v188_v40  ;;  %v4406_v19 = vcombine.low %v184_v3, %v188_v40 }
 0x152   :  { %v6312_v32 = vpop.f32.mrf.mxu0  ;;  %3016 = vmatpush1.bf16.msra.mxu1 %v4574_v14  ;;  %2966 = vmatprep.subr.bf16.mxu0 %v4439_v59  ;;  %v328_v36 = vld [vmem:[%s7075_s1 + $0x898] sm:$0xff]  ;;  %v4423_v48 = vcombine.high %v200_v39, %v204_v44  ;;  %v4422_v9 = vcombine.low %v200_v39, %v204_v44  ;;  %v4535_v14 = vcombine.high %v312_v4, %v316_v25 }
 0x153   :  { %3017 = vmatprep.subr.bf16.mxu1 %v4567_v15  ;;  %v6320_v23 = vpop.f32.mrf.mxu1  ;;  %2992 = vmatprep.mubr.bf16.mxu0 %v5841_v28  ;;  %v4551_v28 = vcombine.high %v328_v36, %v332_v41  ;;  %v4550_v56 = vcombine.low %v328_v36, %v332_v41  ;;  %v304_v59 = vld [vmem:[%s7075_s1 + $0x7d8] sm:$0xff] }
 0x154   :  { %v2600_v42 = vpop.f32.mrf.mxu0  ;;  %3043 = vmatprep.mubr.bf16.mxu1 %v6086_v20  ;;  %v320_v20 = vld [vmem:[%s7075_s1 + $0x858] sm:$0xff] }
 0x155   :  { %2967 = vmatpush1.bf16.msra.mxu0 %v4438_v18  ;;  %v2651_v46 = vpop.f32.mrf.mxu1  ;;  %v4543_v1 = vcombine.high %v320_v20, %v324_v55  ;;  %v4542_v31 = vcombine.low %v320_v20, %v324_v55  ;;  %v308_v15 = vld [vmem:[%s7075_s1 + $0x7f8] sm:$0xff] }
 0x156   :  { %3018 = vmatpush1.bf16.msra.mxu1 %v4566_v34  ;;  %2968 = vmatprep.subr.bf16.mxu0 %v4431_v35  ;;  %v2601_v49 = vpop.f32.mrf.mxu0  ;;  %v436_v60 = vld [vmem:[%s7075_s1 + $0xbf8] sm:$0xff]  ;;  %v4527_v22 = vcombine.high %v304_v59, %v308_v15  ;;  %v4526_v44 = vcombine.low %v304_v59, %v308_v15 }
 0x157   :  { %3019 = vmatprep.subr.bf16.mxu1 %v4559_v37  ;;  %v2652_v53 = vpop.f32.mrf.mxu1  ;;  %v4655_v18 = vcombine.high %v432_v24, %v436_v60  ;;  %v296_v34 = vld [vmem:[%s7075_s1 + $0x798] sm:$0xff]  ;;  %v4654_v36 = vcombine.low %v432_v24, %v436_v60 }
 0x158   :  { %v300_v35 = vld [vmem:[%s7075_s1 + $0x7b8] sm:$0xff] }
 0x159   :  { %2969 = vmatpush1.bf16.msra.mxu0 %v4430_v43  ;;  %v424_v37 = vld [vmem:[%s7075_s1 + $0xb98] sm:$0xff]  ;;  %v4519_v41 = vcombine.high %v296_v34, %v300_v35  ;;  %v4518_v49 = vcombine.low %v296_v34, %v300_v35 }
 0x15a   :  { %3020 = vmatpush1.bf16.msra.mxu1 %v4558_v47  ;;  %2970 = vmatprep.subr.bf16.mxu0 %v4423_v48  ;;  %v428_v39 = vld [vmem:[%s7075_s1 + $0xbb8] sm:$0xff] }
 0x15b   :  { %3021 = vmatprep.subr.bf16.mxu1 %v4551_v28  ;;  %v4647_v42 = vcombine.high %v424_v37, %v428_v39  ;;  %v288_v43 = vld [vmem:[%s7075_s1 + $0x758] sm:$0xff]  ;;  %v4646_v28 = vcombine.low %v424_v37, %v428_v39 }
 0x15c   :  { %v292_v46 = vld [vmem:[%s7075_s1 + $0x778] sm:$0xff] }
 0x15d   :  { %2971 = vmatpush1.bf16.msra.mxu0 %v4422_v9  ;;  %v416_v47 = vld [vmem:[%s7075_s1 + $0xb58] sm:$0xff]  ;;  %v4511_v50 = vcombine.high %v288_v43, %v292_v46 }
 0x15e   :  { %3022 = vmatpush1.bf16.msra.mxu1 %v4550_v56  ;;  %2972 = vmatprep.subr.bf16.mxu0 %v4415_v0  ;;  %v420_v48 = vld [vmem:[%s7075_s1 + $0xb78] sm:$0xff]  ;;  %v4510_v56 = vcombine.low %v288_v43, %v292_v46 }
 0x15f   :  { %3023 = vmatprep.subr.bf16.mxu1 %v4543_v1  ;;  %v4639_v52 = vcombine.high %v416_v47, %v420_v48  ;;  %v280_v53 = vld [vmem:[%s7075_s1 + $0x718] sm:$0xff]  ;;  %v4638_v0 = vcombine.low %v416_v47, %v420_v48 }
 0x160   :  { %v284_v20 = vld [vmem:[%s7075_s1 + $0x738] sm:$0xff] }
 0x161   :  { %2973 = vmatpush1.bf16.msra.mxu0 %v4414_v6  ;;  %v408_v55 = vld [vmem:[%s7075_s1 + $0xb18] sm:$0xff]  ;;  %v4503_v1 = vcombine.high %v280_v53, %v284_v20 }
 0x162   :  { %3024 = vmatpush1.bf16.msra.mxu1 %v4542_v31  ;;  %2974 = vmatprep.subr.bf16.mxu0 %v4407_v12  ;;  %v412_v9 = vld [vmem:[%s7075_s1 + $0xb38] sm:$0xff]  ;;  %v4502_v31 = vcombine.low %v280_v53, %v284_v20  ;;  %v6451_v53 = vsub.s32 2, %v5964_v62 }
 0x163   :  { %3025 = vmatprep.subr.bf16.mxu1 %v4535_v14  ;;  %v4631_v3 = vcombine.high %v408_v55, %v412_v9  ;;  %v272_v40 = vld [vmem:[%s7075_s1 + $0x6d8] sm:$0xff]  ;;  %v4630_v12 = vcombine.low %v408_v55, %v412_v9  ;;  %v6454_v55 = vsub.s32 3, %v5964_v62 }
 0x164   :  { %v276_v4 = vld [vmem:[%s7075_s1 + $0x6f8] sm:$0xff] }
 0x165   :  { %2975 = vmatpush1.bf16.msra.mxu0 %v4406_v19  ;;  %v400_v25 = vld [vmem:[%s7075_s1 + $0xad8] sm:$0xff]  ;;  %v4495_v14 = vcombine.high %v272_v40, %v276_v4 }
 0x166   :  { %3026 = vmatpush1.bf16.msra.mxu1 %v4534_v21  ;;  %2976 = vmatprep.subr.bf16.mxu0 %v4527_v22  ;;  %v404_v6 = vld [vmem:[%s7075_s1 + $0xaf8] sm:$0xff]  ;;  %v4494_v21 = vcombine.low %v272_v40, %v276_v4 }
 0x167   :  { %3027 = vmatprep.subr.bf16.mxu1 %v4655_v18  ;;  %v4623_v59 = vcombine.high %v400_v25, %v404_v6  ;;  %v264_v15 = vld [vmem:[%s7075_s1 + $0x698] sm:$0xff]  ;;  %v4622_v22 = vcombine.low %v400_v25, %v404_v6 }
 0x168   :  { %v268_v24 = vld [vmem:[%s7075_s1 + $0x6b8] sm:$0xff] }
 0x169   :  { %2977 = vmatpush2.bf16.msra.mxu0 %v4526_v44  ;;  %v392_v60 = vld [vmem:[%s7075_s1 + $0xa98] sm:$0xff]  ;;  %v4487_v18 = vcombine.high %v264_v15, %v268_v24 }
 0x16a   :  { %3028 = vmatpush2.bf16.msra.mxu1 %v4654_v36  ;;  %2978 = vmatprep.subr.bf16.mxu0 %v4519_v41  ;;  %v396_v19 = vld [vmem:[%s7075_s1 + $0xab8] sm:$0xff]  ;;  %v4486_v36 = vcombine.low %v264_v15, %v268_v24 }
 0x16b   :  { %3029 = vmatprep.subr.bf16.mxu1 %v4647_v42  ;;  %v4615_v34 = vcombine.high %v392_v60, %v396_v19  ;;  %v256_v35 = vld [vmem:[%s7075_s1 + $0x658] sm:$0xff]  ;;  %v4614_v41 = vcombine.low %v392_v60, %v396_v19 }
 0x16c   :  { %v260_v37 = vld [vmem:[%s7075_s1 + $0x678] sm:$0xff] }
 0x16d   :  { %2979 = vmatpush2.bf16.msra.mxu0 %v4518_v49  ;;  %v384_v39 = vld [vmem:[%s7075_s1 + $0xa58] sm:$0xff]  ;;  %v4479_v42 = vcombine.high %v256_v35, %v260_v37 }
 0x16e   :  { %3030 = vmatpush2.bf16.msra.mxu1 %v4646_v28  ;;  %2980 = vmatprep.subr.bf16.mxu0 %v4511_v50  ;;  %v388_v44 = vld [vmem:[%s7075_s1 + $0xa78] sm:$0xff]  ;;  %v4478_v28 = vcombine.low %v256_v35, %v260_v37  ;;  %v3081_v37 = vmul.f32 %v6285_v10, %v6285_v10 }
 0x16f   :  { %3031 = vmatprep.subr.bf16.mxu1 %v4639_v52  ;;  %v4607_v43 = vcombine.high %v384_v39, %v388_v44  ;;  %v248_v46 = vld [vmem:[%s7075_s1 + $0x618] sm:$0xff]  ;;  %v4606_v50 = vcombine.low %v384_v39, %v388_v44 }
 0x170   :  { %v252_v47 = vld [vmem:[%s7075_s1 + $0x638] sm:$0xff] }
 0x171   :  { %2981 = vmatpush2.bf16.msra.mxu0 %v4510_v56  ;;  %v376_v48 = vld [vmem:[%s7075_s1 + $0xa18] sm:$0xff]  ;;  %v4471_v52 = vcombine.high %v248_v46, %v252_v47  ;;  %v4470_v9 = vcombine.low %v248_v46, %v252_v47 }
 0x172   :  { %3032 = vmatpush2.bf16.msra.mxu1 %v4638_v0  ;;  %2982 = vmatprep.subr.bf16.mxu0 %v4503_v1  ;;  %v380_v49 = vld [vmem:[%s7075_s1 + $0xa38] sm:$0xff]  ;;  %v450_v0 = vrot.slane %v5984_v7, %v6451_v53  ;;  %v454_v1 = vrot.slane %v5984_v7, %v6454_v55 }
 0x173   :  { %3033 = vmatprep.subr.bf16.mxu1 %v4631_v3  ;;  %v4599_v20 = vcombine.high %v376_v48, %v380_v49  ;;  %v4598_v56 = vcombine.low %v376_v48, %v380_v49  ;;  %v6462_v3 = vadd.f32 %v6266_v63, %v6051_v51  ;;  %v6473_v51 = vadd.f32 %v6289_v13, %v6070_v5 }
 0x174   :  { %v2638_v40 = vadd.f32 %v6263_v61, %v450_v0  ;;  %v2640_v25 = vadd.f32 %v6268_v2, %v454_v1  ;;  %v6486_v5 = vadd.f32 %v6312_v32, %v6096_v29  ;;  %v2648_v19 = vadd.f32 %v6309_v30, %v450_v0 }
 0x175   :  { %2983 = vmatpush2.bf16.msra.mxu0 %v4502_v31  ;;  %v3078_v7 = vmul.f32 %v6462_v3, %v6462_v3  ;;  %v3067_v60 = vadd.f32 %v6473_v51, %v6285_v10  ;;  %v2650_v44 = vadd.f32 %v6320_v23, %v454_v1  ;;  %v3085_v48 = vmul.f32 %v6307_v26, %v6307_v26 }
 0x176   :  { %3034 = vmatpush2.bf16.msra.mxu1 %v4630_v12  ;;  %2984 = vmatprep.subr.bf16.mxu0 %v4495_v14  ;;  %v2644_v14 = vadd.f32 %v6291_v17, %v454_v1  ;;  %v3082_v17 = vmul.f32 %v6473_v51, %v6473_v51  ;;  %v3086_v39 = vmul.f32 %v6486_v5, %v6486_v5 }
 0x177   :  { %3035 = vmatprep.subr.bf16.mxu1 %v4623_v59  ;;  %v3072_v23 = vadd.f32 %v6486_v5, %v6307_v26 }
 0x179   :  { %2985 = vmatpush2.bf16.msra.mxu0 %v4494_v21 }
 0x17a   :  { %3036 = vmatpush2.bf16.msra.mxu1 %v4622_v22  ;;  %2986 = vmatprep.subr.bf16.mxu0 %v4487_v18 }
 0x17b   :  { %3037 = vmatprep.subr.bf16.mxu1 %v4615_v34 }
 0x17d   :  { %2987 = vmatpush2.bf16.msra.mxu0 %v4486_v36 }
 0x17e   :  { %3038 = vmatpush2.bf16.msra.mxu1 %v4614_v41  ;;  %2988 = vmatprep.subr.bf16.mxu0 %v4479_v42 }
 0x17f   :  { %3039 = vmatprep.subr.bf16.mxu1 %v4607_v43 }
 0x181   :  { %2989 = vmatpush2.bf16.msra.mxu0 %v4478_v28 }
 0x182   :  { %3040 = vmatpush2.bf16.msra.mxu1 %v4606_v50  ;;  %2990 = vmatprep.subr.bf16.mxu0 %v4471_v52  ;;  %v3094_v50 = vadd.f32 %v3082_v17, %v3081_v37  ;;  %v4810_v17 = vld [vmem:[%s7078_s4 + $0x54] ss:$8 sps:$4 sm:$0xff]   ;;  %v4814_v37 = vld [vmem:[%s7078_s4 + $0x40] ss:$8 sps:$4 sm:$0xff]  }
 0x183   :  { %3041 = vmatprep.subr.bf16.mxu1 %v4599_v20 }
 0x185   :  { %2991 = vmatpush2.bf16.msra.mxu0 %v4470_v9 }
 0x186   :  { %3042 = vmatpush2.bf16.msra.mxu1 %v4598_v56 }
 0x188   :  { %v2688_v4 = vpop.f32.mrf.mxu0  ;;  %2993 = vmatmul.mubr.bf16.vlgmr.msra.gmra.mxu0 %v6031_v33  ;;  %v2642_v33 = vadd.f32 %v6287_v11, %v450_v0 }
 0x189   :  { %v2689_v6 = vadd.f32 %v2688_v4, %v2638_v40  ;;  %v2739_v31 = vpop.f32.mrf.mxu1  ;;  %3044 = vmatmul.mubr.bf16.vlgmr.msra.gmra.mxu1 %v6251_v54  ;;  %3002 = vmatprep.mubr.bf16.mxu0 %v5368_v27  ;;  %v3062_v54 = vadd.f32 %v6462_v3, %v6261_v58  ;;  %v3077_v27 = vmul.f32 %v6261_v58, %v6261_v58 }
 0x18a   :  { %v2690_v63 = vpop.f32.mrf.mxu0  ;;  %3053 = vmatprep.mubr.bf16.mxu1 %v5574_v45 }
 0x18b   :  { %v6477_v61 = vadd.f32 %v2739_v31, %v2689_v6  ;;  %v2691_v2 = vadd.f32 %v2690_v63, %v2640_v25  ;;  %v2741_v12 = vpop.f32.mrf.mxu1  ;;  %v3089_v32 = vadd.f32 %v3078_v7, %v3077_v27  ;;  %v3099_v6 = vadd.f32 %v3086_v39, %v3085_v48  ;;  %v4798_v27 = vld [vmem:[%s7078_s4 + $0x74] ss:$8 sps:$4 sm:$0xff]   ;;  %v4817_v39 = vld [vmem:[%s7078_s4 + $0x140] ss:$8 sps:$4 sm:$0xff]  }
 0x18c   :  { %v2692_v13 = vpop.f32.mrf.mxu0  ;;  %3739 = vmatprep.subr.bf16.mxu0 %v4798_v27  ;;  %v4835_v27 = vld [vmem:[%s7078_s4 + $0x110] ss:$8 sps:$4 sm:$0xff]  }
 0x18d   :  { %v6488_v45 = vadd.f32 %v2741_v12, %v2691_v2  ;;  %v2693_v11 = vadd.f32 %v2692_v13, %v2642_v33  ;;  %v2743_v59 = vpop.f32.mrf.mxu1  ;;  %v3063_v15 = vadd.f32 %v3062_v54, %v6477_v61  ;;  %v3079_v24 = vmul.f32 %v6477_v61, %v6477_v61  ;;  %v4799_v13 = vld [vmem:[%s7078_s4 + $0x170] ss:$8 sps:$4 sm:$0xff]  }
 0x18e   :  { %v2694_v29 = vpop.f32.mrf.mxu0 }
 0x18f   :  { %v6498_v21 = vadd.f32 %v2743_v59, %v2693_v11  ;;  %v2695_v22 = vadd.f32 %v2694_v29, %v2644_v14  ;;  %v2745_v18 = vpop.f32.mrf.mxu1  ;;  %v3064_v34 = vadd.f32 %v3063_v15, %v6488_v45  ;;  %v3080_v35 = vmul.f32 %v6488_v45, %v6488_v45  ;;  %v4796_v14 = vld [vmem:[%s7078_s4 + $0x70] ss:$8 sps:$4 sm:$0xff]   ;;  %v4801_v11 = vld [vmem:[%s7078_s4 + $0x174] ss:$8 sps:$4 sm:$0xff]   ;;  %v4804_v59 = vld [vmem:[%s7078_s4 + $0x64] ss:$8 sps:$4 sm:$0xff]  }
 0x190   :  { %v2698_v30 = vpop.f32.mrf.mxu0  ;;  %v3090_v36 = vadd.f32 %v3089_v32, %v3079_v24  ;;  %3003 = vmatmul.mubr.bf16.gmra.mxu0 %v5387_v38  ;;  %3790 = vmatprep.subr.bf16.mxu1 %v4801_v11  ;;  %v4807_v15 = vld [vmem:[%s7078_s4 + $0x164] ss:$8 sps:$4 sm:$0xff]   ;;  %v4802_v24 = vld [vmem:[%s7078_s4 + $0x60] ss:$8 sps:$4 sm:$0xff]   ;;  %v4808_v29 = vld [vmem:[%s7078_s4 + $0x50] ss:$8 sps:$4 sm:$0xff]  }
 0x191   :  { %v3083_v41 = vmul.f32 %v6498_v21, %v6498_v21  ;;  %v6511_v42 = vadd.f32 %v2745_v18, %v2695_v22  ;;  %v2699_v43 = vadd.f32 %v2698_v30, %v2648_v19  ;;  %3065 = vadd.xlane.f32.xlu0 %v3064_v34  ;;  %v2749_v46 = vpop.f32.mrf.mxu1  ;;  %v3068_v47 = vadd.f32 %v3067_v60, %v6498_v21  ;;  %v4805_v60 = vld [vmem:[%s7078_s4 + $0x160] ss:$8 sps:$4 sm:$0xff]   ;;  %v4813_v19 = vld [vmem:[%s7078_s4 + $0x154] ss:$8 sps:$4 sm:$0xff]   ;;  %v4811_v32 = vld [vmem:[%s7078_s4 + $0x150] ss:$8 sps:$4 sm:$0xff]  }
 0x192   :  { %v2700_v49 = vpop.f32.mrf.mxu0  ;;  %v3091_v28 = vadd.f32 %v3090_v36, %v3080_v35  ;;  %3054 = vmatmul.mubr.bf16.gmra.mxu1 %v5597_v57  ;;  %3740 = vmatpush1.bf16.msra.mxu0 %v4796_v14  ;;  %v457_v22 = vsub.s32 4, %v5964_v62  ;;  %v4816_v18 = vld [vmem:[%s7078_s4 + $0x44] ss:$8 sps:$4 sm:$0xff]   ;;  %v461_v35 = vsub.s32 5, %v5964_v62  ;;  %v4822_v36 = vld [vmem:[%s7078_s4 + $0x34] ss:$8 sps:$4 sm:$0xff]  }
 0x193   :  { %v2701_v38 = vadd.f32 %v2700_v49, %v2650_v44  ;;  %v6519_v52 = vadd.f32 %v2749_v46, %v2699_v43  ;;  %v2751_v20 = vpop.f32.mrf.mxu1  ;;  %v3069_v9 = vadd.f32 %v3068_v47, %v6511_v42  ;;  %v3084_v56 = vmul.f32 %v6511_v42, %v6511_v42  ;;  %3791 = vmatpush1.bf16.msra.mxu1 %v4799_v13  ;;  %v4819_v34 = vld [vmem:[%s7078_s4 + $0x144] ss:$8 sps:$4 sm:$0xff]   ;;  %v4820_v46 = vld [vmem:[%s7078_s4 + $0x30] ss:$8 sps:$4 sm:$0xff]  }
 0x194   :  { %3092 = vadd.xlane.f32.xlu1 %v3091_v28  ;;  %v2702_v0 = vpop.f32.mrf.mxu0  ;;  %v3095_v1 = vadd.f32 %v3094_v50, %v3083_v41  ;;  %3741 = vmatprep.subr.bf16.mxu0 %v4804_v59  ;;  %v6585_v44 = vld [vmem:[%s7077_s2] sm:$0xff]  ;;  %v4825_v41 = vld [vmem:[%s7078_s4 + $0x134] ss:$8 sps:$4 sm:$0xff]   ;;  %v4823_v47 = vld [vmem:[%s7078_s4 + $0x130] ss:$8 sps:$4 sm:$0xff]  }
 0x195   :  { %v3087_v40 = vmul.f32 %v6519_v52, %v6519_v52  ;;  %v6526_v4 = vadd.f32 %v2751_v20, %v2701_v38  ;;  %3070 = vadd.xlane.f32.xlu0 %v3069_v9  ;;  %v2753_v25 = vpop.f32.mrf.mxu1  ;;  %v3073_v57 = vadd.f32 %v3072_v23, %v6519_v52  ;;  %3792 = vmatprep.subr.bf16.mxu1 %v4807_v15  ;;  %v4828_v50 = vld [vmem:[%s7078_s4 + $0x24] ss:$8 sps:$4 sm:$0xff]   ;;  %v4826_v0 = vld [vmem:[%s7078_s4 + $0x20] ss:$8 sps:$4 sm:$0xff]  }
 0x196   :  { %v3096_v31 = vadd.f32 %v3095_v1, %v3084_v56  ;;  %v2703_v7 = vpop.f32.mrf.mxu0  ;;  %3742 = vmatpush1.bf16.msra.mxu0 %v4802_v24  ;;  %v458_v30 = vrot.slane %v6585_v44, %v457_v22  ;;  %v462_v43 = vrot.slane %v6585_v44, %v461_v35  ;;  %v4831_v38 = vld [vmem:[%s7078_s4 + $0x124] ss:$8 sps:$4 sm:$0xff]   ;;  %v4829_v1 = vld [vmem:[%s7078_s4 + $0x120] ss:$8 sps:$4 sm:$0xff]  }
 0x197   :  { %v3074_v63 = vadd.f32 %v3073_v57, %v6526_v4  ;;  %v2754_v33 = vpop.f32.mrf.mxu1  ;;  %v3088_v2 = vmul.f32 %v6526_v4, %v6526_v4  ;;  %v3100_v12 = vadd.f32 %v3099_v6, %v3087_v40  ;;  %3793 = vmatpush1.bf16.msra.mxu1 %v4805_v60  ;;  %3743 = vmatprep.subr.bf16.mxu0 %v4810_v17  ;;  %v4834_v7 = vld [vmem:[%s7078_s4 + $0x14] ss:$8 sps:$4 sm:$0xff]   ;;  %v4838_v22 = vld [vmem:[%s7078_s4] ss:$8 sps:$4 sm:$0xff]  }
 0x198   :  { %3097 = vadd.xlane.f32.xlu1 %v3096_v31  ;;  %3794 = vmatprep.subr.bf16.mxu1 %v4813_v19  ;;  %v4840_v19 = vld [vmem:[%s7078_s4 + $0x4] ss:$8 sps:$4 sm:$0xff]  }
 0x199   :  { %3075 = vadd.xlane.f32.xlu0 %v3074_v63  ;;  %v3101_v54 = vadd.f32 %v3100_v12, %v3088_v2  ;;  %v4837_v63 = vld [vmem:[%s7078_s4 + $0x114] ss:$8 sps:$4 sm:$0xff]  }
 0x19a   :  { %3744 = vmatpush1.bf16.msra.mxu0 %v4808_v29  ;;  %v4843_v29 = vld [vmem:[%s7078_s4 + $0x104] ss:$8 sps:$4 sm:$0xff]  }
 0x19b   :  { %3795 = vmatpush1.bf16.msra.mxu1 %v4811_v32  ;;  %3745 = vmatprep.subr.bf16.mxu0 %v4816_v18  ;;  %v4841_v18 = vld [vmem:[%s7078_s4 + $0x100] ss:$8 sps:$4 sm:$0xff]  }
 0x19c   :  { %3102 = vadd.xlane.f32.xlu1 %v3101_v54  ;;  %3796 = vmatprep.subr.bf16.mxu1 %v4819_v34  ;;  %v4832_v54 = vld [vmem:[%s7078_s4 + $0x10] ss:$8 sps:$4 sm:$0xff]  }
 0x19e   :  { %3746 = vmatpush1.bf16.msra.mxu0 %v4814_v37 }
 0x19f   :  { %3797 = vmatpush1.bf16.msra.mxu1 %v4817_v39  ;;  %3747 = vmatprep.subr.bf16.mxu0 %v4822_v36  ;;  %v4849_v36 = vld [vmem:[%s7078_s4 + $0x1f4] ss:$8 sps:$4 sm:$0xff]  }
 0x1a0   :  { %3798 = vmatprep.subr.bf16.mxu1 %v4825_v41  ;;  %v4844_v41 = vld [vmem:[%s7078_s4 + $0xf0] ss:$8 sps:$4 sm:$0xff]  }
 0x1a2   :  { %3748 = vmatpush1.bf16.msra.mxu0 %v4820_v46  ;;  %v4852_v46 = vld [vmem:[%s7078_s4 + $0xe4] ss:$8 sps:$4 sm:$0xff]  }
 0x1a3   :  { %3799 = vmatpush1.bf16.msra.mxu1 %v4823_v47  ;;  %3749 = vmatprep.subr.bf16.mxu0 %v4828_v50  ;;  %v4855_v47 = vld [vmem:[%s7078_s4 + $0x1e4] ss:$8 sps:$4 sm:$0xff]   ;;  %v4856_v50 = vld [vmem:[%s7078_s4 + $0xd0] ss:$8 sps:$4 sm:$0xff]  }
 0x1a4   :  { %3800 = vmatprep.subr.bf16.mxu1 %v4831_v38  ;;  %v4859_v38 = vld [vmem:[%s7078_s4 + $0x1d0] ss:$8 sps:$4 sm:$0xff]  }
 0x1a6   :  { %3750 = vmatpush1.bf16.msra.mxu0 %v4826_v0  ;;  %v4862_v0 = vld [vmem:[%s7078_s4 + $0xc0] ss:$8 sps:$4 sm:$0xff]  }
 0x1a7   :  { %3801 = vmatpush1.bf16.msra.mxu1 %v4829_v1  ;;  %3751 = vmatprep.subr.bf16.mxu0 %v4834_v7  ;;  %v4865_v1 = vld [vmem:[%s7078_s4 + $0x1c0] ss:$8 sps:$4 sm:$0xff]   ;;  %v4876_v7 = vld [vmem:[%s7078_s4 + $0xa4] ss:$8 sps:$4 sm:$0xff]  }
 0x1a8   :  { %3802 = vmatprep.subr.bf16.mxu1 %v4837_v63  ;;  %v4879_v63 = vld [vmem:[%s7078_s4 + $0x1a4] ss:$8 sps:$4 sm:$0xff]  }
 0x1aa   :  { %3752 = vmatpush1.bf16.msra.mxu0 %v4832_v54  ;;  %v4882_v54 = vld [vmem:[%s7078_s4 + $0x94] ss:$8 sps:$4 sm:$0xff]  }
 0x1ab   :  { %3803 = vmatpush1.bf16.msra.mxu1 %v4835_v27  ;;  %3753 = vmatprep.subr.bf16.mxu0 %v4840_v19  ;;  %v4885_v27 = vld [vmem:[%s7078_s4 + $0x194] ss:$8 sps:$4 sm:$0xff]  }
 0x1ac   :  { %3804 = vmatprep.subr.bf16.mxu1 %v4843_v29 }
 0x1ae   :  { %3754 = vmatpush1.bf16.msra.mxu0 %v4838_v22 }
 0x1af   :  { %3805 = vmatpush1.bf16.msra.mxu1 %v4841_v18 }
 0x1b0   :  { %3806 = vmatprep.subr.bf16.mxu1 %v4849_v36 }
 0x1c8   :  { %v2790_v48 = vpop.f32.mrf.mxu0 }
 0x1c9   :  { %v2791_v23 = vadd.f32 %v2790_v48, %v458_v30  ;;  %v2841_v49 = vpop.f32.mrf.mxu1  ;;  %v4850_v48 = vld [vmem:[%s7078_s4 + $0xe0] ss:$8 sps:$4 sm:$0xff]  }
 0x1ca   :  { %v2792_v28 = vpop.f32.mrf.mxu0 }
 0x1cb   :  { %v2793_v20 = vadd.f32 %v2792_v28, %v462_v43  ;;  %v6607_v9 = vadd.f32 %v2841_v49, %v2791_v23  ;;  %v2843_v56 = vpop.f32.mrf.mxu1  ;;  %v4853_v23 = vld [vmem:[%s7078_s4 + $0x1e0] ss:$8 sps:$4 sm:$0xff]   ;;  %v4858_v49 = vld [vmem:[%s7078_s4 + $0xd4] ss:$8 sps:$4 sm:$0xff]  }
 0x1cc   :  { %v2794_v40 = vpop.f32.mrf.mxu0  ;;  %v4861_v28 = vld [vmem:[%s7078_s4 + $0x1d4] ss:$8 sps:$4 sm:$0xff]  }
 0x1cd   :  { %v2795_v25 = vadd.f32 %v2794_v40, %v458_v30  ;;  %v6615_v57 = vadd.f32 %v2843_v56, %v2793_v20  ;;  %v2845_v6 = vpop.f32.mrf.mxu1  ;;  %v4864_v20 = vld [vmem:[%s7078_s4 + $0xc4] ss:$8 sps:$4 sm:$0xff]   ;;  %v4870_v40 = vld [vmem:[%s7078_s4 + $0xb4] ss:$8 sps:$4 sm:$0xff]  }
 0x1ce   :  { %v2796_v31 = vpop.f32.mrf.mxu0  ;;  %v4867_v56 = vld [vmem:[%s7078_s4 + $0x1c4] ss:$8 sps:$4 sm:$0xff]  }
 0x1cf   :  { %v2797_v33 = vadd.f32 %v2796_v31, %v462_v43  ;;  %v6623_v2 = vadd.f32 %v2845_v6, %v2795_v25  ;;  %v2847_v12 = vpop.f32.mrf.mxu1  ;;  %v4873_v25 = vld [vmem:[%s7078_s4 + $0x1b4] ss:$8 sps:$4 sm:$0xff]   ;;  %v4868_v6 = vld [vmem:[%s7078_s4 + $0xb0] ss:$8 sps:$4 sm:$0xff]  }
 0x1d0   :  { %v2800_v14 = vpop.f32.mrf.mxu0  ;;  %v4871_v31 = vld [vmem:[%s7078_s4 + $0x1b0] ss:$8 sps:$4 sm:$0xff]  }
 0x1d1   :  { %v6631_v13 = vadd.f32 %v2847_v12, %v2797_v33  ;;  %v2801_v11 = vadd.f32 %v2800_v14, %v458_v30  ;;  %v2851_v59 = vpop.f32.mrf.mxu1  ;;  %v4846_v30 = vld [vmem:[%s7078_s4 + $0xf4] ss:$8 sps:$4 sm:$0xff]   ;;  %v4874_v33 = vld [vmem:[%s7078_s4 + $0xa0] ss:$8 sps:$4 sm:$0xff]   ;;  %v4880_v14 = vld [vmem:[%s7078_s4 + $0x90] ss:$8 sps:$4 sm:$0xff]  }
 0x1d2   :  { %v2802_v15 = vpop.f32.mrf.mxu0  ;;  %3755 = vmatprep.subr.bf16.mxu0 %v4846_v30  ;;  %v4877_v12 = vld [vmem:[%s7078_s4 + $0x1a0] ss:$8 sps:$4 sm:$0xff]  }
 0x1d3   :  { %v2803_v24 = vadd.f32 %v2802_v15, %v462_v43  ;;  %v6633_v60 = vadd.f32 %v2851_v59, %v2801_v11  ;;  %v2853_v17 = vpop.f32.mrf.mxu1  ;;  %v4847_v43 = vld [vmem:[%s7078_s4 + $0x1f0] ss:$8 sps:$4 sm:$0xff]   ;;  %3756 = vmatpush2.bf16.msra.mxu0 %v4844_v41  ;;  %v4888_v59 = vld [vmem:[%s7078_s4 + $0x84] ss:$8 sps:$4 sm:$0xff]  }
 0x1d4   :  { %v2804_v32 = vpop.f32.mrf.mxu0  ;;  %3807 = vmatpush2.bf16.msra.mxu1 %v4847_v43  ;;  %3757 = vmatprep.subr.bf16.mxu0 %v4852_v46  ;;  %v4883_v11 = vld [vmem:[%s7078_s4 + $0x190] ss:$8 sps:$4 sm:$0xff]   ;;  %v4891_v15 = vld [vmem:[%s7078_s4 + $0x184] ss:$8 sps:$4 sm:$0xff]  }
 0x1d5   :  { %v6647_v34 = vadd.f32 %v2853_v17, %v2803_v24  ;;  %v2855_v35 = vpop.f32.mrf.mxu1  ;;  %3808 = vmatprep.subr.bf16.mxu1 %v4855_v47  ;;  %v4886_v24 = vld [vmem:[%s7078_s4 + $0x80] ss:$8 sps:$4 sm:$0xff]  }
 0x1d6   :  { %v2805_v37 = vpop.f32.mrf.mxu0  ;;  %v4889_v17 = vld [vmem:[%s7078_s4 + $0x180] ss:$8 sps:$4 sm:$0xff]  }
 0x1d7   :  { %v2856_v39 = vpop.f32.mrf.mxu1  ;;  %3758 = vmatpush2.bf16.msra.mxu0 %v4850_v48 }
 0x1d8   :  { %3809 = vmatpush2.bf16.msra.mxu1 %v4853_v23  ;;  %3759 = vmatprep.subr.bf16.mxu0 %v4858_v49 }
 0x1d9   :  { %3810 = vmatprep.subr.bf16.mxu1 %v4861_v28 }
 0x1db   :  { %3760 = vmatpush2.bf16.msra.mxu0 %v4856_v50 }
 0x1dc   :  { %3811 = vmatpush2.bf16.msra.mxu1 %v4859_v38  ;;  %3761 = vmatprep.subr.bf16.mxu0 %v4864_v20 }
 0x1dd   :  { %3812 = vmatprep.subr.bf16.mxu1 %v4867_v56 }
 0x1df   :  { %3762 = vmatpush2.bf16.msra.mxu0 %v4862_v0 }
 0x1e0   :  { %3813 = vmatpush2.bf16.msra.mxu1 %v4865_v1  ;;  %3763 = vmatprep.subr.bf16.mxu0 %v4870_v40 }
 0x1e1   :  { %3814 = vmatprep.subr.bf16.mxu1 %v4873_v25 }
 0x1e3   :  { %3764 = vmatpush2.bf16.msra.mxu0 %v4868_v6 }
 0x1e4   :  { %3815 = vmatpush2.bf16.msra.mxu1 %v4871_v31  ;;  %3765 = vmatprep.subr.bf16.mxu0 %v4876_v7 }
 0x1e5   :  { %3816 = vmatprep.subr.bf16.mxu1 %v4879_v63 }
 0x1e7   :  { %3766 = vmatpush2.bf16.msra.mxu0 %v4874_v33 }
 0x1e8   :  { %3817 = vmatpush2.bf16.msra.mxu1 %v4877_v12  ;;  %3767 = vmatprep.subr.bf16.mxu0 %v4882_v54 }
 0x1e9   :  { %3818 = vmatprep.subr.bf16.mxu1 %v4885_v27 }
 0x1eb   :  { %3768 = vmatpush2.bf16.msra.mxu0 %v4880_v14 }
 0x1ec   :  { %3819 = vmatpush2.bf16.msra.mxu1 %v4883_v11  ;;  %3769 = vmatprep.subr.bf16.mxu0 %v4888_v59 }
 0x1ed   :  { %3820 = vmatprep.subr.bf16.mxu1 %v4891_v15 }
 0x1ef   :  { %3770 = vmatpush2.bf16.msra.mxu0 %v4886_v24 }
 0x1f0   :  { %3821 = vmatpush2.bf16.msra.mxu1 %v4889_v17 }
 0x208   :  { %v2892_v19 = vpop.f32.mrf.mxu0 }
 0x209   :  { %v6746_v29 = vadd.f32 %v2892_v19, %v6607_v9  ;;  %v6748_v32 = vpop.f32.mrf.mxu1 }
 0x20a   :  { %v2894_v22 = vpop.f32.mrf.mxu0 }
 0x20b   :  { %v6751_v18 = vadd.f32 %v2894_v22, %v6615_v57  ;;  %v6753_v35 = vpop.f32.mrf.mxu1 }
 0x20c   :  { %v2896_v37 = vpop.f32.mrf.mxu0 }
 0x20d   :  { %v6756_v39 = vadd.f32 %v2896_v37, %v6623_v2  ;;  %v6758_v30 = vpop.f32.mrf.mxu1 }
 0x20e   :  { %v2898_v36 = vpop.f32.mrf.mxu0 }
 0x20f   :  { %v6761_v41 = vadd.f32 %v2898_v36, %v6631_v13  ;;  %v6763_v9 = vpop.f32.mrf.mxu1 }
 0x210   :  { %v2902_v43 = vpop.f32.mrf.mxu0 }
 0x211   :  { %v6766_v46 = vadd.f32 %v2902_v43, %v6633_v60  ;;  %v6768_v57 = vpop.f32.mrf.mxu1 }
 0x212   :  { %v2904_v47 = vpop.f32.mrf.mxu0 }
 0x213   :  { %v6771_v48 = vadd.f32 %v2904_v47, %v6647_v34  ;;  %v6773_v2 = vpop.f32.mrf.mxu1 }
 0x214   :  { %v2906_v23 = vpop.f32.mrf.mxu0 }
 0x215   :  { %v2957_v49 = vpop.f32.mrf.mxu1 }
 0x216   :  { %v2907_v28 = vpop.f32.mrf.mxu0 }
 0x217   :  { %v2958_v50 = vpop.f32.mrf.mxu1 }
 0x21a   :  { %v3066_v13 = vpop.xlane.xlu0 %3065 }
 0x21b   :  { %v6775_v38 = vmul.f32 0.001953125, %v3066_v13 }
 0x21d   :  { %v3093_v20 = vpop.xlane.xlu1 %3092  ;;  %v3110_v60 = vmul.f32 %v6775_v38, %v6775_v38 }
 0x21e   :  { %v3107_v56 = vmul.f32 0.001953125, %v3093_v20  ;;  %v3071_v0 = vpop.xlane.xlu0 %3070 }
 0x21f   :  { %v6779_v1 = vmul.f32 0.001953125, %v3071_v0 }
 0x220   :  { %v3113_v40 = vsub.f32 %v3107_v56, %v3110_v60 }
 0x221   :  { %v3098_v34 = vpop.xlane.xlu1 %3097  ;;  %v3111_v25 = vmul.f32 %v6779_v1, %v6779_v1 }
 0x222   :  { %v3116_v6 = vmax.f32 %v3113_v40, 0.0  ;;  %v3108_v31 = vmul.f32 0.001953125, %v3098_v34  ;;  %v3076_v7 = vpop.xlane.xlu0 %3075  ;;  %v3146_v40 = vld [vmem:[%s7079_s3] ss:$2 sm:$0xf] }
 0x223   :  { %v6783_v63 = vmul.f32 0.001953125, %v3076_v7  ;;  %v4656_v34 = vld [vmem:[%s7079_s3 + $0x1] ss:$2 sm:$0xf]  ;;  %v3152_v7 = vsub.f32 %v6488_v45, %v6775_v38 }
 0x224   :  { %4916 = vrsqrt.f32 %v3116_v6  ;;  %v3114_v33 = vsub.f32 %v3108_v31, %v3111_v25  ;;  %vm3121_vm0 = vcmp.eq.f32.partialorder %v3116_v6, inf  ;;  %v3124_v17 = vand.u32 2147483648, %v3116_v6 }
 0x225   :  { %v3103_v12 = vpop.xlane.xlu1 %3102  ;;  %v3112_v54 = vmul.f32 %v6783_v63, %v6783_v63  ;;  %vm3123_vm1 = vcmp.eq.f32.partialorder %v3116_v6, 0.0  ;;  %v3185_v25 = vrot.slane %v3146_v40, %v6451_v53  ;;  %v3151_v31 = vsub.f32 %v6477_v61, %v6775_v38 }
 0x226   :  { %v3109_v27 = vmul.f32 0.001953125, %v3103_v12  ;;  %v3117_v14 = vmax.f32 %v3114_v33, 0.0  ;;  %v3189_v33 = vrot.slane %v3146_v40, %v6454_v55  ;;  %v6807_v61 = vrot.slane %v3146_v40, %v5979_v16 }
 0x228   :  { %v3115_v11 = vsub.f32 %v3109_v27, %v3112_v54  ;;  %4918 = vrsqrt.f32 %v3117_v14  ;;  %vm3128_vm2 = vcmp.eq.f32.partialorder %v3117_v14, inf  ;;  %v3131_v47 = vand.u32 2147483648, %v3117_v14 }
 0x229   :  { %vm3130_vm3 = vcmp.eq.f32.partialorder %v3117_v14, 0.0  ;;  %v3181_v54 = vrot.slane %v3146_v40, %v5987_v8  ;;  %v3218_v27 = vrot.slane %v4656_v34, %v6451_v53  ;;  %v3155_v53 = vsub.f32 %v6498_v21, %v6779_v1 }
 0x22a   :  { %v3118_v59 = vmax.f32 %v3115_v11, 0.0  ;;  %v3149_v11 = vsub.f32 %v6261_v58, %v6775_v38  ;;  %v3156_v58 = vsub.f32 %v6511_v42, %v6779_v1  ;;  %v3158_v21 = vsub.f32 %v6486_v5, %v6783_v63 }
 0x22c   :  { %4920 = vrsqrt.f32 %v3118_v59  ;;  %vm3135_vm4 = vcmp.eq.f32.partialorder %v3118_v59, inf  ;;  %v3138_v20 = vand.u32 2147483648, %v3118_v59  ;;  %vm3137_vm5 = vcmp.eq.f32.partialorder %v3118_v59, 0.0 }
 0x231   :  { %v4917_v15 = vpop.eup %4916 }
 0x232   :  { %v3120_v24 = vmul.f32 %v4917_v15, %v3116_v6 }
 0x234   :  { %v3122_v19 = vsel %vm3121_vm0, %v3116_v6, %v3120_v24  ;;  %v3150_v6 = vsub.f32 %v6462_v3, %v6775_v38 }
 0x235   :  { %v3125_v22 = vsel %vm3123_vm1, %v3124_v17, %v3122_v19  ;;  %v4919_v37 = vpop.eup %4918 }
 0x236   :  { %v3140_v36 = vadd.f32 1e-05, %v3125_v22  ;;  %v3127_v43 = vmul.f32 %v4919_v37, %v3117_v14  ;;  %v3214_v22 = vrot.slane %v4656_v34, %v5987_v8 }
 0x238   :  { %4922 = vrcp.f32 %v3140_v36  ;;  %v3129_v49 = vsel %vm3128_vm2, %v3117_v14, %v3127_v43  ;;  %v3222_v14 = vrot.slane %v4656_v34, %v6454_v55  ;;  %v3154_v36 = vsub.f32 %v6473_v51, %v6779_v1 }
 0x239   :  { %v4921_v23 = vpop.eup %4920  ;;  %v3132_v28 = vsel %vm3130_vm3, %v3131_v47, %v3129_v49  ;;  %v6821_v43 = vrot.slane %v4656_v34, %v5979_v16  ;;  %vm4252_vm2 = vcmask 7168  }
 0x23a   :  { %v3134_v50 = vmul.f32 %v4921_v23, %v3118_v59  ;;  %v3141_v13 = vadd.f32 1e-05, %v3132_v28 }
 0x23c   :  { %v3136_v60 = vsel %vm3135_vm4, %v3118_v59, %v3134_v50  ;;  %4924 = vrcp.f32 %v3141_v13  ;;  %v3159_v13 = vsub.f32 %v6519_v52, %v6783_v63 }
 0x23d   :  { %v3139_v56 = vsel %vm3137_vm5, %v3138_v20, %v3136_v60 }
 0x23e   :  { %v3142_v0 = vadd.f32 1e-05, %v3139_v56  ;;  %v3160_v56 = vsub.f32 %v6526_v4, %v6783_v63 }
 0x240   :  { %4926 = vrcp.f32 %v3142_v0 }
 0x245   :  { %v4923_v12 = vpop.eup %4922 }
 0x246   :  { %v3163_v59 = vmul.f32 %v4923_v12, %v3151_v31  ;;  %v3164_v3 = vmul.f32 %v4923_v12, %v3152_v7  ;;  %v3162_v15 = vmul.f32 %v4923_v12, %v3150_v6  ;;  %v3161_v19 = vmul.f32 %v4923_v12, %v3149_v11 }
 0x248   :  { %v6809_v24 = vpop.f32.mrf.mxu0  ;;  %v3196_v45 = vmul.f32 %v3185_v25, %v3163_v59  ;;  %v3197_v17 = vmul.f32 %v3189_v33, %v3164_v3  ;;  %v3195_v55 = vmul.f32 %v3181_v54, %v3162_v15  ;;  %v3194_v0 = vmul.f32 %v6807_v61, %v3161_v19 }
 0x249   :  { %v6812_v37 = vpop.f32.mrf.mxu1  ;;  %v4925_v38 = vpop.eup %4924 }
 0x24a   :  { %v6823_v47 = vpop.f32.mrf.mxu0  ;;  %v6825_v23 = vadd.f32 %v3218_v27, %v3196_v45  ;;  %v6827_v49 = vadd.f32 %v3222_v14, %v3197_v17  ;;  %v3167_v42 = vmul.f32 %v4925_v38, %v3155_v53  ;;  %v3168_v50 = vmul.f32 %v4925_v38, %v3156_v58 }
 0x24b   :  { %v6831_v28 = vpop.f32.mrf.mxu1  ;;  %v3166_v31 = vmul.f32 %v4925_v38, %v3154_v36  ;;  %v6844_v7 = vadd.f32 %v3214_v22, %v3195_v55 }
 0x24c   :  { %v4659_v51 = vmul.f32 -1.442695, %v6825_v23  ;;  %v6836_v20 = vpop.f32.mrf.mxu0  ;;  %v4660_v60 = vmul.f32 -1.442695, %v6827_v49  ;;  %v3200_v34 = vmul.f32 %v3185_v25, %v3167_v42  ;;  %v3201_v6 = vmul.f32 %v3189_v33, %v3168_v50 }
 0x24d   :  { %v4927_v40 = vpop.eup %4926  ;;  %v6842_v5 = vpop.f32.mrf.mxu1  ;;  %v3199_v55 = vmul.f32 %v3181_v54, %v3166_v31  ;;  %v4658_v36 = vmul.f32 -1.442695, %v6844_v7 }
 0x24e   :  { %v3170_v52 = vmul.f32 %v4927_v40, %v3158_v21  ;;  %4928 = vpow2.f32 %v4659_v51  ;;  %v6846_v12 = vpop.f32.mrf.mxu0  ;;  %v3171_v11 = vmul.f32 %v4927_v40, %v3159_v13  ;;  %v3172_v59 = vmul.f32 %v4927_v40, %v3160_v56 }
 0x24f   :  { %4930 = vpow2.f32 %v4660_v60  ;;  %v6848_v3 = vadd.f32 %v3218_v27, %v3200_v34  ;;  %v6850_v15 = vpop.f32.mrf.mxu1  ;;  %v6852_v45 = vadd.f32 %v3222_v14, %v3201_v6  ;;  %v6859_v21 = vadd.f32 %v6821_v43, %v3194_v0 }
 0x250   :  { %v3203_v4 = vmul.f32 %v3181_v54, %v3170_v52  ;;  %v6854_v17 = vpop.f32.mrf.mxu0  ;;  %v3204_v19 = vmul.f32 %v3185_v25, %v3171_v11  ;;  %v3205_v53 = vmul.f32 %v3189_v33, %v3172_v59  ;;  %v3153_v33 = vsub.f32 %v6285_v10, %v6779_v1 }
 0x251   :  { %v4663_v58 = vmul.f32 -1.442695, %v6848_v3  ;;  %v4664_v50 = vmul.f32 -1.442695, %v6852_v45  ;;  %v3157_v54 = vsub.f32 %v6307_v26, %v6783_v63  ;;  %v6876_v56 = vadd.f32 %v3214_v22, %v3199_v55 }
 0x252   :  { %v6861_v42 = vadd.f32 %v3214_v22, %v3203_v4  ;;  %v6864_v13 = vpop.f32.mrf.mxu0  ;;  %v6866_v51 = vpop.f32.mrf.mxu1  ;;  %v6868_v60 = vadd.f32 %v3218_v27, %v3204_v19  ;;  %v6870_v25 = vadd.f32 %v3222_v14, %v3205_v53  ;;  %v3165_v10 = vmul.f32 %v4925_v38, %v3153_v33 }
 0x253   :  { %4932 = vpow2.f32 %v4663_v58  ;;  %v4662_v31 = vmul.f32 -1.442695, %v6876_v56  ;;  %v4657_v26 = vmul.f32 -1.442695, %v6859_v21  ;;  %v3169_v22 = vmul.f32 %v4927_v40, %v3157_v54 }
 0x254   :  { %v4666_v0 = vmul.f32 -1.442695, %v6861_v42  ;;  %4934 = vpow2.f32 %v4664_v50  ;;  %v4667_v34 = vmul.f32 -1.442695, %v6868_v60  ;;  %v6880_v6 = vpop.f32.mrf.mxu1  ;;  %v4668_v27 = vmul.f32 -1.442695, %v6870_v25  ;;  %v3008_v14 = vpop.f32.mrf.mxu0 }
 0x255   :  { %4936 = vpow2.f32 %v4658_v36  ;;  %v3198_v52 = vmul.f32 %v6807_v61, %v3165_v10  ;;  %v3202_v59 = vmul.f32 %v6807_v61, %v3169_v22  ;;  %v469_v10 = vsub.s32 7, %v5964_v62 }
 0x256   :  { %4938 = vpow2.f32 %v4666_v0  ;;  %v3009_v1 = vpop.f32.mrf.mxu0  ;;  %v3059_v63 = vpop.f32.mrf.mxu1 }
 0x257   :  { %4940 = vpow2.f32 %v4667_v34  ;;  %v6888_v4 = vadd.f32 %v6821_v43, %v3198_v52  ;;  %v6891_v38 = vadd.f32 %v6821_v43, %v3202_v59  ;;  %v465_v43 = vsub.s32 6, %v5964_v62 }
 0x258   :  { %4942 = vpow2.f32 %v4668_v27  ;;  %v3060_v11 = vpop.f32.mrf.mxu1 }
 0x259   :  { %4944 = vpow2.f32 %v4662_v31  ;;  %v4661_v53 = vmul.f32 -1.442695, %v6888_v4  ;;  %v4665_v55 = vmul.f32 -1.442695, %v6891_v38  ;;  %v466_v11 = vrot.slane %v6585_v44, %v465_v43 }
 0x25a   :  { %4946 = vpow2.f32 %v4657_v26 }
 0x25b   :  { %v4929_v19 = vpop.eup %4928  ;;  %4948 = vpow2.f32 %v4661_v53 }
 0x25c   :  { %v4931_v58 = vpop.eup %4930  ;;  %v3277_v40 = vadd.f32 1.0, %v4929_v19  ;;  %v470_v19 = vrot.slane %v6585_v44, %v469_v10 }
 0x25d   :  { %v3278_v36 = vadd.f32 1.0, %v4931_v58 }
 0x25e   :  { %4950 = vrcp.f32 %v3277_v40  ;;  %v2944_v40 = vadd.f32 %v6748_v32, %v466_v11 }
 0x25f   :  { %4952 = vrcp.f32 %v3278_v36 }
 0x260   :  { %v4933_v61 = vpop.eup %4932  ;;  %4954 = vpow2.f32 %v4665_v55  ;;  %v2948_v55 = vadd.f32 %v6758_v30, %v466_v11 }
 0x261   :  { %v4935_v50 = vpop.eup %4934  ;;  %v3281_v33 = vadd.f32 1.0, %v4933_v61 }
 0x262   :  { %v4937_v54 = vpop.eup %4936  ;;  %v3282_v0 = vadd.f32 1.0, %v4935_v50  ;;  %v2946_v50 = vadd.f32 %v6753_v35, %v470_v19  ;;  %v2999_v44 = vadd.f32 %v6836_v20, %v2948_v55 }
 0x263   :  { %v4939_v34 = vpop.eup %4938  ;;  %4956 = vrcp.f32 %v3281_v33  ;;  %v3276_v27 = vadd.f32 1.0, %v4937_v54  ;;  %v2950_v33 = vadd.f32 %v6763_v9, %v470_v19 }
 0x264   :  { %v4941_v14 = vpop.eup %4940  ;;  %v3284_v31 = vadd.f32 1.0, %v4939_v34  ;;  %4958 = vrcp.f32 %v3282_v0  ;;  %v2995_v0 = vadd.f32 %v6809_v24, %v2944_v40  ;;  %v2956_v34 = vadd.f32 %v6773_v2, %v470_v19 }
 0x265   :  { %v4943_v26 = vpop.eup %4942  ;;  %v3285_v1 = vadd.f32 1.0, %v4941_v14  ;;  %4960 = vrcp.f32 %v3276_v27  ;;  %v2997_v43 = vadd.f32 %v6823_v47, %v2946_v50  ;;  %v3001_v32 = vadd.f32 %v6846_v12, %v2950_v33 }
 0x266   :  { %v4945_v63 = vpop.eup %4944  ;;  %4962 = vrcp.f32 %v3284_v31  ;;  %v3286_v22 = vadd.f32 1.0, %v4943_v26  ;;  %v2954_v31 = vadd.f32 %v6768_v57, %v466_v11  ;;  %v3046_v24 = vadd.f32 %v6812_v37, %v2995_v0  ;;  %v3407_v0 = vld [vmem:[%s7080_s5] sm:$0x3] }
 0x267   :  { %v4947_v52 = vpop.eup %4946  ;;  %4964 = vrcp.f32 %v3285_v1  ;;  %v3280_v59 = vadd.f32 1.0, %v4945_v63  ;;  %v3050_v20 = vadd.f32 %v6842_v5, %v2999_v44  ;;  %v3048_v47 = vadd.f32 %v6831_v28, %v2997_v43 }
 0x268   :  { %4966 = vrcp.f32 %v3286_v22  ;;  %v3275_v53 = vadd.f32 1.0, %v4947_v52  ;;  %v4949_v58 = vpop.eup %4948  ;;  %v3052_v12 = vadd.f32 %v6850_v15, %v3001_v32  ;;  %v3007_v26 = vadd.f32 %v6864_v13, %v2956_v34 }
 0x269   :  { %4968 = vrcp.f32 %v3280_v59  ;;  %v3279_v36 = vadd.f32 1.0, %v4949_v58  ;;  %v3005_v5 = vadd.f32 %v6854_v17, %v2954_v31  ;;  %v3416_v43 = vrot.slane %v3407_v0, %v5987_v8 }
 0x26a   :  { %4970 = vrcp.f32 %v3275_v53  ;;  %v3058_v15 = vadd.f32 %v6880_v6, %v3007_v26 }
 0x26b   :  { %v4951_v62 = vpop.eup %4950  ;;  %4972 = vrcp.f32 %v3279_v36  ;;  %v3056_v40 = vadd.f32 %v6866_v51, %v3005_v5 }
 0x26c   :  { %v4953_v61 = vpop.eup %4952  ;;  %v3313_v30 = vmul.f32 %v4951_v62, %v6825_v23 }
 0x26d   :  { %v4955_v54 = vpop.eup %4954  ;;  %v3314_v35 = vmul.f32 %v4953_v61, %v6827_v49 }
 0x26e   :  { %v3283_v27 = vadd.f32 1.0, %v4955_v54  ;;  %v3325_v1 = vadd.f32 %v3313_v30, %v3046_v24 }
 0x26f   :  { %v3326_v57 = vadd.f32 %v3314_v35, %v3048_v47 }
 0x270   :  { %v4957_v14 = vpop.eup %4956  ;;  %4974 = vrcp.f32 %v3283_v27 }
 0x271   :  { %v4959_v9 = vpop.eup %4958  ;;  %v3317_v2 = vmul.f32 %v4957_v14, %v6848_v3 }
 0x272   :  { %v4961_v10 = vpop.eup %4960  ;;  %v3318_v23 = vmul.f32 %v4959_v9, %v6852_v45 }
 0x273   :  { %v4963_v49 = vpop.eup %4962  ;;  %v3329_v63 = vadd.f32 %v3317_v2, %v3050_v20  ;;  %v3312_v3 = vmul.f32 %v4961_v10, %v6844_v7 }
 0x274   :  { %v4965_v22 = vpop.eup %4964  ;;  %v3330_v52 = vadd.f32 %v3318_v23, %v3052_v12  ;;  %v3320_v28 = vmul.f32 %v4963_v49, %v6861_v42 }
 0x275   :  { %v4967_v37 = vpop.eup %4966  ;;  %v3337_v11 = vpack.c.bf16 %v3329_v63, %v3325_v1  ;;  %v3321_v53 = vmul.f32 %v4965_v22, %v6868_v60  ;;  %v3324_v17 = vadd.f32 %v3312_v3, %v6751_v18 }
 0x276   :  { %v4969_v59 = vpop.eup %4968  ;;  %v3322_v45 = vmul.f32 %v4967_v37, %v6870_v25  ;;  %v3338_v13 = vpack.c.bf16 %v3330_v52, %v3326_v57  ;;  %v3332_v25 = vadd.f32 %v3320_v28, %v6771_v48  ;;  %v5043_v28 = vmov 0  }
 0x277   :  { %v4971_v19 = vpop.eup %4970  ;;  %v3316_v58 = vmul.f32 %v4969_v59, %v6876_v56  ;;  %v3333_v36 = vadd.f32 %v3321_v53, %v3056_v40  ;;  %v4892_v59 = vld [vmem:[%s7081_s7 + $0x70] ss:$8 sps:$4 sm:$0xff]   ;;  %v4906_v40 = vld [vmem:[%s7081_s7 + $0x34] ss:$8 sps:$4 sm:$0xff]  }
 0x278   :  { %v3334_v62 = vadd.f32 %v3322_v45, %v3058_v15  ;;  %3822 = vmatprep.mubr.bf16.mxu1 %v3338_v13  ;;  %v3311_v42 = vmul.f32 %v4971_v19, %v6859_v21  ;;  %v4973_v6 = vpop.eup %4972  ;;  %v3340_v50 = vpack.c.bf16 %v3332_v25, %v3332_v25  ;;  %v4894_v15 = vld [vmem:[%s7081_s7 + $0x74] ss:$8 sps:$4 sm:$0xff]   ;;  %v4897_v45 = vld [vmem:[%s7081_s7 + $0x64] ss:$8 sps:$4 sm:$0xff]   ;;  %v4895_v13 = vld [vmem:[%s7081_s7 + $0x60] ss:$8 sps:$4 sm:$0xff]  }
 0x279   :  { %v3328_v7 = vadd.f32 %v3316_v58, %v6761_v41  ;;  %3823 = vmatmul.mubr.bf16.vlgmr.msra.gmra.mxu1 %v3337_v11  ;;  %v3315_v60 = vmul.f32 %v4973_v6, %v6888_v4  ;;  %v3341_v41 = vpack.c.bf16 %v3333_v36, %v3333_v36  ;;  %4054 = vmatprep.subr.bf16.mxu0 %v4894_v15  ;;  %v4900_v19 = vld [vmem:[%s7081_s7 + $0x54] ss:$8 sps:$4 sm:$0xff]   ;;  %v4898_v53 = vld [vmem:[%s7081_s7 + $0x50] ss:$8 sps:$4 sm:$0xff]   ;;  %v4903_v58 = vld [vmem:[%s7081_s7 + $0x44] ss:$8 sps:$4 sm:$0xff]  }
 0x27a   :  { %v3342_v55 = vpack.c.bf16 %v3334_v62, %v3334_v62  ;;  %v3323_v51 = vadd.f32 %v3311_v42, %v6746_v29  ;;  %4764 = vmatprep.subr.bf16.mxu1 %v4894_v15  ;;  %v4901_v62 = vld [vmem:[%s7081_s7 + $0x40] ss:$8 sps:$4 sm:$0xff]   ;;  %v4912_v6 = vld [vmem:[%s7081_s7 + $0x14] ss:$8 sps:$4 sm:$0xff]   ;;  %v4910_v25 = vld [vmem:[%s7081_s7 + $0x10] ss:$8 sps:$4 sm:$0xff]  }
 0x27b   :  { %v3336_v61 = vpack.c.bf16 %v3328_v7, %v3324_v17  ;;  %v3327_v18 = vadd.f32 %v3315_v60, %v6756_v39  ;;  %v3412_v39 = vrot.slane %v3407_v0, %v5979_v16  ;;  %4772 = vmatpush1.bf16.msra.mxu1 %v4892_v59  ;;  %v4904_v17 = vld [vmem:[%s7081_s7 + $0x30] ss:$8 sps:$4 sm:$0xff]   ;;  %v4909_v7 = vld [vmem:[%s7081_s7 + $0x24] ss:$8 sps:$4 sm:$0xff]   ;;  %v4907_v42 = vld [vmem:[%s7081_s7 + $0x20] ss:$8 sps:$4 sm:$0xff]  }
 0x27c   :  { %3832 = vmatprep.mubr.bf16.mxu1 %v3342_v55  ;;  %4765 = vmatprep.subr.bf16.mxu1 %v4897_v45  ;;  %v4915_v55 = vld [vmem:[%s7081_s7 + $0x4] ss:$8 sps:$4 sm:$0xff]   ;;  %v4913_v36 = vld [vmem:[%s7081_s7] ss:$8 sps:$4 sm:$0xff]  }
 0x27d   :  { %v4975_v56 = vpop.eup %4974  ;;  %3771 = vmatprep.mubr.bf16.mxu0 %v3336_v61  ;;  %v3335_v33 = vpack.c.bf16 %v3327_v18, %v3323_v51  ;;  %v4733_v15 = vld [vmem:[%s7082_s6] ss:$0 sm:$0xff] }
 0x27e   :  { %v3319_v21 = vmul.f32 %v4975_v56, %v6891_v38 }
 0x27f   :  { %3772 = vmatmul.mubr.bf16.vlgmr.msra.gmra.mxu0 %v3335_v33  ;;  %4773 = vmatpush1.bf16.msra.mxu1 %v4895_v13 }
 0x280   :  { %3781 = vmatprep.mubr.bf16.mxu0 %v3340_v50  ;;  %v3331_v48 = vadd.f32 %v3319_v21, %v6766_v46  ;;  %4055 = vmatpush1.bf16.msra.mxu0 %v4892_v59 }
 0x281   :  { %3833 = vmatmul.mubr.bf16.gmra.mxu1 %v3341_v41  ;;  %4056 = vmatprep.subr.bf16.mxu0 %v4897_v45 }
 0x282   :  { %v3339_v54 = vpack.c.bf16 %v3331_v48, %v3331_v48  ;;  %4096 = vmatprep.mubr.bf16.mxu1 %v5043_v28  ;;  %4766 = vmatprep.subr.bf16.mxu1 %v4900_v19 }
 0x283   :  { %4774 = vmatpush1.bf16.msra.mxu1 %v4898_v53 }
 0x284   :  { %4057 = vmatpush1.bf16.msra.mxu0 %v4895_v13  ;;  %4767 = vmatprep.subr.bf16.mxu1 %v4903_v58  ;;  %v4734_v13 = vld [vmem:[%s7082_s6 + $0x1] ss:$0 sm:$0xff] }
 0x285   :  { %4058 = vmatprep.subr.bf16.mxu0 %v4900_v19 }
 0x287   :  { %3782 = vmatmul.mubr.bf16.gmra.mxu0 %v3339_v54  ;;  %4775 = vmatpush1.bf16.msra.mxu1 %v4901_v62 }
 0x288   :  { %4086 = vmatprep.mubr.bf16.mxu0 %v5043_v28  ;;  %4059 = vmatpush1.bf16.msra.mxu0 %v4898_v53 }
 0x289   :  { %4060 = vmatprep.subr.bf16.mxu0 %v4903_v58  ;;  %4768 = vmatprep.subr.bf16.mxu1 %v4906_v40 }
 0x28b   :  { %4776 = vmatpush1.bf16.msra.mxu1 %v4904_v17 }
 0x28c   :  { %4061 = vmatpush1.bf16.msra.mxu0 %v4901_v62  ;;  %4769 = vmatprep.subr.bf16.mxu1 %v4909_v7 }
 0x28d   :  { %4062 = vmatprep.subr.bf16.mxu0 %v4906_v40 }
 0x28f   :  { %4777 = vmatpush1.bf16.msra.mxu1 %v4907_v42 }
 0x290   :  { %4063 = vmatpush1.bf16.msra.mxu0 %v4904_v17  ;;  %4770 = vmatprep.subr.bf16.mxu1 %v4912_v6 }
 0x291   :  { %4064 = vmatprep.subr.bf16.mxu0 %v4909_v7 }
 0x293   :  { %4778 = vmatpush1.bf16.msra.mxu1 %v4910_v25 }
 0x294   :  { %4065 = vmatpush1.bf16.msra.mxu0 %v4907_v42  ;;  %4771 = vmatprep.subr.bf16.mxu1 %v4915_v55 }
 0x295   :  { %4066 = vmatprep.subr.bf16.mxu0 %v4912_v6 }
 0x297   :  { %4779 = vmatpush1.bf16.msra.mxu1 %v4913_v36 }
 0x298   :  { %4067 = vmatpush1.bf16.msra.mxu0 %v4910_v25 }
 0x299   :  { %4068 = vmatprep.subr.bf16.mxu0 %v4915_v55 }
 0x29c   :  { %4069 = vmatpush1.bf16.msra.mxu0 %v4913_v36 }
 0x339   :  { %v3824_v4 = vpop.f32.mrf.mxu1 }
 0x33b   :  { %v3826_v29 = vpop.f32.mrf.mxu1 }
 0x33d   :  { %v3828_v44 = vpop.f32.mrf.mxu1 }
 0x33f   :  { %v3830_v34 = vpop.f32.mrf.mxu1  ;;  %v3773_v38 = vpop.f32.mrf.mxu0 }
 0x340   :  { %v3774_v27 = vadd.f32 %v3773_v38, %v3412_v39 }
 0x341   :  { %v3834_v32 = vpop.f32.mrf.mxu1  ;;  %v3775_v30 = vpop.f32.mrf.mxu0 }
 0x342   :  { %v6940_v46 = vadd.f32 %v3824_v4, %v3774_v27  ;;  %v3776_v35 = vadd.f32 %v3775_v30, %v3416_v43 }
 0x343   :  { %v3836_v14 = vpop.f32.mrf.mxu1  ;;  %v3777_v9 = vpop.f32.mrf.mxu0 }
 0x344   :  { %v6942_v24 = vadd.f32 %v3826_v29, %v3776_v35  ;;  %v3778_v20 = vadd.f32 %v3777_v9, %v3412_v39  ;;  %3841 = vadd.xlane.f32.xlu0 %v6940_v46  ;;  %v3847_v23 = vmul.f32 %v6940_v46, %v6940_v46 }
 0x345   :  { %v3838_v31 = vpop.f32.mrf.mxu1  ;;  %v3779_v2 = vpop.f32.mrf.mxu0 }
 0x346   :  { %v6945_v47 = vadd.f32 %v3828_v44, %v3778_v20  ;;  %v3780_v12 = vadd.f32 %v3779_v2, %v3416_v43 }
 0x347   :  { %v3839_v10 = vpop.f32.mrf.mxu1  ;;  %v3783_v26 = vpop.f32.mrf.mxu0 }
 0x348   :  { %v6949_v49 = vadd.f32 %v3830_v34, %v3780_v12  ;;  %v3784_v1 = vadd.f32 %v3783_v26, %v3412_v39  ;;  %3843 = vadd.xlane.f32.xlu1 %v6945_v47  ;;  %3850 = vadd.xlane.f32.xlu0 %v3847_v23  ;;  %v3848_v52 = vmul.f32 %v6945_v47, %v6945_v47 }
 0x349   :  { %v3785_v63 = vpop.f32.mrf.mxu0 }
 0x34a   :  { %v6952_v22 = vadd.f32 %v3834_v32, %v3784_v1  ;;  %v3786_v57 = vadd.f32 %v3785_v63, %v3416_v43 }
 0x34b   :  { %v3787_v37 = vpop.f32.mrf.mxu0 }
 0x34c   :  { %v6956_v11 = vadd.f32 %v3836_v14, %v3786_v57  ;;  %3852 = vadd.xlane.f32.xlu1 %v3848_v52  ;;  %3845 = vadd.xlane.f32.xlu0 %v6952_v22  ;;  %v3849_v3 = vmul.f32 %v6952_v22, %v6952_v22 }
 0x34d   :  { %v3788_v5 = vpop.f32.mrf.mxu0 }
 0x350   :  { %3854 = vadd.xlane.f32.xlu1 %v3849_v3 }
 0x3cd   :  { %v3842_v61 = vpop.xlane.xlu0 %3841 }
 0x3ce   :  { %v3856_v60 = vmul.f32 0.011904762, %v3842_v61 }
 0x3d0   :  { %v3862_v18 = vmul.f32 %v3856_v60, %v3856_v60  ;;  %v3900_v59 = vsub.f32 %v6940_v46, %v3856_v60 }
 0x3d1   :  { %v3844_v56 = vpop.xlane.xlu1 %3843  ;;  %v3851_v51 = vpop.xlane.xlu0 %3850 }
 0x3d2   :  { %v3859_v50 = vmul.f32 0.011904762, %v3851_v51  ;;  %v3857_v41 = vmul.f32 0.011904762, %v3844_v56 }
 0x3d4   :  { %v3865_v33 = vsub.f32 %v3859_v50, %v3862_v18  ;;  %v3863_v29 = vmul.f32 %v3857_v41, %v3857_v41  ;;  %v3901_v53 = vsub.f32 %v6945_v47, %v3857_v41 }
 0x3d5   :  { %v3853_v21 = vpop.xlane.xlu1 %3852  ;;  %v3846_v48 = vpop.xlane.xlu0 %3845 }
 0x3d6   :  { %v3868_v54 = vmax.f32 %v3865_v33, 0.0  ;;  %v3860_v4 = vmul.f32 0.011904762, %v3853_v21  ;;  %v3858_v0 = vmul.f32 0.011904762, %v3846_v48 }
 0x3d8   :  { %4976 = vrsqrt.f32 %v3868_v54  ;;  %v3866_v44 = vsub.f32 %v3860_v4, %v3863_v29  ;;  %v3864_v34 = vmul.f32 %v3858_v0, %v3858_v0  ;;  %vm3873_vm6 = vcmp.eq.f32.partialorder %v3868_v54, inf }
 0x3d9   :  { %v3855_v39 = vpop.xlane.xlu1 %3854  ;;  %v3876_v35 = vand.u32 2147483648, %v3868_v54  ;;  %vm3875_vm7 = vcmp.eq.f32.partialorder %v3868_v54, 0.0  ;;  %v3902_v17 = vsub.f32 %v6952_v22, %v3858_v0 }
 0x3da   :  { %v3861_v43 = vmul.f32 0.011904762, %v3855_v39  ;;  %v3869_v38 = vmax.f32 %v3866_v44, 0.0 }
 0x3dc   :  { %v3867_v32 = vsub.f32 %v3861_v43, %v3864_v34  ;;  %4978 = vrsqrt.f32 %v3869_v38  ;;  %vm3880_vm8 = vcmp.eq.f32.partialorder %v3869_v38, inf  ;;  %v3883_v12 = vand.u32 2147483648, %v3869_v38  ;;  %v7024_v43 = vld [vmem:[%s7083_s8] sm:$0x3] }
 0x3dd   :  { %vm3882_vm9 = vcmp.eq.f32.partialorder %v3869_v38, 0.0 }
 0x3de   :  { %v3870_v27 = vmax.f32 %v3867_v32, 0.0 }
 0x3e0   :  { %4980 = vrsqrt.f32 %v3870_v27  ;;  %vm3887_vm10 = vcmp.eq.f32.partialorder %v3870_v27, inf  ;;  %v3890_v52 = vand.u32 2147483648, %v3870_v27  ;;  %vm3889_vm11 = vcmp.eq.f32.partialorder %v3870_v27, 0.0 }
 0x3e5   :  { %v4977_v30 = vpop.eup %4976 }
 0x3e6   :  { %v3872_v14 = vmul.f32 %v4977_v30, %v3868_v54 }
 0x3e8   :  { %v3874_v9 = vsel %vm3873_vm6, %v3868_v54, %v3872_v14 }
 0x3e9   :  { %v3877_v31 = vsel %vm3875_vm7, %v3876_v35, %v3874_v9  ;;  %v4979_v20 = vpop.eup %4978 }
 0x3ea   :  { %v3892_v2 = vadd.f32 1e-05, %v3877_v31  ;;  %v3879_v10 = vmul.f32 %v4979_v20, %v3869_v38 }
 0x3ec   :  { %4982 = vrcp.f32 %v3892_v2  ;;  %v3881_v26 = vsel %vm3880_vm8, %v3869_v38, %v3879_v10  ;;  %v3967_v38 = vrot.slane %v7024_v43, %v5979_v16  ;;  %v17_v10 = vstv %s7084_s11 }
 0x3ed   :  { %v4981_v23 = vpop.eup %4980  ;;  %v3884_v1 = vsel %vm3882_vm9, %v3883_v12, %v3881_v26  ;;  %18 = vst [vmem:[#allocation2] sm:$0x1] %v17_v10 }
 0x3ee   :  { %v3886_v63 = vmul.f32 %v4981_v23, %v3870_v27  ;;  %v3893_v57 = vadd.f32 1e-05, %v3884_v1 }
 0x3f0   :  { %v3888_v37 = vsel %vm3887_vm10, %v3870_v27, %v3886_v63  ;;  %4984 = vrcp.f32 %v3893_v57 }
 0x3f1   :  { %v3891_v5 = vsel %vm3889_vm11, %v3890_v52, %v3888_v37 }
 0x3f2   :  { %v3894_v3 = vadd.f32 1e-05, %v3891_v5 }
 0x3f4   :  { %4986 = vrcp.f32 %v3894_v3 }
 0x3f9   :  { %v4983_v28 = vpop.eup %4982 }
 0x3fa   :  { %v3903_v45 = vmul.f32 %v4983_v28, %v3900_v59 }
 0x3fc   :  { %v3910_v19 = vmul.f32 %v4733_v15, %v3903_v45 }
 0x3fd   :  { %v4985_v58 = vpop.eup %4984 }
 0x3fe   :  { %v3917_v62 = vadd.f32 %v4734_v13, %v3910_v19  ;;  %v3904_v40 = vmul.f32 %v4985_v58, %v3901_v53 }
 0x400   :  { %v4735_v7 = vmul.f32 -1.442695, %v3917_v62  ;;  %v3911_v42 = vmul.f32 %v4733_v15, %v3904_v40 }
 0x401   :  { %v4987_v46 = vpop.eup %4986 }
 0x402   :  { %4988 = vpow2.f32 %v4735_v7  ;;  %v3905_v6 = vmul.f32 %v4987_v46, %v3902_v17  ;;  %v3918_v25 = vadd.f32 %v4734_v13, %v3911_v42 }
 0x404   :  { %v3912_v55 = vmul.f32 %v4733_v15, %v3905_v6  ;;  %v4736_v36 = vmul.f32 -1.442695, %v3918_v25 }
 0x406   :  { %v3919_v61 = vadd.f32 %v4734_v13, %v3912_v55  ;;  %4990 = vpow2.f32 %v4736_v36 }
 0x408   :  { %v4737_v60 = vmul.f32 -1.442695, %v3919_v61 }
 0x40a   :  { %4992 = vpow2.f32 %v4737_v60 }
 0x40f   :  { %v4989_v56 = vpop.eup %4988 }
 0x410   :  { %v3929_v51 = vadd.f32 1.0, %v4989_v56 }
 0x412   :  { %4994 = vrcp.f32 %v3929_v51 }
 0x413   :  { %v4991_v47 = vpop.eup %4990 }
 0x414   :  { %v3930_v18 = vadd.f32 1.0, %v4991_v47 }
 0x416   :  { %4996 = vrcp.f32 %v3930_v18 }
 0x417   :  { %v4993_v50 = vpop.eup %4992 }
 0x418   :  { %v3931_v22 = vadd.f32 1.0, %v4993_v50 }
 0x41a   :  { %4998 = vrcp.f32 %v3931_v22 }
 0x41f   :  { %v4995_v41 = vpop.eup %4994 }
 0x420   :  { %v3938_v33 = vmul.f32 %v4995_v41, %v3917_v62 }
 0x422   :  { %v3941_v4 = vadd.f32 %v3938_v33, %v6942_v24 }
 0x423   :  { %v4997_v21 = vpop.eup %4996 }
 0x424   :  { %v3939_v48 = vmul.f32 %v4997_v21, %v3918_v25 }
 0x426   :  { %v3942_v0 = vadd.f32 %v3939_v48, %v6949_v49 }
 0x427   :  { %v4999_v54 = vpop.eup %4998 }
 0x428   :  { %v3940_v29 = vmul.f32 %v4999_v54, %v3919_v61  ;;  %v3944_v44 = vpack.c.bf16 %v3942_v0, %v3941_v4  ;;  %v4754_v4 = vld [vmem:[%s7085_s9] ss:$0 sm:$0xff] }
 0x42a   :  { %v3943_v39 = vadd.f32 %v3940_v29, %v6956_v11  ;;  %4087 = vmatmul.mubr.bf16.vlgmr.msra.gmra.mxu0 %v3944_v44  ;;  %v4755_v29 = vld [vmem:[%s7085_s9 + $0x1] ss:$0 sm:$0xff] }
 0x42c   :  { %v3945_v34 = vpack.c.bf16 %v3943_v39, %v3943_v39 }
 0x42e   :  { %4097 = vmatmul.mubr.bf16.vlgmr.msra.gmra.mxu1 %v3945_v34 }
 0x4ea   :  { %v4088_v32 = vpop.f32.mrf.mxu0 }
 0x4eb   :  { %v7028_v27 = vadd.f32 %v4088_v32, %v3967_v38 }
 0x4ec   :  { %v7030_v24 = vpop.f32.mrf.mxu0 }
 0x4ed   :  { %4105 = vadd.xlane.f32.xlu0 %v7028_v27  ;;  %v4111_v11 = vmul.f32 %v7028_v27, %v7028_v27 }
 0x4ee   :  { %v4098_v49 = vpop.f32.mrf.mxu1  ;;  %v4092_v30 = vpop.f32.mrf.mxu0 }
 0x4ef   :  { %v7035_v14 = vadd.f32 %v4098_v49, %v3967_v38  ;;  %v7037_v35 = vadd.f32 %v4092_v30, %v3967_v38  ;;  %4114 = vadd.xlane.f32.xlu1 %v4111_v11 }
 0x4f0   :  { %v7039_v9 = vpop.f32.mrf.mxu1 }
 0x4f1   :  { %4109 = vadd.xlane.f32.xlu0 %v7035_v14  ;;  %v4112_v20 = vmul.f32 %v7037_v35, %v7037_v35  ;;  %v4113_v2 = vmul.f32 %v7035_v14, %v7035_v14 }
 0x4f2   :  { %v4102_v16 = vpop.f32.mrf.mxu1 }
 0x4f3   :  { %4107 = vadd.xlane.f32.xlu1 %v7037_v35 }
 0x4f4   :  { %v4103_v31 = vpop.f32.mrf.mxu1 }
 0x4f5   :  { %4116 = vadd.xlane.f32.xlu0 %v4112_v20 }
 0x4f7   :  { %4118 = vadd.xlane.f32.xlu1 %v4113_v2 }
 0x576   :  { %v4106_v12 = vpop.xlane.xlu0 %4105 }
 0x577   :  { %v4120_v23 = vmul.f32 0.0625, %v4106_v12 }
 0x578   :  { %v4115_v26 = vpop.xlane.xlu1 %4114 }
 0x579   :  { %v4126_v1 = vmul.f32 %v4120_v23, %v4120_v23  ;;  %v4123_v63 = vmul.f32 0.0625, %v4115_v26  ;;  %v4164_v48 = vsub.f32 %v7028_v27, %v4120_v23 }
 0x57a   :  { %v4110_v57 = vpop.xlane.xlu0 %4109 }
 0x57b   :  { %v4129_v52 = vsub.f32 %v4123_v63, %v4126_v1  ;;  %v4122_v3 = vmul.f32 0.0625, %v4110_v57  ;;  %v3971_v57 = vrot.slane %v7024_v43, %v5987_v8 }
 0x57c   :  { %v4108_v37 = vpop.xlane.xlu1 %4107 }
 0x57d   :  { %v4132_v5 = vmax.f32 %v4129_v52, 0.0  ;;  %v4121_v59 = vmul.f32 0.0625, %v4108_v37  ;;  %v4128_v19 = vmul.f32 %v4122_v3, %v4122_v3  ;;  %v4166_v32 = vsub.f32 %v7035_v14, %v4122_v3  ;;  %v4759_v3 = vld [vmem:[%s7086_s10] ss:$0 sm:$0xff] }
 0x57e   :  { %v4117_v28 = vpop.xlane.xlu0 %4116  ;;  %v4091_v37 = vadd.f32 %v7030_v24, %v3971_v57 }
 0x57f   :  { %5000 = vrsqrt.f32 %v4132_v5  ;;  %v4127_v15 = vmul.f32 %v4121_v59, %v4121_v59  ;;  %v4124_v45 = vmul.f32 0.0625, %v4117_v28  ;;  %vm4137_vm12 = vcmp.eq.f32.partialorder %v4132_v5, inf  ;;  %v4094_v28 = vpop.f32.mrf.mxu0 }
 0x580   :  { %v4119_v13 = vpop.xlane.xlu1 %4118  ;;  %v4140_v42 = vand.u32 2147483648, %v4132_v5  ;;  %vm4139_vm13 = vcmp.eq.f32.partialorder %v4132_v5, 0.0  ;;  %v4165_v34 = vsub.f32 %v7037_v35, %v4121_v59 }
 0x581   :  { %v4125_v53 = vmul.f32 0.0625, %v4119_v13  ;;  %v4130_v58 = vsub.f32 %v4124_v45, %v4127_v15 }
 0x583   :  { %v4131_v62 = vsub.f32 %v4125_v53, %v4128_v19  ;;  %v4133_v40 = vmax.f32 %v4130_v58, 0.0  ;;  %v4095_v19 = vadd.f32 %v4094_v28, %v3971_v57  ;;  %v4101_v58 = vadd.f32 %v7039_v9, %v3971_v57 }
 0x585   :  { %v4134_v17 = vmax.f32 %v4131_v62, 0.0  ;;  %5002 = vrsqrt.f32 %v4133_v40  ;;  %vm4144_vm14 = vcmp.eq.f32.partialorder %v4133_v40, inf  ;;  %v4147_v56 = vand.u32 2147483648, %v4133_v40 }
 0x586   :  { %vm4146_vm15 = vcmp.eq.f32.partialorder %v4133_v40, 0.0 }
 0x587   :  { %5004 = vrsqrt.f32 %v4134_v17  ;;  %vm4151_vm0 = vcmp.eq.f32.partialorder %v4134_v17, inf  ;;  %v4154_v18 = vand.u32 2147483648, %v4134_v17  ;;  %vm4153_vm1 = vcmp.eq.f32.partialorder %v4134_v17, 0.0 }
 0x58c   :  { %v5001_v7 = vpop.eup %5000 }
 0x58d   :  { %v4136_v46 = vmul.f32 %v5001_v7, %v4132_v5 }
 0x58f   :  { %v4138_v6 = vsel %vm4137_vm12, %v4132_v5, %v4136_v46 }
 0x590   :  { %v4141_v25 = vsel %vm4139_vm13, %v4140_v42, %v4138_v6 }
 0x591   :  { %v4156_v55 = vadd.f32 1e-05, %v4141_v25 }
 0x592   :  { %v5003_v36 = vpop.eup %5002 }
 0x593   :  { %5006 = vrcp.f32 %v4156_v55  ;;  %v4143_v60 = vmul.f32 %v5003_v36, %v4133_v40 }
 0x594   :  { %v5005_v61 = vpop.eup %5004 }
 0x595   :  { %v4150_v51 = vmul.f32 %v5005_v61, %v4134_v17  ;;  %v4145_v47 = vsel %vm4144_vm14, %v4133_v40, %v4143_v60 }
 0x596   :  { %v4148_v50 = vsel %vm4146_vm15, %v4147_v56, %v4145_v47 }
 0x597   :  { %v4152_v22 = vsel %vm4151_vm0, %v4134_v17, %v4150_v51  ;;  %v4157_v41 = vadd.f32 1e-05, %v4148_v50  ;;  %v4760_v17 = vld [vmem:[#allocation2] ss:$0 sm:$0xff] }
 0x598   :  { %v4155_v33 = vsel %vm4153_vm1, %v4154_v18, %v4152_v22 }
 0x599   :  { %v4158_v21 = vadd.f32 1e-05, %v4155_v33  ;;  %5008 = vrcp.f32 %v4157_v41 }
 0x59b   :  { %5010 = vrcp.f32 %v4158_v21 }
 0x5a0   :  { %v5007_v54 = vpop.eup %5006 }
 0x5a1   :  { %v4167_v0 = vmul.f32 %v5007_v54, %v4164_v48 }
 0x5a3   :  { %v4174_v44 = vmul.f32 %v4754_v4, %v4167_v0 }
 0x5a5   :  { %v4181_v39 = vadd.f32 %v4755_v29, %v4174_v44 }
 0x5a6   :  { %v5009_v38 = vpop.eup %5008 }
 0x5a7   :  { %v4756_v49 = vmul.f32 -1.442695, %v4181_v39  ;;  %v4168_v27 = vmul.f32 %v5009_v38, %v4165_v34 }
 0x5a8   :  { %v5011_v11 = vpop.eup %5010 }
 0x5a9   :  { %5012 = vpow2.f32 %v4756_v49  ;;  %v4169_v30 = vmul.f32 %v5011_v11, %v4166_v32  ;;  %v4175_v16 = vmul.f32 %v4754_v4, %v4168_v27 }
 0x5ab   :  { %v4176_v31 = vmul.f32 %v4754_v4, %v4169_v30  ;;  %v4182_v20 = vadd.f32 %v4755_v29, %v4175_v16 }
 0x5ad   :  { %v4183_v2 = vadd.f32 %v4755_v29, %v4176_v31  ;;  %v4757_v10 = vmul.f32 -1.442695, %v4182_v20 }
 0x5af   :  { %v4758_v12 = vmul.f32 -1.442695, %v4183_v2  ;;  %5014 = vpow2.f32 %v4757_v10 }
 0x5b1   :  { %5016 = vpow2.f32 %v4758_v12 }
 0x5b6   :  { %v5013_v23 = vpop.eup %5012 }
 0x5b7   :  { %v4193_v26 = vadd.f32 1.0, %v5013_v23 }
 0x5b9   :  { %5018 = vrcp.f32 %v4193_v26 }
 0x5bc   :  { %v5015_v35 = vpop.eup %5014 }
 0x5bd   :  { %v4194_v63 = vadd.f32 1.0, %v5015_v35 }
 0x5be   :  { %v5017_v1 = vpop.eup %5016 }
 0x5bf   :  { %v4195_v14 = vadd.f32 1.0, %v5017_v1  ;;  %5020 = vrcp.f32 %v4194_v63 }
 0x5c1   :  { %5022 = vrcp.f32 %v4195_v14 }
 0x5c6   :  { %v5019_v52 = vpop.eup %5018 }
 0x5c7   :  { %v4202_v5 = vmul.f32 %v5019_v52, %v4181_v39 }
 0x5c9   :  { %v4205_v59 = vadd.f32 %v4202_v5, %v4091_v37 }
 0x5cb   :  { %v4215_v15 = vmul.f32 %v4759_v3, %v4205_v59 }
 0x5cc   :  { %v5021_v45 = vpop.eup %5020 }
 0x5cd   :  { %4218 = vadd.xlane.f32.xlu0 %v4215_v15  ;;  %v4203_v53 = vmul.f32 %v5021_v45, %v4182_v20 }
 0x5ce   :  { %v5023_v13 = vpop.eup %5022 }
 0x5cf   :  { %v4204_v62 = vmul.f32 %v5023_v13, %v4183_v2  ;;  %v4206_v8 = vadd.f32 %v4203_v53, %v4095_v19 }
 0x5d1   :  { %v4207_v43 = vadd.f32 %v4204_v62, %v4101_v58  ;;  %v4216_v40 = vmul.f32 %v4759_v3, %v4206_v8 }
 0x5d3   :  { %v4217_v24 = vmul.f32 %v4759_v3, %v4207_v43  ;;  %4220 = vadd.xlane.f32.xlu1 %v4216_v40 }
 0x5d5   :  { %4222 = vadd.xlane.f32.xlu0 %v4217_v24 }
 0x656   :  { %v4219_v7 = vpop.xlane.xlu0 %4218 }
 0x657   :  { %v4231_v46 = vadd.f32 %v4760_v17, %v4219_v7 }
 0x659   :  { %v4761_v42 = vmul.f32 -1.442695, %v4231_v46 }
 0x65b   :  { %5024 = vpow2.f32 %v4761_v42 }
 0x65c   :  { %v4221_v6 = vpop.xlane.xlu1 %4220 }
 0x65d   :  { %v4232_v25 = vadd.f32 %v4760_v17, %v4221_v6 }
 0x65e   :  { %v4223_v55 = vpop.xlane.xlu0 %4222 }
 0x65f   :  { %v4233_v36 = vadd.f32 %v4760_v17, %v4223_v55  ;;  %v4762_v61 = vmul.f32 -1.442695, %v4232_v25 }
 0x661   :  { %v4763_v60 = vmul.f32 -1.442695, %v4233_v36  ;;  %5026 = vpow2.f32 %v4762_v61 }
 0x663   :  { %5028 = vpow2.f32 %v4763_v60 }
 0x668   :  { %v5025_v9 = vpop.eup %5024 }
 0x669   :  { %v4243_v56 = vadd.f32 1.0, %v5025_v9 }
 0x66b   :  { %5030 = vrcp.f32 %v4243_v56 }
 0x66e   :  { %v5027_v51 = vpop.eup %5026 }
 0x66f   :  { %v4244_v18 = vadd.f32 1.0, %v5027_v51 }
 0x670   :  { %v5029_v47 = vpop.eup %5028 }
 0x671   :  { %v4245_v50 = vadd.f32 1.0, %v5029_v47  ;;  %5032 = vrcp.f32 %v4244_v18 }
 0x673   :  { %5034 = vrcp.f32 %v4245_v50 }
 0x678   :  { %v5031_v22 = vpop.eup %5030 }
 0x679   :  { %4253 = vst.msk [vmem:[%s7087_s12] sm:$0xff] %vm4252_vm2, %v5031_v22 }
 0x67e   :  { %v5033_v41 = vpop.eup %5032 }
 0x67f   :  { %4254 = vst.msk [vmem:[%s7087_s12 + $0x8] sm:$0xff] %vm4252_vm2, %v5033_v41 }
 0x680   :  { %v5035_v33 = vpop.eup %5034 }
 0x681   :  { %4255 = vst.msk [vmem:[%s7087_s12 + $0x10] sm:$0xff] %vm4252_vm2, %v5035_v33 }

</bundles_post_ra>
